<compile_context>
chip_gen: v6e
topology: v6e:2x2x1
jax: 0.10.0
libtpu: 0.0.40
codegen_flags: <defaults>
</compile_context>

<pallas_src>
import functools

import numpy as np
import jax
import jax.numpy as jnp
from jax.experimental import pallas as pl
from jax.experimental.pallas import tpu as pltpu


# ------------------------------ fused kernel -------------------------------

def _mnist_fused_kernel(x_ref, w1_ref, b1_ref, w2_ref, b2_ref,
                        wf1_ref, bf1_ref, wf2_ref, bf2_ref, out_ref, *, fuse_k):
    """Whole MNIST_NET forward for one batch tile; all activations stay in VMEM.

    x_ref  : [1, 28, BT, 32] bf16  input, layout (H, batch, W zero-padded 28->32)
    w1_ref : [160, 256] bf16  conv1 K-fused Toeplitz: row k = i*32 + x_in,
                              col n = dx*128 + xo*10 + o   (conv x = 2*xo + dx)
    b1_ref : [1, 128]  f32    conv1 bias tiled over pooled-x, pad lanes = 0
    w2_ref : [640, 256] bf16  conv2 K-fused: row k = i*128 + x_in*10 + c,
                              col n = dx*128 + x2*20 + o
    b2_ref : [1, 128]  f32
    wf1_ref: [512, 64] bf16   fc1 (flatten folded in): row k = y2*128 + x2*20 + c,
                              N padded 50 -> 64
    bf1_ref: [1, 64]   f32
    wf2_ref: [64, 128] bf16   fc2: K padded 50 -> 64, N padded 10 -> 128
    bf2_ref: [1, 128]  f32    pad lanes = -1e30 so log_softmax ignores them
    out_ref: [BT, 128] f32    log-probs in lanes [:10]
    """
    xt = x_ref[0]                                     # [28, BT, 32] bf16
    bt = xt.shape[1]
    f32 = jnp.float32

    w1 = w1_ref[...]
    w2 = w2_ref[...]
    wf1 = wf1_ref[...]
    wf2 = wf2_ref[...]

    # ---- conv1 (5x5 valid, 1 -> 10 ch): one K=160 MXU pass -----------------
    # c1 rows = (Y1, b), Y1 in [0,24); cols = (dx, xo, o) in two 128-lane halves.
    p1 = [xt[i:i + 24].reshape(24 * bt, 32) for i in range(5)]
    if fuse_k:
        c1 = jnp.dot(jnp.concatenate(p1, axis=-1), w1,
                     preferred_element_type=f32)                      # [24*BT, 256]
    else:  # fallback: 5 shifted K=32 matmuls accumulated in f32
        c1 = jnp.dot(p1[0], w1[0:32, :], preferred_element_type=f32)
        for i in range(1, 5):
            c1 = c1 + jnp.dot(p1[i], w1[i * 32:(i + 1) * 32, :],
                              preferred_element_type=f32)

    # ---- 2x2 max-pool + bias + ReLU (per-channel bias commutes with max) ---
    cw = jnp.maximum(c1[:, :128], c1[:, 128:])        # pool over W: aligned halves
    cw = cw.reshape(12, 2, bt, 128)                   # (yo, dy, b, xo*10+o)
    a1 = jnp.maximum(cw[:, 0], cw[:, 1])              # pool over H -> [12, BT, 128]
    a1 = jnp.maximum(a1 + b1_ref[...], 0.0).astype(jnp.bfloat16)
    # TODO(synk): Dropout2d(0.3) after conv2 / F.dropout after fcn1 are identity in
    # eval mode; training-mode stochastic masking not implemented.

    # ---- conv2 (5x5 valid, 10 -> 20 ch): one K=640 matmul (aligned concat) --
    p2 = [a1[i:i + 8].reshape(8 * bt, 128) for i in range(5)]
    if fuse_k:
        c2 = jnp.dot(jnp.concatenate(p2, axis=-1), w2,
                     preferred_element_type=f32)                      # [8*BT, 256]
    else:
        c2 = jnp.dot(p2[0], w2[0:128, :], preferred_element_type=f32)
        for i in range(1, 5):
            c2 = c2 + jnp.dot(p2[i], w2[i * 128:(i + 1) * 128, :],
                              preferred_element_type=f32)

    cw2 = jnp.maximum(c2[:, :128], c2[:, 128:])       # pool over W
    cw2 = cw2.reshape(4, 2, bt, 128)                  # (y2, dy, b, x2*20+o)
    a2 = jnp.maximum(cw2[:, 0], cw2[:, 1])            # pool over H -> [4, BT, 128]
    a2 = jnp.maximum(a2 + b2_ref[...], 0.0).astype(jnp.bfloat16)

    # ---- fc1 (320 -> 50, padded): flatten folded into wf1, one K=512 matmul -
    p3 = [a2[y] for y in range(4)]
    if fuse_k:
        h = jnp.dot(jnp.concatenate(p3, axis=-1), wf1,
                    preferred_element_type=f32)                       # [BT, 64]
    else:
        h = jnp.dot(p3[0], wf1[0:128, :], preferred_element_type=f32)
        for y in range(1, 4):
            h = h + jnp.dot(p3[y], wf1[y * 128:(y + 1) * 128, :],
                            preferred_element_type=f32)
    h = jnp.maximum(h + bf1_ref[...], 0.0).astype(jnp.bfloat16)

    # ---- fc2 (50 -> 10, padded to 128 lanes) + log_softmax -----------------
    logits = jnp.dot(h, wf2, preferred_element_type=f32) + bf2_ref[...]   # [BT, 128]
    m = jnp.max(logits, axis=-1, keepdims=True)       # pad lanes are -1e30 -> ignored
    z = logits - m
    lse = jnp.log(jnp.sum(jnp.exp(z), axis=-1, keepdims=True))
    out_ref[...] = z - lse                            # lane-dense (unmasked) store


# ------------------------------ host wrapper -------------------------------

def _pick_block_batch(B):
    # Largest batch tile (multiple of 8) that still yields >= 2 grid steps so
    # both v7x TensorCores get work under "parallel" semantics; capped at 256
    # so per-step f32 intermediates (~20 MB at bt=256) stay well inside v7x's
    # 64 MiB VMEM.  v5e/v6e (128 MiB) are comfortable at every choice.
    for cand in (256, 128, 64, 32, 16, 8):
        if B >= 2 * cand:
            return cand
    return 8


@functools.partial(jax.jit, static_argnames=("fuse",))
def _forward(x_nchw, packed, *, fuse):
    """x_nchw: [B, 1, 28, 28] -> log-probs [B, 10]."""
    B = x_nchw.shape[0]
    x = x_nchw.reshape(B, 28, 28).astype(jnp.float32)

    bt = _pick_block_batch(B)
    n_tiles = max(2, pl.cdiv(B, bt))          # >= 2 grid steps (v7x megacore)
    b_pad = n_tiles * bt

    # Pad batch -> b_pad and W 28 -> 32 (zero pad; matching conv1 weight rows are
    # zero), then pre-tile as [n_tiles, 28, bt, 32] so every grid step's input
    # block is ONE contiguous HBM DMA.  Cast to bf16 once (MXU operand dtype).
    x = jnp.pad(x, ((0, b_pad - B), (0, 0), (0, 4)))
    xt = jnp.transpose(x.reshape(n_tiles, bt, 28, 32),
                       (0, 2, 1, 3)).astype(jnp.bfloat16)            # [T, 28, bt, 32]

    kernel = functools.partial(_mnist_fused_kernel, fuse_k=fuse)

    out = pl.pallas_call(
        kernel,
        out_shape=jax.ShapeDtypeStruct((b_pad, 128), jnp.float32),
        grid_spec=pltpu.PrefetchScalarGridSpec(
            num_scalar_prefetch=0,
            grid=(n_tiles,),
            in_specs=[
                pl.BlockSpec((1, 28, bt, 32), lambda b: (b, 0, 0, 0)),  # input tile
                pl.BlockSpec((160, 256), lambda b: (0, 0)),             # conv1 w (resident)
                pl.BlockSpec((1, 128), lambda b: (0, 0)),               # conv1 b
                pl.BlockSpec((640, 256), lambda b: (0, 0)),             # conv2 w
                pl.BlockSpec((1, 128), lambda b: (0, 0)),               # conv2 b
                pl.BlockSpec((512, 64), lambda b: (0, 0)),              # fc1 w
                pl.BlockSpec((1, 64), lambda b: (0, 0)),                # fc1 b
                pl.BlockSpec((64, 128), lambda b: (0, 0)),              # fc2 w
                pl.BlockSpec((1, 128), lambda b: (0, 0)),               # fc2 b
            ],
            out_specs=pl.BlockSpec((bt, 128), lambda b: (b, 0)),
        ),
        compiler_params=pltpu.CompilerParams(
            dimension_semantics=("parallel",),       # shard batch tiles over TCs (v7x)
            vmem_limit_bytes=48 * 1024 * 1024,
        ),
    )(xt, packed["w1"], packed["b1"], packed["w2"], packed["b2"],
      packed["wf1"], packed["bf1"], packed["wf2"], packed["bf2"])

    return out[:B, :10]


_CONCAT_FUSION_OK = None  # decided once, on the first call


def mnist_net_forward(x_nchw, packed):
    """Public entry: [B, 1, 28, 28] -> log-probs [B, 10]."""
    global _CONCAT_FUSION_OK
    if _CONCAT_FUSION_OK is None:
        try:
            out = _forward(x_nchw, packed, fuse=True)
            out = jax.block_until_ready(out)
            _CONCAT_FUSION_OK = True
            return out
        except Exception:
            # Lane-axis concatenation not lowerable on this toolchain: fall back to
            # the accumulate-over-shifts formulation (identical numerics).
            _CONCAT_FUSION_OK = False
    return _forward(x_nchw, packed, fuse=_CONCAT_FUSION_OK)


# --------------------- one-time weight packing (init) ----------------------

def pack_params(p):
    """PyTorch-layout params -> kernel layout (done once, outside the hot path)."""
    w1 = np.asarray(p["w_conv1"], np.float32)   # [10, 1, 5, 5]
    b1 = np.asarray(p["b_conv1"], np.float32)   # [10]
    w2 = np.asarray(p["w_conv2"], np.float32)   # [20, 10, 5, 5]
    b2 = np.asarray(p["b_conv2"], np.float32)   # [20]
    wf1 = np.asarray(p["w_fc1"], np.float32)    # [50, 320]
    bf1 = np.asarray(p["b_fc1"], np.float32)    # [50]
    wf2 = np.asarray(p["w_fc2"], np.float32)    # [10, 50]
    bf2 = np.asarray(p["b_fc2"], np.float32)    # [10]

    # conv1 K-fused Toeplitz [5*32, 256]: row k = i*32 + x_in (x_in = 2*xo+dx+j,
    # W padded 28->32 with zero rows), col n = dx*128 + xo*10 + o.  The two
    # pool-x phases land in separate 128-lane halves (aligned W-pooling).
    w1p = np.zeros((160, 256), np.float32)
    for o in range(10):
        for i in range(5):
            for j in range(5):
                for xo in range(12):
                    for dx in range(2):
                        x_in = 2 * xo + dx + j                  # in [0, 28)
                        w1p[i * 32 + x_in, dx * 128 + xo * 10 + o] = w1[o, 0, i, j]
    b1p = np.zeros((1, 128), np.float32)
    b1p[0, :120] = np.tile(b1, 12)

    # conv2 K-fused Toeplitz [5*128, 256] over conv1 activations packed as
    # (pooled-x*10 + c, pad to 128): row k = i*128 + x_in*10 + c,
    # col n = dx*128 + x2*20 + o (conv2 x = 2*x2 + dx).
    w2p = np.zeros((640, 256), np.float32)
    for o in range(20):
        for c in range(10):
            for i in range(5):
                for j in range(5):
                    for x2 in range(4):
                        for dx in range(2):
                            x_in = 2 * x2 + dx + j              # in [0, 12)
                            w2p[i * 128 + x_in * 10 + c,
                                dx * 128 + x2 * 20 + o] = w2[o, c, i, j]
    b2p = np.zeros((1, 128), np.float32)
    b2p[0, :80] = np.tile(b2, 4)

    # fc1 [4*128, 64]: torch flattens NCHW (c*16 + y*4 + x); our activation slab
    # column is y*128 + x*20 + c.  N padded 50 -> 64 with zeros.
    wf1_r = wf1.reshape(50, 20, 4, 4)            # [n, c, y, x]
    wf1_r = np.transpose(wf1_r, (2, 3, 1, 0))    # [y, x, c, n]
    wf1p = np.zeros((4, 128, 64), np.float32)
    wf1p[:, :80, :50] = wf1_r.reshape(4, 80, 50)
    wf1p = wf1p.reshape(512, 64)
    bf1p = np.zeros((1, 64), np.float32)
    bf1p[0, :50] = bf1

    # fc2 [64, 128]: K padded 50 -> 64 (zero rows), N padded 10 -> 128.  The pad
    # output lanes get bias -1e30 so the in-kernel log_softmax ignores them.
    wf2p = np.zeros((64, 128), np.float32)
    wf2p[:50, :10] = wf2.T
    bf2p = np.full((1, 128), -1e30, np.float32)
    bf2p[0, :10] = bf2

    bf16 = jnp.bfloat16
    return {
        "w1": jnp.asarray(w1p, bf16), "b1": jnp.asarray(b1p, jnp.float32),
        "w2": jnp.asarray(w2p, bf16), "b2": jnp.asarray(b2p, jnp.float32),
        "wf1": jnp.asarray(wf1p, bf16), "bf1": jnp.asarray(bf1p, jnp.float32),
        "wf2": jnp.asarray(wf2p, bf16), "bf2": jnp.asarray(bf2p, jnp.float32),
    }


# ------------------------- reference / init helpers ------------------------

def _reference_forward(x_nchw, p):
    """Pure-JAX f32 reference with PyTorch semantics (eval mode)."""
    x = x_nchw.astype(jnp.float32)

    def conv(x, w, b):
        y = jax.lax.conv_general_dilated(
            x, w, (1, 1), "VALID", dimension_numbers=("NCHW", "OIHW", "NCHW"))
        return y + b[None, :, None, None]

    def pool_relu(y):
        B, C, H, W = y.shape
        y = y.reshape(B, C, H // 2, 2, W // 2, 2).max(axis=(3, 5))
        return jax.nn.relu(y)

    y = pool_relu(conv(x, p["w_conv1"], p["b_conv1"]))
    y = pool_relu(conv(y, p["w_conv2"], p["b_conv2"]))
    y = y.reshape(y.shape[0], 320)
    y = jax.nn.relu(y @ p["w_fc1"].T + p["b_fc1"])
    y = y @ p["w_fc2"].T + p["b_fc2"]
    return jax.nn.log_softmax(y, axis=-1)


def init_params(key):
    ks = jax.random.split(key, 8)
    s = lambda fan_in: 1.0 / np.sqrt(fan_in)
    return {
        "w_conv1": jax.random.uniform(ks[0], (10, 1, 5, 5), jnp.float32, -s(25), s(25)),
        "b_conv1": jax.random.uniform(ks[1], (10,), jnp.float32, -s(25), s(25)),
        "w_conv2": jax.random.uniform(ks[2], (20, 10, 5, 5), jnp.float32, -s(250), s(250)),
        "b_conv2": jax.random.uniform(ks[3], (20,), jnp.float32, -s(250), s(250)),
        "w_fc1": jax.random.uniform(ks[4], (50, 320), jnp.float32, -s(320), s(320)),
        "b_fc1": jax.random.uniform(ks[5], (50,), jnp.float32, -s(320), s(320)),
        "w_fc2": jax.random.uniform(ks[6], (10, 50), jnp.float32, -s(50), s(50)),
        "b_fc2": jax.random.uniform(ks[7], (10,), jnp.float32, -s(50), s(50)),
    }


if __name__ == "__main__":
    key = jax.random.PRNGKey(0)
    k_params, k_x = jax.random.split(key)
    params = init_params(k_params)          # PyTorch-layout parameters
    packed = pack_params(params)            # kernel-layout (packed once)

    # MNIST-shaped input (view(-1, 320) implies 1x28x28), batch = 2.
    x = jax.random.normal(k_x, (2, 1, 28, 28), dtype=jnp.float32)

    out = mnist_net_forward(x, packed)
    out = jax.block_until_ready(out)
    assert out.shape == (2, 10)

    # log_softmax sanity: each row exponentiates/sums to ~1.
    row_sums = jnp.sum(jnp.exp(out), axis=-1)
    assert bool(jnp.all(jnp.abs(row_sums - 1.0) < 1e-3))

    # Numerical check vs pure-JAX f32 reference (bf16 MXU operands -> loose tol).
    ref = _reference_forward(x, params)
    max_err = float(jnp.max(jnp.abs(out - ref)))
    assert max_err < 5e-2, f"max |kernel - reference| = {max_err}"

    print("KERNEL_OK")
</pallas_src>

<mosaic_0001>
module attributes {stable_mosaic.version = 11 : i64} {
  func.func @_mnist_fused_kernel(%arg0: i32, %arg1: memref<1x28x8x32xbf16, #tpu.memory_space<vmem>>, %arg2: memref<160x256xbf16, #tpu.memory_space<vmem>>, %arg3: memref<1x128xf32, #tpu.memory_space<vmem>>, %arg4: memref<640x256xbf16, #tpu.memory_space<vmem>>, %arg5: memref<1x128xf32, #tpu.memory_space<vmem>>, %arg6: memref<512x64xbf16, #tpu.memory_space<vmem>>, %arg7: memref<1x64xf32, #tpu.memory_space<vmem>>, %arg8: memref<64x128xbf16, #tpu.memory_space<vmem>>, %arg9: memref<1x128xf32, #tpu.memory_space<vmem>>, %arg10: memref<8x128xf32, #tpu.memory_space<vmem>>) attributes {dimension_semantics = [#tpu.dimension_semantics<parallel>], iteration_bounds = array<i64: 2>, scalar_prefetch = 0 : i64, scratch_operands = 0 : i64, tpu.core_type = #tpu.core_type<tc>, window_params = [{transform_indices = @transform_0, window_bounds = array<i64: 1, 28, 8, 32>}, {pipeline_mode = #tpu.pipeline_mode<synchronous>, transform_indices = @transform_1, window_bounds = array<i64: 160, 256>}, {pipeline_mode = #tpu.pipeline_mode<synchronous>, transform_indices = @transform_2, window_bounds = array<i64: 1, 128>}, {pipeline_mode = #tpu.pipeline_mode<synchronous>, transform_indices = @transform_3, window_bounds = array<i64: 640, 256>}, {pipeline_mode = #tpu.pipeline_mode<synchronous>, transform_indices = @transform_4, window_bounds = array<i64: 1, 128>}, {pipeline_mode = #tpu.pipeline_mode<synchronous>, transform_indices = @transform_5, window_bounds = array<i64: 512, 64>}, {pipeline_mode = #tpu.pipeline_mode<synchronous>, transform_indices = @transform_6, window_bounds = array<i64: 1, 64>}, {pipeline_mode = #tpu.pipeline_mode<synchronous>, transform_indices = @transform_7, window_bounds = array<i64: 64, 128>}, {pipeline_mode = #tpu.pipeline_mode<synchronous>, transform_indices = @transform_8, window_bounds = array<i64: 1, 128>}, {transform_indices = @transform_9, window_bounds = array<i64: 8, 128>}]} {
    %c0 = arith.constant 0 : index
    %c0_0 = arith.constant 0 : index
    %c0_1 = arith.constant 0 : index
    %c0_2 = arith.constant 0 : index
    %0 = vector.load %arg1[%c0, %c0_0, %c0_1, %c0_2] : memref<1x28x8x32xbf16, #tpu.memory_space<vmem>>, vector<1x28x8x32xbf16>
    %1 = vector.shape_cast %0 : vector<1x28x8x32xbf16> to vector<28x8x32xbf16>
    %c0_3 = arith.constant 0 : index
    %c0_4 = arith.constant 0 : index
    %2 = vector.load %arg2[%c0_3, %c0_4] : memref<160x256xbf16, #tpu.memory_space<vmem>>, vector<160x256xbf16>
    %c0_5 = arith.constant 0 : index
    %c0_6 = arith.constant 0 : index
    %3 = vector.load %arg4[%c0_5, %c0_6] : memref<640x256xbf16, #tpu.memory_space<vmem>>, vector<640x256xbf16>
    %c0_7 = arith.constant 0 : index
    %c0_8 = arith.constant 0 : index
    %4 = vector.load %arg6[%c0_7, %c0_8] : memref<512x64xbf16, #tpu.memory_space<vmem>>, vector<512x64xbf16>
    %c0_9 = arith.constant 0 : index
    %c0_10 = arith.constant 0 : index
    %5 = vector.load %arg8[%c0_9, %c0_10] : memref<64x128xbf16, #tpu.memory_space<vmem>>, vector<64x128xbf16>
    %6 = vector.extract_strided_slice %1 {offsets = [0, 0, 0], sizes = [24, 8, 32], strides = [1, 1, 1]} : vector<28x8x32xbf16> to vector<24x8x32xbf16>
    %7 = vector.shape_cast %6 : vector<24x8x32xbf16> to vector<192x32xbf16>
    %8 = vector.extract_strided_slice %1 {offsets = [1, 0, 0], sizes = [24, 8, 32], strides = [1, 1, 1]} : vector<28x8x32xbf16> to vector<24x8x32xbf16>
    %9 = vector.shape_cast %8 : vector<24x8x32xbf16> to vector<192x32xbf16>
    %10 = vector.extract_strided_slice %1 {offsets = [2, 0, 0], sizes = [24, 8, 32], strides = [1, 1, 1]} : vector<28x8x32xbf16> to vector<24x8x32xbf16>
    %11 = vector.shape_cast %10 : vector<24x8x32xbf16> to vector<192x32xbf16>
    %12 = vector.extract_strided_slice %1 {offsets = [3, 0, 0], sizes = [24, 8, 32], strides = [1, 1, 1]} : vector<28x8x32xbf16> to vector<24x8x32xbf16>
    %13 = vector.shape_cast %12 : vector<24x8x32xbf16> to vector<192x32xbf16>
    %14 = vector.extract_strided_slice %1 {offsets = [4, 0, 0], sizes = [24, 8, 32], strides = [1, 1, 1]} : vector<28x8x32xbf16> to vector<24x8x32xbf16>
    %15 = vector.shape_cast %14 : vector<24x8x32xbf16> to vector<192x32xbf16>
    %16 = tpu.concatenate %7, %9, %11, %13, %15 in 1 : vector<192x32xbf16>, vector<192x32xbf16>, vector<192x32xbf16>, vector<192x32xbf16>, vector<192x32xbf16> -> vector<192x160xbf16>
    %cst = arith.constant dense<0.000000e+00> : vector<192x256xf32>
    %17 = tpu.matmul %16, %2, %cst {dimension_numbers = #tpu.dot_dimension_numbers<[1], [0], [0], [1], [0, 0, 1, 1], [], []>} : vector<192x160xbf16>, vector<160x256xbf16>, vector<192x256xf32> -> vector<192x256xf32>
    %18 = vector.extract_strided_slice %17 {offsets = [0, 0], sizes = [192, 128], strides = [1, 1]} : vector<192x256xf32> to vector<192x128xf32>
    %19 = vector.extract_strided_slice %17 {offsets = [0, 128], sizes = [192, 128], strides = [1, 1]} : vector<192x256xf32> to vector<192x128xf32>
    %20 = arith.maximumf %18, %19 : vector<192x128xf32>
    %21 = vector.shape_cast %20 : vector<192x128xf32> to vector<12x2x8x128xf32>
    %22 = vector.extract_strided_slice %21 {offsets = [0, 0, 0, 0], sizes = [12, 1, 8, 128], strides = [1, 1, 1, 1]} : vector<12x2x8x128xf32> to vector<12x1x8x128xf32>
    %23 = vector.shape_cast %22 : vector<12x1x8x128xf32> to vector<12x8x128xf32>
    %24 = vector.extract_strided_slice %21 {offsets = [0, 1, 0, 0], sizes = [12, 1, 8, 128], strides = [1, 1, 1, 1]} : vector<12x2x8x128xf32> to vector<12x1x8x128xf32>
    %25 = vector.shape_cast %24 : vector<12x1x8x128xf32> to vector<12x8x128xf32>
    %26 = arith.maximumf %23, %25 : vector<12x8x128xf32>
    %c0_11 = arith.constant 0 : index
    %c0_12 = arith.constant 0 : index
    %27 = vector.load %arg3[%c0_11, %c0_12] : memref<1x128xf32, #tpu.memory_space<vmem>>, vector<1x128xf32>
    %28 = vector.shape_cast %27 : vector<1x128xf32> to vector<1x1x128xf32>
    %29 = vector.broadcast %28 : vector<1x1x128xf32> to vector<12x8x128xf32>
    %30 = arith.addf %26, %29 : vector<12x8x128xf32>
    %cst_13 = arith.constant 0.000000e+00 : f32
    %31 = vector.broadcast %cst_13 : f32 to vector<12x8x128xf32>
    %32 = arith.maximumf %30, %31 : vector<12x8x128xf32>
    %33 = arith.truncf %32 : vector<12x8x128xf32> to vector<12x8x128xbf16>
    %34 = vector.extract_strided_slice %33 {offsets = [0, 0, 0], sizes = [8, 8, 128], strides = [1, 1, 1]} : vector<12x8x128xbf16> to vector<8x8x128xbf16>
    %35 = vector.shape_cast %34 : vector<8x8x128xbf16> to vector<64x128xbf16>
    %36 = vector.extract_strided_slice %33 {offsets = [1, 0, 0], sizes = [8, 8, 128], strides = [1, 1, 1]} : vector<12x8x128xbf16> to vector<8x8x128xbf16>
    %37 = vector.shape_cast %36 : vector<8x8x128xbf16> to vector<64x128xbf16>
    %38 = vector.extract_strided_slice %33 {offsets = [2, 0, 0], sizes = [8, 8, 128], strides = [1, 1, 1]} : vector<12x8x128xbf16> to vector<8x8x128xbf16>
    %39 = vector.shape_cast %38 : vector<8x8x128xbf16> to vector<64x128xbf16>
    %40 = vector.extract_strided_slice %33 {offsets = [3, 0, 0], sizes = [8, 8, 128], strides = [1, 1, 1]} : vector<12x8x128xbf16> to vector<8x8x128xbf16>
    %41 = vector.shape_cast %40 : vector<8x8x128xbf16> to vector<64x128xbf16>
    %42 = vector.extract_strided_slice %33 {offsets = [4, 0, 0], sizes = [8, 8, 128], strides = [1, 1, 1]} : vector<12x8x128xbf16> to vector<8x8x128xbf16>
    %43 = vector.shape_cast %42 : vector<8x8x128xbf16> to vector<64x128xbf16>
    %44 = tpu.concatenate %35, %37, %39, %41, %43 in 1 : vector<64x128xbf16>, vector<64x128xbf16>, vector<64x128xbf16>, vector<64x128xbf16>, vector<64x128xbf16> -> vector<64x640xbf16>
    %cst_14 = arith.constant dense<0.000000e+00> : vector<64x256xf32>
    %45 = tpu.matmul %44, %3, %cst_14 {dimension_numbers = #tpu.dot_dimension_numbers<[1], [0], [0], [1], [0, 0, 1, 1], [], []>} : vector<64x640xbf16>, vector<640x256xbf16>, vector<64x256xf32> -> vector<64x256xf32>
    %46 = vector.extract_strided_slice %45 {offsets = [0, 0], sizes = [64, 128], strides = [1, 1]} : vector<64x256xf32> to vector<64x128xf32>
    %47 = vector.extract_strided_slice %45 {offsets = [0, 128], sizes = [64, 128], strides = [1, 1]} : vector<64x256xf32> to vector<64x128xf32>
    %48 = arith.maximumf %46, %47 : vector<64x128xf32>
    %49 = vector.shape_cast %48 : vector<64x128xf32> to vector<4x2x8x128xf32>
    %50 = vector.extract_strided_slice %49 {offsets = [0, 0, 0, 0], sizes = [4, 1, 8, 128], strides = [1, 1, 1, 1]} : vector<4x2x8x128xf32> to vector<4x1x8x128xf32>
    %51 = vector.shape_cast %50 : vector<4x1x8x128xf32> to vector<4x8x128xf32>
    %52 = vector.extract_strided_slice %49 {offsets = [0, 1, 0, 0], sizes = [4, 1, 8, 128], strides = [1, 1, 1, 1]} : vector<4x2x8x128xf32> to vector<4x1x8x128xf32>
    %53 = vector.shape_cast %52 : vector<4x1x8x128xf32> to vector<4x8x128xf32>
    %54 = arith.maximumf %51, %53 : vector<4x8x128xf32>
    %c0_15 = arith.constant 0 : index
    %c0_16 = arith.constant 0 : index
    %55 = vector.load %arg5[%c0_15, %c0_16] : memref<1x128xf32, #tpu.memory_space<vmem>>, vector<1x128xf32>
    %56 = vector.shape_cast %55 : vector<1x128xf32> to vector<1x1x128xf32>
    %57 = vector.broadcast %56 : vector<1x1x128xf32> to vector<4x8x128xf32>
    %58 = arith.addf %54, %57 : vector<4x8x128xf32>
    %cst_17 = arith.constant 0.000000e+00 : f32
    %59 = vector.broadcast %cst_17 : f32 to vector<4x8x128xf32>
    %60 = arith.maximumf %58, %59 : vector<4x8x128xf32>
    %61 = arith.truncf %60 : vector<4x8x128xf32> to vector<4x8x128xbf16>
    %62 = vector.extract_strided_slice %61 {offsets = [0, 0, 0], sizes = [1, 8, 128], strides = [1, 1, 1]} : vector<4x8x128xbf16> to vector<1x8x128xbf16>
    %63 = vector.shape_cast %62 : vector<1x8x128xbf16> to vector<8x128xbf16>
    %64 = vector.extract_strided_slice %61 {offsets = [1, 0, 0], sizes = [1, 8, 128], strides = [1, 1, 1]} : vector<4x8x128xbf16> to vector<1x8x128xbf16>
    %65 = vector.shape_cast %64 : vector<1x8x128xbf16> to vector<8x128xbf16>
    %66 = vector.extract_strided_slice %61 {offsets = [2, 0, 0], sizes = [1, 8, 128], strides = [1, 1, 1]} : vector<4x8x128xbf16> to vector<1x8x128xbf16>
    %67 = vector.shape_cast %66 : vector<1x8x128xbf16> to vector<8x128xbf16>
    %68 = vector.extract_strided_slice %61 {offsets = [3, 0, 0], sizes = [1, 8, 128], strides = [1, 1, 1]} : vector<4x8x128xbf16> to vector<1x8x128xbf16>
    %69 = vector.shape_cast %68 : vector<1x8x128xbf16> to vector<8x128xbf16>
    %70 = tpu.concatenate %63, %65, %67, %69 in 1 : vector<8x128xbf16>, vector<8x128xbf16>, vector<8x128xbf16>, vector<8x128xbf16> -> vector<8x512xbf16>
    %cst_18 = arith.constant dense<0.000000e+00> : vector<8x64xf32>
    %71 = tpu.matmul %70, %4, %cst_18 {dimension_numbers = #tpu.dot_dimension_numbers<[1], [0], [0], [1], [0, 0, 1, 1], [], []>} : vector<8x512xbf16>, vector<512x64xbf16>, vector<8x64xf32> -> vector<8x64xf32>
    %c0_19 = arith.constant 0 : index
    %c0_20 = arith.constant 0 : index
    %72 = vector.load %arg7[%c0_19, %c0_20] : memref<1x64xf32, #tpu.memory_space<vmem>>, vector<1x64xf32>
    %73 = vector.broadcast %72 : vector<1x64xf32> to vector<8x64xf32>
    %74 = arith.addf %71, %73 : vector<8x64xf32>
    %cst_21 = arith.constant 0.000000e+00 : f32
    %75 = vector.broadcast %cst_21 : f32 to vector<8x64xf32>
    %76 = arith.maximumf %74, %75 : vector<8x64xf32>
    %77 = arith.truncf %76 : vector<8x64xf32> to vector<8x64xbf16>
    %cst_22 = arith.constant dense<0.000000e+00> : vector<8x128xf32>
    %78 = tpu.matmul %77, %5, %cst_22 {dimension_numbers = #tpu.dot_dimension_numbers<[1], [0], [0], [1], [0, 0, 1, 1], [], []>} : vector<8x64xbf16>, vector<64x128xbf16>, vector<8x128xf32> -> vector<8x128xf32>
    %c0_23 = arith.constant 0 : index
    %c0_24 = arith.constant 0 : index
    %79 = vector.load %arg9[%c0_23, %c0_24] : memref<1x128xf32, #tpu.memory_space<vmem>>, vector<1x128xf32>
    %80 = vector.broadcast %79 : vector<1x128xf32> to vector<8x128xf32>
    %81 = arith.addf %78, %80 : vector<8x128xf32>
    %cst_25 = arith.constant dense<0xFF800000> : vector<8xf32>
    %82 = vector.multi_reduction <maximumf>, %81, %cst_25 [1] : vector<8x128xf32> to vector<8xf32>
    %83 = vector.shape_cast %82 : vector<8xf32> to vector<8x1xf32>
    %84 = vector.broadcast %83 : vector<8x1xf32> to vector<8x128xf32>
    %85 = arith.subf %81, %84 : vector<8x128xf32>
    %86 = math.exp %85 : vector<8x128xf32>
    %cst_26 = arith.constant dense<0.000000e+00> : vector<8xf32>
    %87 = vector.multi_reduction <add>, %86, %cst_26 [1] : vector<8x128xf32> to vector<8xf32>
    %88 = vector.shape_cast %87 : vector<8xf32> to vector<8x1xf32>
    %89 = math.log %88 : vector<8x1xf32>
    %90 = vector.broadcast %89 : vector<8x1xf32> to vector<8x128xf32>
    %91 = arith.subf %85, %90 : vector<8x128xf32>
    %c0_27 = arith.constant 0 : index
    %c0_28 = arith.constant 0 : index
    %92 = vector.load %arg10[%c0_27, %c0_28] : memref<8x128xf32, #tpu.memory_space<vmem>>, vector<8x128xf32>
    tpu.vector_store %arg10[%c0_27, %c0_28], %91 {strides = array<i32>} : memref<8x128xf32, #tpu.memory_space<vmem>>, vector<8x128xf32>,
    return
  }
  func.func @transform_0(%arg0: i32) -> (i32, i32, i32, i32) {
    %c0_i32 = arith.constant 0 : i32
    %c0_i32_0 = arith.constant 0 : i32
    %c0_i32_1 = arith.constant 0 : i32
    %c0_i32_2 = arith.constant 0 : i32
    return %arg0, %c0_i32, %c0_i32_0, %c0_i32_1 : i32, i32, i32, i32
  }
  func.func @transform_1(%arg0: i32) -> (i32, i32) {
    %c0_i32 = arith.constant 0 : i32
    %c0_i32_0 = arith.constant 0 : i32
    %c0_i32_1 = arith.constant 0 : i32
    return %c0_i32, %c0_i32_0 : i32, i32
  }
  func.func @transform_2(%arg0: i32) -> (i32, i32) {
    %c0_i32 = arith.constant 0 : i32
    %c0_i32_0 = arith.constant 0 : i32
    %c0_i32_1 = arith.constant 0 : i32
    return %c0_i32, %c0_i32_0 : i32, i32
  }
  func.func @transform_3(%arg0: i32) -> (i32, i32) {
    %c0_i32 = arith.constant 0 : i32
    %c0_i32_0 = arith.constant 0 : i32
    %c0_i32_1 = arith.constant 0 : i32
    return %c0_i32, %c0_i32_0 : i32, i32
  }
  func.func @transform_4(%arg0: i32) -> (i32, i32) {
    %c0_i32 = arith.constant 0 : i32
    %c0_i32_0 = arith.constant 0 : i32
    %c0_i32_1 = arith.constant 0 : i32
    return %c0_i32, %c0_i32_0 : i32, i32
  }
  func.func @transform_5(%arg0: i32) -> (i32, i32) {
    %c0_i32 = arith.constant 0 : i32
    %c0_i32_0 = arith.constant 0 : i32
    %c0_i32_1 = arith.constant 0 : i32
    return %c0_i32, %c0_i32_0 : i32, i32
  }
  func.func @transform_6(%arg0: i32) -> (i32, i32) {
    %c0_i32 = arith.constant 0 : i32
    %c0_i32_0 = arith.constant 0 : i32
    %c0_i32_1 = arith.constant 0 : i32
    return %c0_i32, %c0_i32_0 : i32, i32
  }
  func.func @transform_7(%arg0: i32) -> (i32, i32) {
    %c0_i32 = arith.constant 0 : i32
    %c0_i32_0 = arith.constant 0 : i32
    %c0_i32_1 = arith.constant 0 : i32
    return %c0_i32, %c0_i32_0 : i32, i32
  }
  func.func @transform_8(%arg0: i32) -> (i32, i32) {
    %c0_i32 = arith.constant 0 : i32
    %c0_i32_0 = arith.constant 0 : i32
    %c0_i32_1 = arith.constant 0 : i32
    return %c0_i32, %c0_i32_0 : i32, i32
  }
  func.func @transform_9(%arg0: i32) -> (i32, i32) {
    %c0_i32 = arith.constant 0 : i32
    %c0_i32_0 = arith.constant 0 : i32
    return %arg0, %c0_i32 : i32, i32
  }
}

module attributes {stable_mosaic.version = 11 : i64} {
  func.func @_mnist_fused_kernel(%arg0: i32, %arg1: memref<1x28x8x32xbf16, #tpu.memory_space<vmem>>, %arg2: memref<160x256xbf16, #tpu.memory_space<vmem>>, %arg3: memref<1x128xf32, #tpu.memory_space<vmem>>, %arg4: memref<640x256xbf16, #tpu.memory_space<vmem>>, %arg5: memref<1x128xf32, #tpu.memory_space<vmem>>, %arg6: memref<512x64xbf16, #tpu.memory_space<vmem>>, %arg7: memref<1x64xf32, #tpu.memory_space<vmem>>, %arg8: memref<64x128xbf16, #tpu.memory_space<vmem>>, %arg9: memref<1x128xf32, #tpu.memory_space<vmem>>, %arg10: memref<8x128xf32, #tpu.memory_space<vmem>>) attributes {dimension_semantics = [#tpu.dimension_semantics<parallel>], iteration_bounds = array<i64: 2>, scalar_prefetch = 0 : i64, scratch_operands = 0 : i64, tpu.core_type = #tpu.core_type<tc>, window_params = [{transform_indices = @transform_0, window_bounds = array<i64: 1, 28, 8, 32>}, {pipeline_mode = #tpu.pipeline_mode<synchronous>, transform_indices = @transform_1, window_bounds = array<i64: 160, 256>}, {pipeline_mode = #tpu.pipeline_mode<synchronous>, transform_indices = @transform_2, window_bounds = array<i64: 1, 128>}, {pipeline_mode = #tpu.pipeline_mode<synchronous>, transform_indices = @transform_3, window_bounds = array<i64: 640, 256>}, {pipeline_mode = #tpu.pipeline_mode<synchronous>, transform_indices = @transform_4, window_bounds = array<i64: 1, 128>}, {pipeline_mode = #tpu.pipeline_mode<synchronous>, transform_indices = @transform_5, window_bounds = array<i64: 512, 64>}, {pipeline_mode = #tpu.pipeline_mode<synchronous>, transform_indices = @transform_6, window_bounds = array<i64: 1, 64>}, {pipeline_mode = #tpu.pipeline_mode<synchronous>, transform_indices = @transform_7, window_bounds = array<i64: 64, 128>}, {pipeline_mode = #tpu.pipeline_mode<synchronous>, transform_indices = @transform_8, window_bounds = array<i64: 1, 128>}, {transform_indices = @transform_9, window_bounds = array<i64: 8, 128>}]} {
    %c0 = arith.constant 0 : index
    %c0_0 = arith.constant 0 : index
    %c0_1 = arith.constant 0 : index
    %c0_2 = arith.constant 0 : index
    %0 = vector.load %arg1[%c0, %c0_0, %c0_1, %c0_2] : memref<1x28x8x32xbf16, #tpu.memory_space<vmem>>, vector<1x28x8x32xbf16>
    %1 = vector.shape_cast %0 : vector<1x28x8x32xbf16> to vector<28x8x32xbf16>
    %c0_3 = arith.constant 0 : index
    %c0_4 = arith.constant 0 : index
    %2 = vector.load %arg2[%c0_3, %c0_4] : memref<160x256xbf16, #tpu.memory_space<vmem>>, vector<160x256xbf16>
    %c0_5 = arith.constant 0 : index
    %c0_6 = arith.constant 0 : index
    %3 = vector.load %arg4[%c0_5, %c0_6] : memref<640x256xbf16, #tpu.memory_space<vmem>>, vector<640x256xbf16>
    %c0_7 = arith.constant 0 : index
    %c0_8 = arith.constant 0 : index
    %4 = vector.load %arg6[%c0_7, %c0_8] : memref<512x64xbf16, #tpu.memory_space<vmem>>, vector<512x64xbf16>
    %c0_9 = arith.constant 0 : index
    %c0_10 = arith.constant 0 : index
    %5 = vector.load %arg8[%c0_9, %c0_10] : memref<64x128xbf16, #tpu.memory_space<vmem>>, vector<64x128xbf16>
    %6 = vector.extract_strided_slice %1 {offsets = [0, 0, 0], sizes = [24, 8, 32], strides = [1, 1, 1]} : vector<28x8x32xbf16> to vector<24x8x32xbf16>
    %7 = vector.shape_cast %6 : vector<24x8x32xbf16> to vector<192x32xbf16>
    %8 = vector.extract_strided_slice %1 {offsets = [1, 0, 0], sizes = [24, 8, 32], strides = [1, 1, 1]} : vector<28x8x32xbf16> to vector<24x8x32xbf16>
    %9 = vector.shape_cast %8 : vector<24x8x32xbf16> to vector<192x32xbf16>
    %10 = vector.extract_strided_slice %1 {offsets = [2, 0, 0], sizes = [24, 8, 32], strides = [1, 1, 1]} : vector<28x8x32xbf16> to vector<24x8x32xbf16>
    %11 = vector.shape_cast %10 : vector<24x8x32xbf16> to vector<192x32xbf16>
    %12 = vector.extract_strided_slice %1 {offsets = [3, 0, 0], sizes = [24, 8, 32], strides = [1, 1, 1]} : vector<28x8x32xbf16> to vector<24x8x32xbf16>
    %13 = vector.shape_cast %12 : vector<24x8x32xbf16> to vector<192x32xbf16>
    %14 = vector.extract_strided_slice %1 {offsets = [4, 0, 0], sizes = [24, 8, 32], strides = [1, 1, 1]} : vector<28x8x32xbf16> to vector<24x8x32xbf16>
    %15 = vector.shape_cast %14 : vector<24x8x32xbf16> to vector<192x32xbf16>
    %16 = vector.extract_strided_slice %2 {offsets = [0, 0], sizes = [32, 256], strides = [1, 1]} : vector<160x256xbf16> to vector<32x256xbf16>
    %cst = arith.constant dense<0.000000e+00> : vector<192x256xf32>
    %17 = tpu.matmul %7, %16, %cst {dimension_numbers = #tpu.dot_dimension_numbers<[1], [0], [0], [1], [0, 0, 1, 1], [], []>} : vector<192x32xbf16>, vector<32x256xbf16>, vector<192x256xf32> -> vector<192x256xf32>
    %18 = vector.extract_strided_slice %2 {offsets = [32, 0], sizes = [32, 256], strides = [1, 1]} : vector<160x256xbf16> to vector<32x256xbf16>
    %cst_11 = arith.constant dense<0.000000e+00> : vector<192x256xf32>
    %19 = tpu.matmul %9, %18, %cst_11 {dimension_numbers = #tpu.dot_dimension_numbers<[1], [0], [0], [1], [0, 0, 1, 1], [], []>} : vector<192x32xbf16>, vector<32x256xbf16>, vector<192x256xf32> -> vector<192x256xf32>
    %20 = arith.addf %17, %19 : vector<192x256xf32>
    %21 = vector.extract_strided_slice %2 {offsets = [64, 0], sizes = [32, 256], strides = [1, 1]} : vector<160x256xbf16> to vector<32x256xbf16>
    %cst_12 = arith.constant dense<0.000000e+00> : vector<192x256xf32>
    %22 = tpu.matmul %11, %21, %cst_12 {dimension_numbers = #tpu.dot_dimension_numbers<[1], [0], [0], [1], [0, 0, 1, 1], [], []>} : vector<192x32xbf16>, vector<32x256xbf16>, vector<192x256xf32> -> vector<192x256xf32>
    %23 = arith.addf %20, %22 : vector<192x256xf32>
    %24 = vector.extract_strided_slice %2 {offsets = [96, 0], sizes = [32, 256], strides = [1, 1]} : vector<160x256xbf16> to vector<32x256xbf16>
    %cst_13 = arith.constant dense<0.000000e+00> : vector<192x256xf32>
    %25 = tpu.matmul %13, %24, %cst_13 {dimension_numbers = #tpu.dot_dimension_numbers<[1], [0], [0], [1], [0, 0, 1, 1], [], []>} : vector<192x32xbf16>, vector<32x256xbf16>, vector<192x256xf32> -> vector<192x256xf32>
    %26 = arith.addf %23, %25 : vector<192x256xf32>
    %27 = vector.extract_strided_slice %2 {offsets = [128, 0], sizes = [32, 256], strides = [1, 1]} : vector<160x256xbf16> to vector<32x256xbf16>
    %cst_14 = arith.constant dense<0.000000e+00> : vector<192x256xf32>
    %28 = tpu.matmul %15, %27, %cst_14 {dimension_numbers = #tpu.dot_dimension_numbers<[1], [0], [0], [1], [0, 0, 1, 1], [], []>} : vector<192x32xbf16>, vector<32x256xbf16>, vector<192x256xf32> -> vector<192x256xf32>
    %29 = arith.addf %26, %28 : vector<192x256xf32>
    %30 = vector.extract_strided_slice %29 {offsets = [0, 0], sizes = [192, 128], strides = [1, 1]} : vector<192x256xf32> to vector<192x128xf32>
    %31 = vector.extract_strided_slice %29 {offsets = [0, 128], sizes = [192, 128], strides = [1, 1]} : vector<192x256xf32> to vector<192x128xf32>
    %32 = arith.maximumf %30, %31 : vector<192x128xf32>
    %33 = vector.shape_cast %32 : vector<192x128xf32> to vector<12x2x8x128xf32>
    %34 = vector.extract_strided_slice %33 {offsets = [0, 0, 0, 0], sizes = [12, 1, 8, 128], strides = [1, 1, 1, 1]} : vector<12x2x8x128xf32> to vector<12x1x8x128xf32>
    %35 = vector.shape_cast %34 : vector<12x1x8x128xf32> to vector<12x8x128xf32>
    %36 = vector.extract_strided_slice %33 {offsets = [0, 1, 0, 0], sizes = [12, 1, 8, 128], strides = [1, 1, 1, 1]} : vector<12x2x8x128xf32> to vector<12x1x8x128xf32>
    %37 = vector.shape_cast %36 : vector<12x1x8x128xf32> to vector<12x8x128xf32>
    %38 = arith.maximumf %35, %37 : vector<12x8x128xf32>
    %c0_15 = arith.constant 0 : index
    %c0_16 = arith.constant 0 : index
    %39 = vector.load %arg3[%c0_15, %c0_16] : memref<1x128xf32, #tpu.memory_space<vmem>>, vector<1x128xf32>
    %40 = vector.shape_cast %39 : vector<1x128xf32> to vector<1x1x128xf32>
    %41 = vector.broadcast %40 : vector<1x1x128xf32> to vector<12x8x128xf32>
    %42 = arith.addf %38, %41 : vector<12x8x128xf32>
    %cst_17 = arith.constant 0.000000e+00 : f32
    %43 = vector.broadcast %cst_17 : f32 to vector<12x8x128xf32>
    %44 = arith.maximumf %42, %43 : vector<12x8x128xf32>
    %45 = arith.truncf %44 : vector<12x8x128xf32> to vector<12x8x128xbf16>
    %46 = vector.extract_strided_slice %45 {offsets = [0, 0, 0], sizes = [8, 8, 128], strides = [1, 1, 1]} : vector<12x8x128xbf16> to vector<8x8x128xbf16>
    %47 = vector.shape_cast %46 : vector<8x8x128xbf16> to vector<64x128xbf16>
    %48 = vector.extract_strided_slice %45 {offsets = [1, 0, 0], sizes = [8, 8, 128], strides = [1, 1, 1]} : vector<12x8x128xbf16> to vector<8x8x128xbf16>
    %49 = vector.shape_cast %48 : vector<8x8x128xbf16> to vector<64x128xbf16>
    %50 = vector.extract_strided_slice %45 {offsets = [2, 0, 0], sizes = [8, 8, 128], strides = [1, 1, 1]} : vector<12x8x128xbf16> to vector<8x8x128xbf16>
    %51 = vector.shape_cast %50 : vector<8x8x128xbf16> to vector<64x128xbf16>
    %52 = vector.extract_strided_slice %45 {offsets = [3, 0, 0], sizes = [8, 8, 128], strides = [1, 1, 1]} : vector<12x8x128xbf16> to vector<8x8x128xbf16>
    %53 = vector.shape_cast %52 : vector<8x8x128xbf16> to vector<64x128xbf16>
    %54 = vector.extract_strided_slice %45 {offsets = [4, 0, 0], sizes = [8, 8, 128], strides = [1, 1, 1]} : vector<12x8x128xbf16> to vector<8x8x128xbf16>
    %55 = vector.shape_cast %54 : vector<8x8x128xbf16> to vector<64x128xbf16>
    %56 = vector.extract_strided_slice %3 {offsets = [0, 0], sizes = [128, 256], strides = [1, 1]} : vector<640x256xbf16> to vector<128x256xbf16>
    %cst_18 = arith.constant dense<0.000000e+00> : vector<64x256xf32>
    %57 = tpu.matmul %47, %56, %cst_18 {dimension_numbers = #tpu.dot_dimension_numbers<[1], [0], [0], [1], [0, 0, 1, 1], [], []>} : vector<64x128xbf16>, vector<128x256xbf16>, vector<64x256xf32> -> vector<64x256xf32>
    %58 = vector.extract_strided_slice %3 {offsets = [128, 0], sizes = [128, 256], strides = [1, 1]} : vector<640x256xbf16> to vector<128x256xbf16>
    %cst_19 = arith.constant dense<0.000000e+00> : vector<64x256xf32>
    %59 = tpu.matmul %49, %58, %cst_19 {dimension_numbers = #tpu.dot_dimension_numbers<[1], [0], [0], [1], [0, 0, 1, 1], [], []>} : vector<64x128xbf16>, vector<128x256xbf16>, vector<64x256xf32> -> vector<64x256xf32>
    %60 = arith.addf %57, %59 : vector<64x256xf32>
    %61 = vector.extract_strided_slice %3 {offsets = [256, 0], sizes = [128, 256], strides = [1, 1]} : vector<640x256xbf16> to vector<128x256xbf16>
    %cst_20 = arith.constant dense<0.000000e+00> : vector<64x256xf32>
    %62 = tpu.matmul %51, %61, %cst_20 {dimension_numbers = #tpu.dot_dimension_numbers<[1], [0], [0], [1], [0, 0, 1, 1], [], []>} : vector<64x128xbf16>, vector<128x256xbf16>, vector<64x256xf32> -> vector<64x256xf32>
    %63 = arith.addf %60, %62 : vector<64x256xf32>
    %64 = vector.extract_strided_slice %3 {offsets = [384, 0], sizes = [128, 256], strides = [1, 1]} : vector<640x256xbf16> to vector<128x256xbf16>
    %cst_21 = arith.constant dense<0.000000e+00> : vector<64x256xf32>
    %65 = tpu.matmul %53, %64, %cst_21 {dimension_numbers = #tpu.dot_dimension_numbers<[1], [0], [0], [1], [0, 0, 1, 1], [], []>} : vector<64x128xbf16>, vector<128x256xbf16>, vector<64x256xf32> -> vector<64x256xf32>
    %66 = arith.addf %63, %65 : vector<64x256xf32>
    %67 = vector.extract_strided_slice %3 {offsets = [512, 0], sizes = [128, 256], strides = [1, 1]} : vector<640x256xbf16> to vector<128x256xbf16>
    %cst_22 = arith.constant dense<0.000000e+00> : vector<64x256xf32>
    %68 = tpu.matmul %55, %67, %cst_22 {dimension_numbers = #tpu.dot_dimension_numbers<[1], [0], [0], [1], [0, 0, 1, 1], [], []>} : vector<64x128xbf16>, vector<128x256xbf16>, vector<64x256xf32> -> vector<64x256xf32>
    %69 = arith.addf %66, %68 : vector<64x256xf32>
    %70 = vector.extract_strided_slice %69 {offsets = [0, 0], sizes = [64, 128], strides = [1, 1]} : vector<64x256xf32> to vector<64x128xf32>
    %71 = vector.extract_strided_slice %69 {offsets = [0, 128], sizes = [64, 128], strides = [1, 1]} : vector<64x256xf32> to vector<64x128xf32>
    %72 = arith.maximumf %70, %71 : vector<64x128xf32>
    %73 = vector.shape_cast %72 : vector<64x128xf32> to vector<4x2x8x128xf32>
    %74 = vector.extract_strided_slice %73 {offsets = [0, 0, 0, 0], sizes = [4, 1, 8, 128], strides = [1, 1, 1, 1]} : vector<4x2x8x128xf32> to vector<4x1x8x128xf32>
    %75 = vector.shape_cast %74 : vector<4x1x8x128xf32> to vector<4x8x128xf32>
    %76 = vector.extract_strided_slice %73 {offsets = [0, 1, 0, 0], sizes = [4, 1, 8, 128], strides = [1, 1, 1, 1]} : vector<4x2x8x128xf32> to vector<4x1x8x128xf32>
    %77 = vector.shape_cast %76 : vector<4x1x8x128xf32> to vector<4x8x128xf32>
    %78 = arith.maximumf %75, %77 : vector<4x8x128xf32>
    %c0_23 = arith.constant 0 : index
    %c0_24 = arith.constant 0 : index
    %79 = vector.load %arg5[%c0_23, %c0_24] : memref<1x128xf32, #tpu.memory_space<vmem>>, vector<1x128xf32>
    %80 = vector.shape_cast %79 : vector<1x128xf32> to vector<1x1x128xf32>
    %81 = vector.broadcast %80 : vector<1x1x128xf32> to vector<4x8x128xf32>
    %82 = arith.addf %78, %81 : vector<4x8x128xf32>
    %cst_25 = arith.constant 0.000000e+00 : f32
    %83 = vector.broadcast %cst_25 : f32 to vector<4x8x128xf32>
    %84 = arith.maximumf %82, %83 : vector<4x8x128xf32>
    %85 = arith.truncf %84 : vector<4x8x128xf32> to vector<4x8x128xbf16>
    %86 = vector.extract_strided_slice %85 {offsets = [0, 0, 0], sizes = [1, 8, 128], strides = [1, 1, 1]} : vector<4x8x128xbf16> to vector<1x8x128xbf16>
    %87 = vector.shape_cast %86 : vector<1x8x128xbf16> to vector<8x128xbf16>
    %88 = vector.extract_strided_slice %85 {offsets = [1, 0, 0], sizes = [1, 8, 128], strides = [1, 1, 1]} : vector<4x8x128xbf16> to vector<1x8x128xbf16>
    %89 = vector.shape_cast %88 : vector<1x8x128xbf16> to vector<8x128xbf16>
    %90 = vector.extract_strided_slice %85 {offsets = [2, 0, 0], sizes = [1, 8, 128], strides = [1, 1, 1]} : vector<4x8x128xbf16> to vector<1x8x128xbf16>
    %91 = vector.shape_cast %90 : vector<1x8x128xbf16> to vector<8x128xbf16>
    %92 = vector.extract_strided_slice %85 {offsets = [3, 0, 0], sizes = [1, 8, 128], strides = [1, 1, 1]} : vector<4x8x128xbf16> to vector<1x8x128xbf16>
    %93 = vector.shape_cast %92 : vector<1x8x128xbf16> to vector<8x128xbf16>
    %94 = vector.extract_strided_slice %4 {offsets = [0, 0], sizes = [128, 64], strides = [1, 1]} : vector<512x64xbf16> to vector<128x64xbf16>
    %cst_26 = arith.constant dense<0.000000e+00> : vector<8x64xf32>
    %95 = tpu.matmul %87, %94, %cst_26 {dimension_numbers = #tpu.dot_dimension_numbers<[1], [0], [0], [1], [0, 0, 1, 1], [], []>} : vector<8x128xbf16>, vector<128x64xbf16>, vector<8x64xf32> -> vector<8x64xf32>
    %96 = vector.extract_strided_slice %4 {offsets = [128, 0], sizes = [128, 64], strides = [1, 1]} : vector<512x64xbf16> to vector<128x64xbf16>
    %cst_27 = arith.constant dense<0.000000e+00> : vector<8x64xf32>
    %97 = tpu.matmul %89, %96, %cst_27 {dimension_numbers = #tpu.dot_dimension_numbers<[1], [0], [0], [1], [0, 0, 1, 1], [], []>} : vector<8x128xbf16>, vector<128x64xbf16>, vector<8x64xf32> -> vector<8x64xf32>
    %98 = arith.addf %95, %97 : vector<8x64xf32>
    %99 = vector.extract_strided_slice %4 {offsets = [256, 0], sizes = [128, 64], strides = [1, 1]} : vector<512x64xbf16> to vector<128x64xbf16>
    %cst_28 = arith.constant dense<0.000000e+00> : vector<8x64xf32>
    %100 = tpu.matmul %91, %99, %cst_28 {dimension_numbers = #tpu.dot_dimension_numbers<[1], [0], [0], [1], [0, 0, 1, 1], [], []>} : vector<8x128xbf16>, vector<128x64xbf16>, vector<8x64xf32> -> vector<8x64xf32>
    %101 = arith.addf %98, %100 : vector<8x64xf32>
    %102 = vector.extract_strided_slice %4 {offsets = [384, 0], sizes = [128, 64], strides = [1, 1]} : vector<512x64xbf16> to vector<128x64xbf16>
    %cst_29 = arith.constant dense<0.000000e+00> : vector<8x64xf32>
    %103 = tpu.matmul %93, %102, %cst_29 {dimension_numbers = #tpu.dot_dimension_numbers<[1], [0], [0], [1], [0, 0, 1, 1], [], []>} : vector<8x128xbf16>, vector<128x64xbf16>, vector<8x64xf32> -> vector<8x64xf32>
    %104 = arith.addf %101, %103 : vector<8x64xf32>
    %c0_30 = arith.constant 0 : index
    %c0_31 = arith.constant 0 : index
    %105 = vector.load %arg7[%c0_30, %c0_31] : memref<1x64xf32, #tpu.memory_space<vmem>>, vector<1x64xf32>
    %106 = vector.broadcast %105 : vector<1x64xf32> to vector<8x64xf32>
    %107 = arith.addf %104, %106 : vector<8x64xf32>
    %cst_32 = arith.constant 0.000000e+00 : f32
    %108 = vector.broadcast %cst_32 : f32 to vector<8x64xf32>
    %109 = arith.maximumf %107, %108 : vector<8x64xf32>
    %110 = arith.truncf %109 : vector<8x64xf32> to vector<8x64xbf16>
    %cst_33 = arith.constant dense<0.000000e+00> : vector<8x128xf32>
    %111 = tpu.matmul %110, %5, %cst_33 {dimension_numbers = #tpu.dot_dimension_numbers<[1], [0], [0], [1], [0, 0, 1, 1], [], []>} : vector<8x64xbf16>, vector<64x128xbf16>, vector<8x128xf32> -> vector<8x128xf32>
    %c0_34 = arith.constant 0 : index
    %c0_35 = arith.constant 0 : index
    %112 = vector.load %arg9[%c0_34, %c0_35] : memref<1x128xf32, #tpu.memory_space<vmem>>, vector<1x128xf32>
    %113 = vector.broadcast %112 : vector<1x128xf32> to vector<8x128xf32>
    %114 = arith.addf %111, %113 : vector<8x128xf32>
    %cst_36 = arith.constant dense<0xFF800000> : vector<8xf32>
    %115 = vector.multi_reduction <maximumf>, %114, %cst_36 [1] : vector<8x128xf32> to vector<8xf32>
    %116 = vector.shape_cast %115 : vector<8xf32> to vector<8x1xf32>
    %117 = vector.broadcast %116 : vector<8x1xf32> to vector<8x128xf32>
    %118 = arith.subf %114, %117 : vector<8x128xf32>
    %119 = math.exp %118 : vector<8x128xf32>
    %cst_37 = arith.constant dense<0.000000e+00> : vector<8xf32>
    %120 = vector.multi_reduction <add>, %119, %cst_37 [1] : vector<8x128xf32> to vector<8xf32>
    %121 = vector.shape_cast %120 : vector<8xf32> to vector<8x1xf32>
    %122 = math.log %121 : vector<8x1xf32>
    %123 = vector.broadcast %122 : vector<8x1xf32> to vector<8x128xf32>
    %124 = arith.subf %118, %123 : vector<8x128xf32>
    %c0_38 = arith.constant 0 : index
    %c0_39 = arith.constant 0 : index
    %125 = vector.load %arg10[%c0_38, %c0_39] : memref<8x128xf32, #tpu.memory_space<vmem>>, vector<8x128xf32>
    tpu.vector_store %arg10[%c0_38, %c0_39], %124 {strides = array<i32>} : memref<8x128xf32, #tpu.memory_space<vmem>>, vector<8x128xf32>,
    return
  }
  func.func @transform_0(%arg0: i32) -> (i32, i32, i32, i32) {
    %c0_i32 = arith.constant 0 : i32
    %c0_i32_0 = arith.constant 0 : i32
    %c0_i32_1 = arith.constant 0 : i32
    %c0_i32_2 = arith.constant 0 : i32
    return %arg0, %c0_i32, %c0_i32_0, %c0_i32_1 : i32, i32, i32, i32
  }
  func.func @transform_1(%arg0: i32) -> (i32, i32) {
    %c0_i32 = arith.constant 0 : i32
    %c0_i32_0 = arith.constant 0 : i32
    %c0_i32_1 = arith.constant 0 : i32
    return %c0_i32, %c0_i32_0 : i32, i32
  }
  func.func @transform_2(%arg0: i32) -> (i32, i32) {
    %c0_i32 = arith.constant 0 : i32
    %c0_i32_0 = arith.constant 0 : i32
    %c0_i32_1 = arith.constant 0 : i32
    return %c0_i32, %c0_i32_0 : i32, i32
  }
  func.func @transform_3(%arg0: i32) -> (i32, i32) {
    %c0_i32 = arith.constant 0 : i32
    %c0_i32_0 = arith.constant 0 : i32
    %c0_i32_1 = arith.constant 0 : i32
    return %c0_i32, %c0_i32_0 : i32, i32
  }
  func.func @transform_4(%arg0: i32) -> (i32, i32) {
    %c0_i32 = arith.constant 0 : i32
    %c0_i32_0 = arith.constant 0 : i32
    %c0_i32_1 = arith.constant 0 : i32
    return %c0_i32, %c0_i32_0 : i32, i32
  }
  func.func @transform_5(%arg0: i32) -> (i32, i32) {
    %c0_i32 = arith.constant 0 : i32
    %c0_i32_0 = arith.constant 0 : i32
    %c0_i32_1 = arith.constant 0 : i32
    return %c0_i32, %c0_i32_0 : i32, i32
  }
  func.func @transform_6(%arg0: i32) -> (i32, i32) {
    %c0_i32 = arith.constant 0 : i32
    %c0_i32_0 = arith.constant 0 : i32
    %c0_i32_1 = arith.constant 0 : i32
    return %c0_i32, %c0_i32_0 : i32, i32
  }
  func.func @transform_7(%arg0: i32) -> (i32, i32) {
    %c0_i32 = arith.constant 0 : i32
    %c0_i32_0 = arith.constant 0 : i32
    %c0_i32_1 = arith.constant 0 : i32
    return %c0_i32, %c0_i32_0 : i32, i32
  }
  func.func @transform_8(%arg0: i32) -> (i32, i32) {
    %c0_i32 = arith.constant 0 : i32
    %c0_i32_0 = arith.constant 0 : i32
    %c0_i32_1 = arith.constant 0 : i32
    return %c0_i32, %c0_i32_0 : i32, i32
  }
  func.func @transform_9(%arg0: i32) -> (i32, i32) {
    %c0_i32 = arith.constant 0 : i32
    %c0_i32_0 = arith.constant 0 : i32
    return %arg0, %c0_i32 : i32, i32
  }
}

</mosaic_0001>

<bundles_post_ra>
// kernel: _forward.1
= control target key start
LH: loop header
LB: loop body
LE: loop exit
PB: predicated region body
PF: predicated region fallthrough
CT: control target
= control target key end

     0   :  { %s2827_s30 = smov 0   ;;  %s3513_s0 = inlined_call_operand.vmem [shape: bf16[2,28,8,32], index: 0, kind: input, shape index: {}]   ;;  %s3514_s1 = inlined_call_operand.vmem [shape: bf16[160,256], index: 1, kind: input, shape index: {}]   ;;  %s3515_s2 = inlined_call_operand.vmem [shape: f32[1,128], index: 2, kind: input, shape index: {}]   ;;  %s3516_s3 = inlined_call_operand.vmem [shape: bf16[640,256], index: 3, kind: input, shape index: {}]   ;;  %s3517_s4 = inlined_call_operand.vmem [shape: f32[1,128], index: 4, kind: input, shape index: {}]   ;;  %s3518_s5 = inlined_call_operand.vmem [shape: bf16[512,64], index: 5, kind: input, shape index: {}]   ;;  %s3519_s6 = inlined_call_operand.vmem [shape: f32[1,64], index: 6, kind: input, shape index: {}]   ;;  %s3520_s7 = inlined_call_operand.vmem [shape: bf16[64,128], index: 7, kind: input, shape index: {}]   ;;  %s3521_s8 = inlined_call_operand.vmem [shape: f32[1,128], index: 8, kind: input, shape index: {}]   ;;  %s3522_s9 = inlined_call_operand.vmem [shape: f32[16,128], index: 9, kind: output, shape index: {}]  }
   0x1 LB: > { %s2259_s10 = sadd.s32 4294967295, %s2769_s30   ;;  %p2263_p0 = scmp.ge.s32.totalorder %s2769_s30, 1  ;;  %s2769_s30 = sphi %s2827_s30, %s19_s30  }
   0x2   : > { %p287_p1 = scmp.lt.s32.totalorder %s2769_s30, 3 }
   0x4   : > { %p288_p2 = pnand %p2263_p0, %p287_p1 }
   0x5   : > { %p322_p3 = scmp.lt.s32.totalorder (!%p288_p2), %s2259_s10, 1  ;;  %s2771_s29 = smov (!%p288_p2), 32  }
   0x6   : > { %291 = sbr.rel (%p288_p2) target bundleno = 1378 (0x562), region = 56  ;;  %s2772_s11 = smov (!%p288_p2), 96  }
   0x7   : > { %s2773_s16 = smov (!%p288_p2), 64  }
   0xb   : > { %v2568_v0 = vld [vmem:[%s3514_s1 + $0x74] ss:$8 sps:$4 sm:$0xff]   ;;  %v2570_v1 = vld [vmem:[%s3514_s1 + $0x70] ss:$8 sps:$4 sm:$0xff]   ;;  %s3524_s10 = smov (!%p322_p3, %s2259_s10), 1  ;;  %vm687_vm0 = vcmask 261120  }
   0xc   : > { %912 = vmatprep.subr.bf16.mxu0 %v2568_v0  ;;  %v2572_v2 = vld [vmem:[%s3514_s1 + $0x64] ss:$8 sps:$4 sm:$0xff]   ;;  %v2575_v3 = vld [vmem:[%s3514_s1 + $0x60] ss:$8 sps:$4 sm:$0xff]   ;;  %s2531_s19 = smul.u32 112, %s3524_s10  ;;  %vm724_vm1 = vcmask 523264  }
   0xd   : > { %913 = vmatpush1.bf16.msra.mxu0 %v2570_v1  ;;  %v2576_v4 = vld [vmem:[%s3514_s1 + $0x54] ss:$8 sps:$4 sm:$0xff]   ;;  %v2578_v5 = vld [vmem:[%s3514_s1 + $0x50] ss:$8 sps:$4 sm:$0xff]   ;;  %v2580_v6 = vld [vmem:[%s3514_s1 + $0x44] ss:$8 sps:$4 sm:$0xff]  }
   0xe   : > { %914 = vmatprep.subr.bf16.mxu0 %v2572_v2  ;;  %s2856_s24 = scalar_lea.vmem %s3513_s0, %s2531_s19  ;;  %v2584_v18 = vld [vmem:[%s3514_s1 + $0x40] ss:$8 sps:$4 sm:$0xff]   ;;  %v2585_v20 = vld [vmem:[%s3514_s1 + $0x34] ss:$8 sps:$4 sm:$0xff]   ;;  %v2587_v24 = vld [vmem:[%s3514_s1 + $0x30] ss:$8 sps:$4 sm:$0xff]  }
   0xf   : > { %v2865_v7 = vld [vmem:[%s2856_s24 + $0x4] sm:$0xf]  ;;  %v334_v8 = vld [vmem:[%s2856_s24 + $0x8] sm:$0xf]  ;;  %v2869_v9 = vld [vmem:[%s2856_s24] sm:$0xf] }
  0x10   : > { %v2278_v10 = vcombine.low %v2865_v7, %v334_v8  ;;  %v2266_v11 = vcombine.low %v2869_v9, %v2865_v7  ;;  %v335_v12 = vld [vmem:[%s2856_s24 + $0xc] sm:$0xf]  ;;  %v336_v13 = vld [vmem:[%s2856_s24 + $0x10] sm:$0xf]  ;;  %v337_v14 = vld [vmem:[%s2856_s24 + $0x14] sm:$0xf] }
  0x11   : > { %915 = vmatpush1.bf16.msra.mxu0 %v2575_v3  ;;  %v2279_v15 = vcombine.low %v335_v12, %v336_v13  ;;  %v2878_v16 = vcombine.low %v336_v13, %v337_v14  ;;  %v2880_v17 = vcombine.low %v334_v8, %v335_v12  ;;  %v338_v19 = vld [vmem:[%s2856_s24 + $0x18] sm:$0xf]  ;;  %v339_v22 = vld [vmem:[%s2856_s24 + $0x1c] sm:$0xf]  ;;  %v2897_v23 = vld [vmem:[%s2856_s24 + $0x68] sm:$0xf] }
  0x12   : > { %916 = vmatprep.subr.bf16.mxu0 %v2576_v4  ;;  %606 = vrot.lane.b32.xlu0 %v2278_v10, %s2771_s29  ;;  %v2280_v21 = vcombine.low %v337_v14, %v338_v19  ;;  %v2903_v25 = vld [vmem:[%s2856_s24 + $0x6c] sm:$0xf]  ;;  %v2913_v28 = vcombine.low %v338_v19, %v339_v22  ;;  %v340_v29 = vld [vmem:[%s2856_s24 + $0x20] sm:$0xf]  ;;  %v2591_v31 = vld [vmem:[%s3514_s1 + $0x14] ss:$8 sps:$4 sm:$0xff]  }
  0x13   : > { %660 = vrot.lane.b32.xlu1 %v2279_v15, %s2772_s11  ;;  %2313 = vmatprep.mubr.msk.bf16.mxu0 %vm687_vm0, %v2878_v16  ;;  %v2588_v26 = vld [vmem:[%s3514_s1 + $0x24] ss:$8 sps:$4 sm:$0xff]   ;;  %v2292_v27 = vcombine.low %v2897_v23, %v2903_v25  ;;  %v2590_v30 = vld [vmem:[%s3514_s1 + $0x20] ss:$8 sps:$4 sm:$0xff]   ;;  %v2281_v33 = vcombine.low %v339_v22, %v340_v29  ;;  %v2593_v35 = vld [vmem:[%s3514_s1 + $0x10] ss:$8 sps:$4 sm:$0xff]  }
  0x14   : > { %v341_v32 = vld [vmem:[%s2856_s24 + $0x24] sm:$0xf]  ;;  %v342_v34 = vld [vmem:[%s2856_s24 + $0x28] sm:$0xf]  ;;  %v343_v39 = vld [vmem:[%s2856_s24 + $0x2c] sm:$0xf] }
  0x15   : > { %917 = vmatpush1.bf16.msra.mxu0 %v2578_v5  ;;  %v2594_v36 = vld [vmem:[%s3514_s1 + $0x4] ss:$8 sps:$4 sm:$0xff]   ;;  %v2596_v37 = vld [vmem:[%s3514_s1] ss:$8 sps:$4 sm:$0xff]   ;;  %v2937_v38 = vcombine.low %v340_v29, %v341_v32  ;;  %v2597_v40 = vld [vmem:[%s3514_s1 + $0x94] ss:$8 sps:$4 sm:$0xff]   ;;  %v2282_v41 = vcombine.low %v341_v32, %v342_v34  ;;  %v2954_v45 = vcombine.low %v342_v34, %v343_v39 }
  0x16   : > { %918 = vmatprep.subr.bf16.mxu0 %v2580_v6  ;;  %633 = vrot.lane.b32.xlu0 %v2880_v17, %s2773_s16  ;;  %v344_v42 = vld [vmem:[%s2856_s24 + $0x30] sm:$0xf]  ;;  %v2600_v44 = vld [vmem:[%s3514_s1 + $0x84] ss:$8 sps:$4 sm:$0xff]   ;;  %v345_v46 = vld [vmem:[%s2856_s24 + $0x34] sm:$0xf] }
  0x17   : > { %608 = vrot.lane.b32.xlu1 %v2279_v15, %s2771_s29  ;;  %v2599_v43 = vld [vmem:[%s3514_s1 + $0x90] ss:$8 sps:$4 sm:$0xff]   ;;  %v2602_v47 = vld [vmem:[%s3514_s1 + $0x80] ss:$8 sps:$4 sm:$0xff]   ;;  %v2283_v48 = vcombine.low %v343_v39, %v344_v42  ;;  %v2965_v50 = vcombine.low %v344_v42, %v345_v46  ;;  %v347_v51 = vld [vmem:[%s2856_s24 + $0x3c] sm:$0xf] }
  0x18   : > { %v346_v49 = vld [vmem:[%s2856_s24 + $0x38] sm:$0xf]  ;;  %v348_v53 = vld [vmem:[%s2856_s24 + $0x40] sm:$0xf]  ;;  %v349_v55 = vld [vmem:[%s2856_s24 + $0x44] sm:$0xf] }
  0x19   : > { %919 = vmatpush1.bf16.msra.mxu0 %v2584_v18  ;;  %v2284_v52 = vcombine.low %v345_v46, %v346_v49  ;;  %v2973_v54 = vcombine.low %v346_v49, %v347_v51  ;;  %v2285_v56 = vcombine.low %v347_v51, %v348_v53  ;;  %v350_v57 = vld [vmem:[%s2856_s24 + $0x48] sm:$0xf]  ;;  %v2981_v58 = vcombine.low %v348_v53, %v349_v55  ;;  %v351_v59 = vld [vmem:[%s2856_s24 + $0x4c] sm:$0xf]  ;;  %v352_v61 = vld [vmem:[%s2856_s24 + $0x50] sm:$0xf] }
  0x1a   : > { %920 = vmatprep.subr.bf16.mxu0 %v2585_v20  ;;  %635 = vrot.lane.b32.xlu0 %v2878_v16, %s2773_s16  ;;  %v2286_v60 = vcombine.low %v349_v55, %v350_v57  ;;  %v2989_v62 = vcombine.low %v350_v57, %v351_v59  ;;  %v353_v63 = vld [vmem:[%s2856_s24 + $0x54] sm:$0xf]  ;;  %v2287_v0 = vcombine.low %v351_v59, %v352_v61  ;;  %v354_v1 = vld [vmem:[%s2856_s24 + $0x58] sm:$0xf]  ;;  %v355_v3 = vld [vmem:[%s2856_s24 + $0x5c] sm:$0xf] }
  0x1b   : > { %662 = vrot.lane.b32.xlu1 %v2280_v21, %s2772_s11  ;;  %v2997_v2 = vcombine.low %v352_v61, %v353_v63  ;;  %v2288_v4 = vcombine.low %v353_v63, %v354_v1  ;;  %v356_v5 = vld [vmem:[%s2856_s24 + $0x60] sm:$0xf]  ;;  %v3005_v6 = vcombine.low %v354_v1, %v355_v3  ;;  %v357_v8 = vld [vmem:[%s2856_s24 + $0x64] sm:$0xf]  ;;  %v2603_v14 = vld [vmem:[%s3516_s3 + $0x74] ss:$8 sps:$4 sm:$0xff]  }
  0x1c   : > { %v2289_v10 = vcombine.low %v355_v3, %v356_v5  ;;  %v3012_v12 = vcombine.low %v356_v5, %v357_v8  ;;  %v2291_v13 = vcombine.low %v357_v8, %v2897_v23  ;;  %v2605_v15 = vld [vmem:[%s3516_s3 + $0x70] ss:$8 sps:$4 sm:$0xff]   ;;  %v2606_v18 = vld [vmem:[%s3516_s3 + $0x64] ss:$8 sps:$4 sm:$0xff]   ;;  %1590 = vmatprep.subr.bf16.mxu1 %v2603_v14  ;;  %v2608_v19 = vld [vmem:[%s3516_s3 + $0x60] ss:$8 sps:$4 sm:$0xff]  }
  0x1d   : > { %921 = vmatpush1.bf16.msra.mxu0 %v2587_v24  ;;  %1591 = vmatpush1.bf16.msra.mxu1 %v2605_v15  ;;  %v2609_v20 = vld [vmem:[%s3516_s3 + $0x54] ss:$8 sps:$4 sm:$0xff]   ;;  %v2612_v22 = vld [vmem:[%s3516_s3 + $0x44] ss:$8 sps:$4 sm:$0xff]   ;;  %v2614_v24 = vld [vmem:[%s3516_s3 + $0x40] ss:$8 sps:$4 sm:$0xff]  }
  0x1e   : > { %922 = vmatprep.subr.bf16.mxu0 %v2588_v26  ;;  %610 = vrot.lane.b32.xlu0 %v2280_v21, %s2771_s29  ;;  %v2611_v21 = vld [vmem:[%s3516_s3 + $0x50] ss:$8 sps:$4 sm:$0xff]   ;;  %v2615_v26 = vld [vmem:[%s3516_s3 + $0x34] ss:$8 sps:$4 sm:$0xff]   ;;  %v2624_v34 = vld [vmem:[%s3516_s3 + $0x4] ss:$8 sps:$4 sm:$0xff]  }
  0x1f   : > { %637 = vrot.lane.b32.xlu1 %v2913_v28, %s2773_s16  ;;  %1592 = vmatprep.subr.bf16.mxu1 %v2606_v18  ;;  %v2617_v29 = vld [vmem:[%s3516_s3 + $0x30] ss:$8 sps:$4 sm:$0xff]   ;;  %v2621_v32 = vld [vmem:[%s3516_s3 + $0x14] ss:$8 sps:$4 sm:$0xff]   ;;  %vm749_vm2 = vcmask 785408   ;;  %vm2776_vm3 = vmmov 0  }
  0x20   : > { %v2648_v23 = vld [vmem:[%s3516_s3 + $0xa4] ss:$8 sps:$4 sm:$0xff]   ;;  %v2650_v25 = vld [vmem:[%s3516_s3 + $0xa0] ss:$8 sps:$4 sm:$0xff]   ;;  %s2265_s17 = sshll.u32 %s3524_s10, 3 }
  0x21   : > { %923 = vmatpush1.bf16.msra.mxu0 %v2590_v30  ;;  %1593 = vmatpush1.bf16.msra.mxu1 %v2608_v19  ;;  %v2618_v30 = vld [vmem:[%s3516_s3 + $0x24] ss:$8 sps:$4 sm:$0xff]   ;;  %s330_s20 = scalar_lea.vmem %s3522_s9, %s2265_s17 }
  0x22   : > { %924 = vmatprep.subr.bf16.mxu0 %v2591_v31  ;;  %664 = vrot.lane.b32.xlu0 %v2281_v33, %s2772_s11  ;;  %v2620_v31 = vld [vmem:[%s3516_s3 + $0x20] ss:$8 sps:$4 sm:$0xff]  }
  0x23   : > { %612 = vrot.lane.b32.xlu1 %v2281_v33, %s2771_s29  ;;  %1594 = vmatprep.subr.bf16.mxu1 %v2609_v20  ;;  %v2623_v33 = vld [vmem:[%s3516_s3 + $0x10] ss:$8 sps:$4 sm:$0xff]  }
  0x25   : > { %925 = vmatpush1.bf16.msra.mxu0 %v2593_v35  ;;  %1595 = vmatpush1.bf16.msra.mxu1 %v2611_v21  ;;  %v2626_v35 = vld [vmem:[%s3516_s3] ss:$8 sps:$4 sm:$0xff]  }
  0x26   : > { %926 = vmatprep.subr.bf16.mxu0 %v2594_v36  ;;  %639 = vrot.lane.b32.xlu0 %v2937_v38, %s2773_s16 }
  0x27   : > { %666 = vrot.lane.b32.xlu1 %v2282_v41, %s2772_s11  ;;  %1596 = vmatprep.subr.bf16.mxu1 %v2612_v22 }
  0x29   : > { %927 = vmatpush1.bf16.msra.mxu0 %v2596_v37  ;;  %1597 = vmatpush1.bf16.msra.mxu1 %v2614_v24 }
  0x2a   : > { %940 = vmatprep.subr.bf16.mxu0 %v2597_v40  ;;  %614 = vrot.lane.b32.xlu0 %v2282_v41, %s2771_s29 }
  0x2b   : > { %641 = vrot.lane.b32.xlu1 %v2954_v45, %s2773_s16  ;;  %1598 = vmatprep.subr.bf16.mxu1 %v2615_v26 }
  0x2d   : > { %941 = vmatpush2.bf16.msra.mxu0 %v2599_v43  ;;  %1599 = vmatpush1.bf16.msra.mxu1 %v2617_v29 }
  0x2e   : > { %942 = vmatprep.subr.bf16.mxu0 %v2600_v44  ;;  %668 = vrot.lane.b32.xlu0 %v2283_v48, %s2772_s11 }
  0x2f   : > { %616 = vrot.lane.b32.xlu1 %v2283_v48, %s2771_s29  ;;  %1600 = vmatprep.subr.bf16.mxu1 %v2618_v30 }
  0x31   : > { %943 = vmatpush2.bf16.msra.mxu0 %v2602_v47  ;;  %1601 = vmatpush1.bf16.msra.mxu1 %v2620_v31 }
  0x32   : > { %643 = vrot.lane.b32.xlu0 %v2965_v50, %s2773_s16  ;;  %1602 = vmatprep.subr.bf16.mxu1 %v2621_v32 }
  0x33   : > { %670 = vrot.lane.b32.xlu1 %v2284_v52, %s2772_s11 }
  0x35   : > { %1603 = vmatpush1.bf16.msra.mxu1 %v2623_v33 }
  0x36   : > { %618 = vrot.lane.b32.xlu0 %v2284_v52, %s2771_s29  ;;  %1604 = vmatprep.subr.bf16.mxu1 %v2624_v34 }
  0x37   : > { %645 = vrot.lane.b32.xlu1 %v2973_v54, %s2773_s16 }
  0x39   : > { %1605 = vmatpush1.bf16.msra.mxu1 %v2626_v35 }
  0x3a   : > { %672 = vrot.lane.b32.xlu0 %v2285_v56, %s2772_s11 }
  0x3b   : > { %620 = vrot.lane.b32.xlu1 %v2285_v56, %s2771_s29 }
  0x3e   : > { %647 = vrot.lane.b32.xlu0 %v2981_v58, %s2773_s16 }
  0x3f   : > { %674 = vrot.lane.b32.xlu1 %v2286_v60, %s2772_s11 }
  0x42   : > { %622 = vrot.lane.b32.xlu0 %v2286_v60, %s2771_s29 }
  0x43   : > { %649 = vrot.lane.b32.xlu1 %v2989_v62, %s2773_s16 }
  0x46   : > { %676 = vrot.lane.b32.xlu0 %v2287_v0, %s2772_s11 }
  0x47   : > { %624 = vrot.lane.b32.xlu1 %v2287_v0, %s2771_s29 }
  0x4a   : > { %651 = vrot.lane.b32.xlu0 %v2997_v2, %s2773_s16 }
  0x4b   : > { %678 = vrot.lane.b32.xlu1 %v2288_v4, %s2772_s11 }
  0x4e   : > { %626 = vrot.lane.b32.xlu0 %v2288_v4, %s2771_s29 }
  0x4f   : > { %653 = vrot.lane.b32.xlu1 %v3005_v6, %s2773_s16 }
  0x52   : > { %680 = vrot.lane.b32.xlu0 %v2289_v10, %s2772_s11 }
  0x53   : > { %628 = vrot.lane.b32.xlu1 %v2289_v10, %s2771_s29 }
  0x56   : > { %655 = vrot.lane.b32.xlu0 %v3012_v12, %s2773_s16 }
  0x57   : > { %682 = vrot.lane.b32.xlu1 %v2291_v13, %s2772_s11 }
  0x84   : > { %v607_v36 = vpop.permute.xlu0 %606 }
  0x85   : > { %v661_v37 = vpop.permute.xlu1 %660  ;;  %v690_v39 = vsel %vm687_vm0, %v2266_v11, %v607_v36 }
  0x88   : > { %v634_v40 = vpop.permute.xlu0 %633 }
  0x89   : > { %v726_v41 = vsel %vm724_vm1, %v690_v39, %v634_v40  ;;  %v609_v42 = vpop.permute.xlu1 %608 }
  0x8a   : > { %v751_v43 = vsel %vm749_vm2, %v726_v41, %v661_v37  ;;  %v693_v44 = vsel %vm687_vm0, %v2880_v17, %v609_v42  ;;  %v2627_v37 = vld [vmem:[%s3516_s3 + $0xf4] ss:$8 sps:$4 sm:$0xff]   ;;  %v2633_v42 = vld [vmem:[%s3516_s3 + $0xe4] ss:$8 sps:$4 sm:$0xff]  }
  0x8b   : > { %945 = vmatmul.mubr.bf16.vlgmr.msra.gmra.mxu0 %v751_v43  ;;  %1606 = vmatprep.subr.bf16.mxu1 %v2627_v37  ;;  %v2632_v41 = vld [vmem:[%s3516_s3 + $0x274] ss:$8 sps:$4 sm:$0xff]  }
  0x8c   : > { %v636_v46 = vpop.permute.xlu0 %635  ;;  %2314 = vmatprep.mubr.msk.bf16.mxu0 %vm687_vm0, %v2913_v28  ;;  %1736 = vmatprep.subr.bf16.mxu0 %v2632_v41 }
  0x8d   : > { %v728_v47 = vsel %vm724_vm1, %v693_v44, %v636_v46  ;;  %v663_v48 = vpop.permute.xlu1 %662  ;;  %v2635_v44 = vld [vmem:[%s3516_s3 + $0xe0] ss:$8 sps:$4 sm:$0xff]  }
  0x8e   : > { %v754_v9 = vsel %vm749_vm2, %v728_v47, %v663_v48 }
  0x90   : > { %v611_v7 = vpop.permute.xlu0 %610 }
  0x91   : > { %v638_v11 = vpop.permute.xlu1 %637  ;;  %v696_v49 = vsel %vm687_vm0, %v2878_v16, %v611_v7  ;;  %v2636_v7 = vld [vmem:[%s3516_s3 + $0xd4] ss:$8 sps:$4 sm:$0xff]  }
  0x92   : > { %v730_v17 = vsel %vm724_vm1, %v696_v49, %v638_v11 }
  0x93   : > { %955 = vmatmul.mubr.bf16.gmra.mxu0 %v754_v9  ;;  %v2638_v9 = vld [vmem:[%s3516_s3 + $0xd0] ss:$8 sps:$4 sm:$0xff]  }
  0x94   : > { %2315 = vmatprep.mubr.msk.bf16.mxu0 %vm687_vm0, %v2937_v38  ;;  %v665_v51 = vpop.permute.xlu0 %664 }
  0x95   : > { %v613_v52 = vpop.permute.xlu1 %612  ;;  %v757_v55 = vsel %vm749_vm2, %v730_v17, %v665_v51  ;;  %v2641_v17 = vld [vmem:[%s3516_s3 + $0xc0] ss:$8 sps:$4 sm:$0xff]  }
  0x96   : > { %v699_v56 = vsel %vm687_vm0, %v2913_v28, %v613_v52 }
  0x98   : > { %v640_v53 = vpop.permute.xlu0 %639 }
  0x99   : > { %v732_v57 = vsel %vm724_vm1, %v699_v56, %v640_v53  ;;  %v667_v16 = vpop.permute.xlu1 %666  ;;  %v2647_v56 = vld [vmem:[%s3516_s3 + $0xb0] ss:$8 sps:$4 sm:$0xff]  }
  0x9a   : > { %v760_v60 = vsel %vm749_vm2, %v732_v57, %v667_v16  ;;  %v2642_v57 = vld [vmem:[%s3516_s3 + $0x260] ss:$8 sps:$4 sm:$0xff]  }
  0x9b   : > { %965 = vmatmul.mubr.bf16.gmra.mxu0 %v757_v55  ;;  %v2645_v55 = vld [vmem:[%s3516_s3 + $0xb4] ss:$8 sps:$4 sm:$0xff]  }
  0x9c   : > { %2316 = vmatprep.mubr.msk.bf16.mxu0 %vm687_vm0, %v2954_v45  ;;  %v615_v59 = vpop.permute.xlu0 %614 }
  0x9d   : > { %v642_v61 = vpop.permute.xlu1 %641  ;;  %v702_v63 = vsel %vm687_vm0, %v2937_v38, %v615_v59 }
  0x9e   : > { %v734_v28 = vsel %vm724_vm1, %v702_v63, %v642_v61  ;;  %v2653_v61 = vld [vmem:[%s3516_s3 + $0x90] ss:$8 sps:$4 sm:$0xff]  }
  0x9f   : > { %v2654_v63 = vld [vmem:[%s3516_s3 + $0x250] ss:$8 sps:$4 sm:$0xff]  }
  0xa0   : > { %v669_v0 = vpop.permute.xlu0 %668 }
  0xa1   : > { %v617_v1 = vpop.permute.xlu1 %616  ;;  %v763_v3 = vsel %vm749_vm2, %v734_v28, %v669_v0  ;;  %v2656_v28 = vld [vmem:[%s3516_s3 + $0x254] ss:$8 sps:$4 sm:$0xff]   ;;  %v2657_v0 = vld [vmem:[%s3516_s3 + $0x84] ss:$8 sps:$4 sm:$0xff]  }
  0xa2   : > { %v705_v5 = vsel %vm687_vm0, %v2954_v45, %v617_v1  ;;  %v2659_v1 = vld [vmem:[%s3516_s3 + $0x80] ss:$8 sps:$4 sm:$0xff]  }
  0xa3   : > { %975 = vmatmul.mubr.bf16.gmra.mxu0 %v760_v60  ;;  %v2651_v60 = vld [vmem:[%s3516_s3 + $0x94] ss:$8 sps:$4 sm:$0xff]  }
  0xa4   : > { %2317 = vmatprep.mubr.msk.bf16.mxu0 %vm687_vm0, %v2965_v50  ;;  %v644_v4 = vpop.permute.xlu0 %643 }
  0xa5   : > { %v736_v38 = vsel %vm724_vm1, %v705_v5, %v644_v4  ;;  %v671_v8 = vpop.permute.xlu1 %670  ;;  %v2668_v4 = vld [vmem:[%s3516_s3 + $0x244] ss:$8 sps:$4 sm:$0xff]   ;;  %v2666_v5 = vld [vmem:[%s3516_s3 + $0x240] ss:$8 sps:$4 sm:$0xff]  }
  0xa6   : > { %v766_v13 = vsel %vm749_vm2, %v736_v38, %v671_v8  ;;  %v2674_v38 = vld [vmem:[%s3516_s3 + $0x234] ss:$8 sps:$4 sm:$0xff]   ;;  %v2672_v8 = vld [vmem:[%s3516_s3 + $0x230] ss:$8 sps:$4 sm:$0xff]  }
  0xa8   : > { %v619_v10 = vpop.permute.xlu0 %618 }
  0xa9   : > { %v646_v14 = vpop.permute.xlu1 %645  ;;  %v708_v15 = vsel %vm687_vm0, %v2965_v50, %v619_v10  ;;  %v2680_v10 = vld [vmem:[%s3516_s3 + $0x224] ss:$8 sps:$4 sm:$0xff]  }
  0xaa   : > { %v738_v45 = vsel %vm724_vm1, %v708_v15, %v646_v14  ;;  %v2686_v14 = vld [vmem:[%s3516_s3 + $0x214] ss:$8 sps:$4 sm:$0xff]   ;;  %v2684_v15 = vld [vmem:[%s3516_s3 + $0x210] ss:$8 sps:$4 sm:$0xff]  }
  0xab   : > { %985 = vmatmul.mubr.bf16.gmra.mxu0 %v763_v3  ;;  %v2662_v3 = vld [vmem:[%s3516_s3 + $0x174] ss:$8 sps:$4 sm:$0xff]  }
  0xac   : > { %2318 = vmatprep.mubr.msk.bf16.mxu0 %vm687_vm0, %v2973_v54  ;;  %v673_v18 = vpop.permute.xlu0 %672 }
  0xad   : > { %v621_v19 = vpop.permute.xlu1 %620  ;;  %v769_v20 = vsel %vm749_vm2, %v738_v45, %v673_v18  ;;  %v2692_v45 = vld [vmem:[%s3516_s3 + $0x204] ss:$8 sps:$4 sm:$0xff]   ;;  %v2690_v18 = vld [vmem:[%s3516_s3 + $0x200] ss:$8 sps:$4 sm:$0xff]  }
  0xae   : > { %v711_v22 = vsel %vm687_vm0, %v2973_v54, %v621_v19  ;;  %v2774_v19 = vmov 0  }
  0xb0   : > { %v648_v21 = vpop.permute.xlu0 %647 }
  0xb1   : > { %v740_v50 = vsel %vm724_vm1, %v711_v22, %v648_v21  ;;  %v675_v24 = vpop.permute.xlu1 %674 }
  0xb2   : > { %v772_v29 = vsel %vm749_vm2, %v740_v50, %v675_v24 }
  0xb3   : > { %995 = vmatmul.mubr.bf16.gmra.mxu0 %v766_v13  ;;  %v2678_v13 = vld [vmem:[%s3516_s3 + $0x220] ss:$8 sps:$4 sm:$0xff]  }
  0xb4   : > { %2319 = vmatprep.mubr.msk.bf16.mxu0 %vm687_vm0, %v2981_v58  ;;  %v623_v26 = vpop.permute.xlu0 %622 }
  0xb5   : > { %v650_v30 = vpop.permute.xlu1 %649  ;;  %v714_v31 = vsel %vm687_vm0, %v2981_v58, %v623_v26  ;;  %v2629_v58 = vld [vmem:[%s3516_s3 + $0xf0] ss:$8 sps:$4 sm:$0xff]  }
  0xb6   : > { %v742_v54 = vsel %vm724_vm1, %v714_v31, %v650_v30  ;;  %1607 = vmatpush2.bf16.msra.mxu1 %v2629_v58 }
  0xb7   : > { %1608 = vmatprep.subr.bf16.mxu1 %v2633_v42 }
  0xb8   : > { %v677_v32 = vpop.permute.xlu0 %676 }
  0xb9   : > { %v625_v33 = vpop.permute.xlu1 %624  ;;  %v775_v34 = vsel %vm749_vm2, %v742_v54, %v677_v32 }
  0xba   : > { %v717_v36 = vsel %vm687_vm0, %v2989_v62, %v625_v33  ;;  %1609 = vmatpush2.bf16.msra.mxu1 %v2635_v44 }
  0xbb   : > { %1005 = vmatmul.mubr.bf16.gmra.mxu0 %v769_v20  ;;  %1610 = vmatprep.subr.bf16.mxu1 %v2636_v7 }
  0xbc   : > { %2320 = vmatprep.mubr.msk.bf16.mxu0 %vm687_vm0, %v2989_v62  ;;  %v652_v35 = vpop.permute.xlu0 %651  ;;  %v2630_v62 = vld [vmem:[%s3516_s3 + $0x270] ss:$8 sps:$4 sm:$0xff]  }
  0xbd   : > { %v744_v39 = vsel %vm724_vm1, %v717_v36, %v652_v35  ;;  %v679_v40 = vpop.permute.xlu1 %678  ;;  %1737 = vmatpush1.bf16.msra.mxu0 %v2630_v62 }
  0xbe   : > { %v778_v46 = vsel %vm749_vm2, %v744_v39, %v679_v40  ;;  %1611 = vmatpush2.bf16.msra.mxu1 %v2638_v9  ;;  %v3244_v40 = vld [vmem:[%s3515_s2] ss:$0 sm:$0xff] }
  0xc0   : > { %v627_v43 = vpop.permute.xlu0 %626 }
  0xc1   : > { %v654_v47 = vpop.permute.xlu1 %653  ;;  %v720_v48 = vsel %vm687_vm0, %v2997_v2, %v627_v43 }
  0xc2   : > { %v746_v11 = vsel %vm724_vm1, %v720_v48, %v654_v47 }
  0xc3   : > { %1015 = vmatmul.mubr.bf16.gmra.mxu0 %v772_v29 }
  0xc4   : > { %2321 = vmatprep.mubr.msk.bf16.mxu0 %vm687_vm0, %v2997_v2  ;;  %v681_v49 = vpop.permute.xlu0 %680  ;;  %v2639_v2 = vld [vmem:[%s3516_s3 + $0xc4] ss:$8 sps:$4 sm:$0xff]  }
  0xc5   : > { %v629_v51 = vpop.permute.xlu1 %628  ;;  %v781_v52 = vsel %vm749_vm2, %v746_v11, %v681_v49  ;;  %1612 = vmatprep.subr.bf16.mxu1 %v2639_v2 }
  0xc6   : > { %1613 = vmatpush2.bf16.msra.mxu1 %v2641_v17  ;;  %v2660_v17 = vld [vmem:[%s3516_s3 + $0x170] ss:$8 sps:$4 sm:$0xff]  }
  0xc7   : > { %1614 = vmatprep.subr.bf16.mxu1 %v2645_v55 }
  0xc8   : > { %v656_v53 = vpop.permute.xlu0 %655 }
  0xc9   : > { %v683_v59 = vpop.permute.xlu1 %682 }
  0xca   : > { %1615 = vmatpush2.bf16.msra.mxu1 %v2647_v56  ;;  %v2665_v56 = vld [vmem:[%s3516_s3 + $0x164] ss:$8 sps:$4 sm:$0xff]  }
  0xcb   : > { %1025 = vmatmul.mubr.bf16.gmra.mxu0 %v775_v34  ;;  %1616 = vmatprep.subr.bf16.mxu1 %v2648_v23  ;;  %v2671_v23 = vld [vmem:[%s3516_s3 + $0x154] ss:$8 sps:$4 sm:$0xff]  }
  0xcc   : > { %2322 = vmatprep.mubr.msk.bf16.mxu0 %vm687_vm0, %v3005_v6 }
  0xce   : > { %1617 = vmatpush2.bf16.msra.mxu1 %v2650_v25 }
  0xcf   : > { %1618 = vmatprep.subr.bf16.mxu1 %v2651_v60 }
  0xd2   : > { %1619 = vmatpush2.bf16.msra.mxu1 %v2653_v61  ;;  %v2669_v61 = vld [vmem:[%s3516_s3 + $0x150] ss:$8 sps:$4 sm:$0xff]  }
  0xd3   : > { %1035 = vmatmul.mubr.bf16.gmra.mxu0 %v778_v46  ;;  %1620 = vmatprep.subr.bf16.mxu1 %v2657_v0  ;;  %v2677_v0 = vld [vmem:[%s3516_s3 + $0x144] ss:$8 sps:$4 sm:$0xff]  }
  0xd4   : > { %2323 = vmatprep.mubr.msk.bf16.mxu0 %vm687_vm0, %v3012_v12  ;;  %v723_v12 = vsel %vm687_vm0, %v3005_v6, %v629_v51  ;;  %v2644_v6 = vld [vmem:[%s3516_s3 + $0x264] ss:$8 sps:$4 sm:$0xff]  }
  0xd5   : > { %v748_v16 = vsel %vm724_vm1, %v723_v12, %v656_v53  ;;  %1738 = vmatprep.subr.bf16.mxu0 %v2644_v6  ;;  %v2663_v6 = vld [vmem:[%s3516_s3 + $0x160] ss:$8 sps:$4 sm:$0xff]  }
  0xd6   : > { %1739 = vmatpush1.bf16.msra.mxu0 %v2642_v57  ;;  %1621 = vmatpush2.bf16.msra.mxu1 %v2659_v1 }
  0xd7   : > { %1740 = vmatprep.subr.bf16.mxu0 %v2656_v28  ;;  %1663 = vmatprep.subr.bf16.mxu1 %v2662_v3 }
  0xda   : > { %1741 = vmatpush1.bf16.msra.mxu0 %v2654_v63 }
  0xdb   : > { %1045 = vmatmul.mubr.bf16.gmra.mxu0 %v781_v52  ;;  %1742 = vmatprep.subr.bf16.mxu0 %v2668_v4 }
  0xdc   : > { %2324 = vmatprep.mubr.msk.bf16.mxu0 %vm687_vm0, %v2292_v27  ;;  %v784_v27 = vsel %vm749_vm2, %v748_v16, %v683_v59 }
  0xde   : > { %1743 = vmatpush1.bf16.msra.mxu0 %v2666_v5  ;;  %v2675_v5 = vld [vmem:[%s3516_s3 + $0x140] ss:$8 sps:$4 sm:$0xff]  }
  0xdf   : > { %1744 = vmatprep.subr.bf16.mxu0 %v2674_v38 }
  0xe2   : > { %1745 = vmatpush1.bf16.msra.mxu0 %v2672_v8 }
  0xe3   : > { %1055 = vmatmul.mubr.bf16.gmra.mxu0 %v784_v27  ;;  %1746 = vmatprep.subr.bf16.mxu0 %v2680_v10  ;;  %v2683_v10 = vld [vmem:[%s3516_s3 + $0x134] ss:$8 sps:$4 sm:$0xff]  }
  0xe4   : > { %1768 = vmatprep.mubr.bf16.mxu0 %v2774_v19 }
  0xe6   : > { %1747 = vmatpush1.bf16.msra.mxu0 %v2678_v13 }
  0xe7   : > { %1748 = vmatprep.subr.bf16.mxu0 %v2686_v14 }
  0xea   : > { %1749 = vmatpush1.bf16.msra.mxu0 %v2684_v15 }
  0xeb   : > { %1750 = vmatprep.subr.bf16.mxu0 %v2692_v45 }
  0xee   : > { %1751 = vmatpush1.bf16.msra.mxu0 %v2690_v18 }
 0x14b   : > { %v946_v20 = vpop.f32.mrf.mxu0 }
 0x14d   : > { %v948_v21 = vpop.f32.mrf.mxu0 }
 0x14e   : > { %v1065_v35 = vmax.f32 %v946_v20, %v948_v21  ;;  %v2681_v20 = vld [vmem:[%s3516_s3 + $0x130] ss:$8 sps:$4 sm:$0xff]  }
 0x14f   : > { %v950_v22 = vpop.f32.mrf.mxu0 }
 0x151   : > { %v952_v50 = vpop.f32.mrf.mxu0 }
 0x152   : > { %v1066_v32 = vmax.f32 %v950_v22, %v952_v50  ;;  %v2689_v50 = vld [vmem:[%s3516_s3 + $0x124] ss:$8 sps:$4 sm:$0xff]  }
 0x153   : > { %v956_v24 = vpop.f32.mrf.mxu0 }
 0x154   : > { %v1089_v58 = vmax.f32 %v1065_v35, %v1066_v32 }
 0x155   : > { %v958_v26 = vpop.f32.mrf.mxu0 }
 0x156   : > { %v1067_v33 = vmax.f32 %v956_v24, %v958_v26  ;;  %v1108_v46 = vadd.f32 %v3244_v40, %v1089_v58 }
 0x157   : > { %v960_v29 = vpop.f32.mrf.mxu0 }
 0x158   : > { %v1120_v49 = vmax.f32 %v1108_v46, 0.0  ;;  %v2701_v46 = vld [vmem:[%s3516_s3 + $0x1f4] ss:$8 sps:$4 sm:$0xff]  }
 0x159   : > { %v962_v30 = vpop.f32.mrf.mxu0 }
 0x15a   : > { %v1068_v31 = vmax.f32 %v960_v29, %v962_v30  ;;  %v2687_v30 = vld [vmem:[%s3516_s3 + $0x120] ss:$8 sps:$4 sm:$0xff]  }
 0x15b   : > { %v966_v54 = vpop.f32.mrf.mxu0 }
 0x15c   : > { %v1090_v36 = vmax.f32 %v1067_v33, %v1068_v31 }
 0x15d   : > { %v968_v34 = vpop.f32.mrf.mxu0 }
 0x15e   : > { %v1069_v62 = vmax.f32 %v966_v54, %v968_v34  ;;  %v1109_v43 = vadd.f32 %v3244_v40, %v1090_v36  ;;  %v2695_v54 = vld [vmem:[%s3516_s3 + $0x114] ss:$8 sps:$4 sm:$0xff]  }
 0x15f   : > { %v970_v37 = vpop.f32.mrf.mxu0 }
 0x160   : > { %v1121_v9 = vmax.f32 %v1109_v43, 0.0  ;;  %v2696_v43 = vld [vmem:[%s3516_s3 + $0x100] ss:$8 sps:$4 sm:$0xff]  }
 0x161   : > { %v972_v39 = vpop.f32.mrf.mxu0 }
 0x162   : > { %v1070_v41 = vmax.f32 %v970_v37, %v972_v39  ;;  %v2459_v55 = vpack.c.bf16 %v1121_v9, %v1120_v49  ;;  %v2693_v37 = vld [vmem:[%s3516_s3 + $0x110] ss:$8 sps:$4 sm:$0xff]   ;;  %v2698_v39 = vld [vmem:[%s3516_s3 + $0x104] ss:$8 sps:$4 sm:$0xff]  }
 0x163   : > { %v976_v42 = vpop.f32.mrf.mxu0  ;;  %v2699_v49 = vld [vmem:[%s3516_s3 + $0x1f0] ss:$8 sps:$4 sm:$0xff]  }
 0x164   : > { %v1091_v44 = vmax.f32 %v1069_v62, %v1070_v41 }
 0x165   : > { %v978_v47 = vpop.f32.mrf.mxu0 }
 0x166   : > { %v1110_v48 = vadd.f32 %v3244_v40, %v1091_v44  ;;  %v1071_v52 = vmax.f32 %v976_v42, %v978_v47 }
 0x167   : > { %v980_v7 = vpop.f32.mrf.mxu0 }
 0x168   : > { %v1122_v11 = vmax.f32 %v1110_v48, 0.0 }
 0x169   : > { %v982_v2 = vpop.f32.mrf.mxu0 }
 0x16a   : > { %v2463_v51 = vpack.c.bf16 %v1122_v11, %v1121_v9  ;;  %v1072_v12 = vmax.f32 %v980_v7, %v982_v2 }
 0x16b   : > { %v986_v53 = vpop.f32.mrf.mxu0 }
 0x16c   : > { %1622 = vmatprep.mubr.bf16.mxu1 %v2463_v51  ;;  %v1092_v16 = vmax.f32 %v1071_v52, %v1072_v12  ;;  %v2704_v51 = vld [vmem:[%s3516_s3 + $0x1e4] ss:$8 sps:$4 sm:$0xff]  }
 0x16d   : > { %v988_v57 = vpop.f32.mrf.mxu0  ;;  %1623 = vmatmul.mubr.bf16.vlgmr.msra.gmra.mxu1 %v2459_v55 }
 0x16e   : > { %1664 = vmatpush1.bf16.msra.mxu1 %v2660_v17  ;;  %v1073_v25 = vmax.f32 %v986_v53, %v988_v57  ;;  %v1111_v63 = vadd.f32 %v3244_v40, %v1092_v16  ;;  %v2702_v53 = vld [vmem:[%s3516_s3 + $0x1e0] ss:$8 sps:$4 sm:$0xff]  }
 0x16f   : > { %v990_v59 = vpop.f32.mrf.mxu0  ;;  %1665 = vmatprep.subr.bf16.mxu1 %v2665_v56  ;;  %v2707_v56 = vld [vmem:[%s3516_s3 + $0x1d4] ss:$8 sps:$4 sm:$0xff]  }
 0x170   : > { %v1123_v38 = vmax.f32 %v1111_v63, 0.0 }
 0x171   : > { %v992_v27 = vpop.f32.mrf.mxu0 }
 0x172   : > { %v1074_v60 = vmax.f32 %v990_v59, %v992_v27  ;;  %1666 = vmatpush1.bf16.msra.mxu1 %v2663_v6  ;;  %v3280_v22 = vpack.c.bf16 %v1123_v38, %v1122_v11 }
 0x173   : > { %v996_v28 = vpop.f32.mrf.mxu0  ;;  %1667 = vmatprep.subr.bf16.mxu1 %v2671_v23  ;;  %v2705_v23 = vld [vmem:[%s3516_s3 + $0x1d0] ss:$8 sps:$4 sm:$0xff]  }
 0x174   : > { %v1093_v1 = vmax.f32 %v1073_v25, %v1074_v60  ;;  %v2710_v60 = vld [vmem:[%s3516_s3 + $0x1c4] ss:$8 sps:$4 sm:$0xff]  }
 0x175   : > { %v998_v3 = vpop.f32.mrf.mxu0 }
 0x176   : > { %v1112_v4 = vadd.f32 %v3244_v40, %v1093_v1  ;;  %1668 = vmatpush1.bf16.msra.mxu1 %v2669_v61  ;;  %v1075_v14 = vmax.f32 %v996_v28, %v998_v3  ;;  %v2713_v3 = vld [vmem:[%s3516_s3 + $0x1b4] ss:$8 sps:$4 sm:$0xff]  }
 0x177   : > { %v1000_v8 = vpop.f32.mrf.mxu0  ;;  %1669 = vmatprep.subr.bf16.mxu1 %v2677_v0  ;;  %v2708_v0 = vld [vmem:[%s3516_s3 + $0x1c0] ss:$8 sps:$4 sm:$0xff]  }
 0x178   : > { %v1124_v13 = vmax.f32 %v1112_v4, 0.0 }
 0x179   : > { %v1002_v15 = vpop.f32.mrf.mxu0 }
 0x17a   : > { %v1076_v45 = vmax.f32 %v1000_v8, %v1002_v15  ;;  %1670 = vmatpush1.bf16.msra.mxu1 %v2675_v5  ;;  %v3275_v18 = vpack.c.bf16 %v1124_v13, %v1123_v38  ;;  %v2716_v15 = vld [vmem:[%s3516_s3 + $0x1a4] ss:$8 sps:$4 sm:$0xff]  }
 0x17b   : > { %v1006_v21 = vpop.f32.mrf.mxu0  ;;  %1671 = vmatprep.subr.bf16.mxu1 %v2683_v10 }
 0x17c   : > { %v1094_v24 = vmax.f32 %v1075_v14, %v1076_v45  ;;  %1632 = vmatprep.mubr.bf16.mxu1 %v3275_v18 }
 0x17d   : > { %v1008_v26 = vpop.f32.mrf.mxu0  ;;  %1633 = vmatmul.mubr.bf16.gmra.mxu1 %v3280_v22 }
 0x17e   : > { %v1113_v29 = vadd.f32 %v3244_v40, %v1094_v24  ;;  %1672 = vmatpush1.bf16.msra.mxu1 %v2681_v20  ;;  %v1077_v33 = vmax.f32 %v1006_v21, %v1008_v26  ;;  %v2719_v26 = vld [vmem:[%s3516_s3 + $0x194] ss:$8 sps:$4 sm:$0xff]  }
 0x17f   : > { %v1010_v31 = vpop.f32.mrf.mxu0  ;;  %1673 = vmatprep.subr.bf16.mxu1 %v2689_v50  ;;  %v2714_v50 = vld [vmem:[%s3516_s3 + $0x1a0] ss:$8 sps:$4 sm:$0xff]  }
 0x180   : > { %v1125_v32 = vmax.f32 %v1113_v29, 0.0 }
 0x181   : > { %v1012_v34 = vpop.f32.mrf.mxu0 }
 0x182   : > { %v3294_v35 = vpack.c.bf16 %v1125_v32, %v1124_v13  ;;  %v1078_v36 = vmax.f32 %v1010_v31, %v1012_v34  ;;  %1674 = vmatpush1.bf16.msra.mxu1 %v2687_v30  ;;  %v2711_v13 = vld [vmem:[%s3516_s3 + $0x1b0] ss:$8 sps:$4 sm:$0xff]  }
 0x183   : > { %v1016_v58 = vpop.f32.mrf.mxu0  ;;  %1675 = vmatprep.subr.bf16.mxu1 %v2695_v54  ;;  %v2717_v31 = vld [vmem:[%s3516_s3 + $0x190] ss:$8 sps:$4 sm:$0xff]  }
 0x184   : > { %v1095_v62 = vmax.f32 %v1077_v33, %v1078_v36  ;;  %1769 = vmatmul.mubr.bf16.vlgmr.msra.gmra.mxu0 %v3294_v35 }
 0x185   : > { %v1018_v41 = vpop.f32.mrf.mxu0  ;;  %1778 = vmatprep.mubr.bf16.mxu0 %v2774_v19 }
 0x186   : > { %v1114_v42 = vadd.f32 %v3244_v40, %v1095_v62  ;;  %1676 = vmatpush1.bf16.msra.mxu1 %v2693_v37  ;;  %v1079_v48 = vmax.f32 %v1016_v58, %v1018_v41  ;;  %v2720_v37 = vld [vmem:[%s3516_s3 + $0x180] ss:$8 sps:$4 sm:$0xff]  }
 0x187   : > { %v1020_v44 = vpop.f32.mrf.mxu0  ;;  %1677 = vmatprep.subr.bf16.mxu1 %v2698_v39 }
 0x188   : > { %v1126_v47 = vmax.f32 %v1114_v42, 0.0 }
 0x189   : > { %v1022_v7 = vpop.f32.mrf.mxu0 }
 0x18a   : > { %v1080_v9 = vmax.f32 %v1020_v44, %v1022_v7  ;;  %1678 = vmatpush1.bf16.msra.mxu1 %v2696_v43  ;;  %v3311_v11 = vpack.c.bf16 %v1126_v47, %v1125_v32 }
 0x18b   : > { %v1026_v2 = vpop.f32.mrf.mxu0  ;;  %1679 = vmatprep.subr.bf16.mxu1 %v2701_v46 }
 0x18c   : > { %v1096_v17 = vmax.f32 %v1079_v48, %v1080_v9  ;;  %1642 = vmatprep.mubr.bf16.mxu1 %v3311_v11  ;;  %v2726_v9 = vld [vmem:[%s3518_s5 + $0x30] sm:$0xff]  }
 0x18d   : > { %v1028_v52 = vpop.f32.mrf.mxu0  ;;  %1643 = vmatmul.mubr.bf16.gmra.mxu1 %v3294_v35 }
 0x18e   : > { %v1115_v12 = vadd.f32 %v3244_v40, %v1096_v17  ;;  %1680 = vmatpush2.bf16.msra.mxu1 %v2699_v49  ;;  %v1081_v6 = vmax.f32 %v1026_v2, %v1028_v52  ;;  %v2728_v49 = vld [vmem:[%s3518_s5 + $0x28] sm:$0xff]   ;;  %v2729_v2 = vld [vmem:[%s3518_s5 + $0x60] sm:$0xff]   ;;  %v2731_v17 = vld [vmem:[%s3518_s5 + $0xf8] sm:$0xff]  }
 0x18f   : > { %v1030_v55 = vpop.f32.mrf.mxu0  ;;  %1681 = vmatprep.subr.bf16.mxu1 %v2704_v51  ;;  %v2730_v51 = vld [vmem:[%s3518_s5 + $0x20] sm:$0xff]   ;;  %v2732_v52 = vld [vmem:[%s3518_s5 + $0x58] sm:$0xff]   ;;  %2492 = vmatprep.subr.bf16.mxu0 %v2731_v17 }
 0x190   : > { %v1127_v57 = vmax.f32 %v1115_v12, 0.0  ;;  %v2733_v12 = vld [vmem:[%s3518_s5 + $0xb8] sm:$0xff]  }
 0x191   : > { %v1032_v16 = vpop.f32.mrf.mxu0  ;;  %2493 = vmatpush3.bf16.msra.mxu0 %v2733_v12 }
 0x192   : > { %v1082_v59 = vmax.f32 %v1030_v55, %v1032_v16  ;;  %1682 = vmatpush2.bf16.msra.mxu1 %v2702_v53  ;;  %v3331_v25 = vpack.c.bf16 %v1127_v57, %v1126_v47  ;;  %v2734_v53 = vld [vmem:[%s3518_s5 + $0x18] sm:$0xff]   ;;  %v2735_v55 = vld [vmem:[%s3518_s5 + $0xf0] sm:$0xff]   ;;  %v2739_v16 = vld [vmem:[%s3518_s5 + $0xe8] sm:$0xff]  }
 0x193   : > { %v1036_v27 = vpop.f32.mrf.mxu0  ;;  %1683 = vmatprep.subr.bf16.mxu1 %v2707_v56  ;;  %v2736_v56 = vld [vmem:[%s3518_s5 + $0x50] sm:$0xff]   ;;  %2494 = vmatprep.subr.bf16.mxu0 %v2735_v55 }
 0x194   : > { %v1097_v61 = vmax.f32 %v1081_v6, %v1082_v59  ;;  %1779 = vmatmul.mubr.bf16.gmra.mxu0 %v3331_v25  ;;  %v2738_v6 = vld [vmem:[%s3518_s5 + $0x10] sm:$0xff]   ;;  %v2740_v59 = vld [vmem:[%s3518_s5 + $0x48] sm:$0xff]  }
 0x195   : > { %v1038_v63 = vpop.f32.mrf.mxu0  ;;  %1788 = vmatprep.mubr.bf16.mxu0 %v2774_v19 }
 0x196   : > { %v1116_v28 = vadd.f32 %v3244_v40, %v1097_v61  ;;  %1684 = vmatpush2.bf16.msra.mxu1 %v2705_v23  ;;  %v1083_v5 = vmax.f32 %v1036_v27, %v1038_v63  ;;  %v2741_v23 = vld [vmem:[%s3518_s5 + $0xa8] sm:$0xff]   ;;  %v2743_v27 = vld [vmem:[%s3518_s5 + $0xe0] sm:$0xff]  }
 0x197   : > { %v1040_v1 = vpop.f32.mrf.mxu0  ;;  %1685 = vmatprep.subr.bf16.mxu1 %v2710_v60  ;;  %v2744_v60 = vld [vmem:[%s3518_s5 + $0x40] sm:$0xff]  }
 0x198   : > { %v1128_v4 = vmax.f32 %v1116_v28, 0.0  ;;  %v2745_v61 = vld [vmem:[%s3518_s5 + $0xa0] sm:$0xff]   ;;  %v2747_v28 = vld [vmem:[%s3518_s5 + $0xd8] sm:$0xff]  }
 0x199   : > { %v1042_v38 = vpop.f32.mrf.mxu0  ;;  %v2746_v63 = vld [vmem:[%s3518_s5] sm:$0xff]  }
 0x19a   : > { %v1084_v8 = vmax.f32 %v1040_v1, %v1042_v38  ;;  %1686 = vmatpush2.bf16.msra.mxu1 %v2708_v0  ;;  %v2466_v10 = vpack.c.bf16 %v1128_v4, %v1127_v57  ;;  %v2737_v57 = vld [vmem:[%s3518_s5 + $0xb0] sm:$0xff]   ;;  %v2748_v0 = vld [vmem:[%s3518_s5 + $0x98] sm:$0xff]   ;;  %v2753_v38 = vld [vmem:[%s3518_s5 + $0xc0] sm:$0xff]  }
 0x19b   : > { %v1046_v14 = vpop.f32.mrf.mxu0  ;;  %1687 = vmatprep.subr.bf16.mxu1 %v2713_v3  ;;  %2495 = vmatpush3.bf16.msra.mxu0 %v2737_v57  ;;  %v2749_v1 = vld [vmem:[%s3518_s5 + $0xd0] sm:$0xff]  }
 0x19c   : > { %v1098_v45 = vmax.f32 %v1083_v5, %v1084_v8  ;;  %1652 = vmatprep.mubr.bf16.mxu1 %v2466_v10  ;;  %2496 = vmatprep.subr.bf16.mxu0 %v2739_v16  ;;  %v2750_v3 = vld [vmem:[%s3518_s5 + $0x90] sm:$0xff]   ;;  %v2752_v5 = vld [vmem:[%s3518_s5 + $0x88] sm:$0xff]   ;;  %v2754_v8 = vld [vmem:[%s3518_s5 + $0x80] sm:$0xff]  }
 0x19d   : > { %v1048_v20 = vpop.f32.mrf.mxu0  ;;  %1653 = vmatmul.mubr.bf16.gmra.mxu1 %v3331_v25 }
 0x19e   : > { %v1117_v21 = vadd.f32 %v3244_v40, %v1098_v45  ;;  %1688 = vmatpush2.bf16.msra.mxu1 %v2711_v13  ;;  %1695 = vmatprep.mubr.bf16.mxu1 %v3275_v18  ;;  %v2722_v18 = vld [vmem:[%s3516_s3 + $0x184] ss:$8 sps:$4 sm:$0xff]   ;;  %v1085_v33 = vmax.f32 %v1046_v14, %v1048_v20 }
 0x19f   : > { %v1050_v24 = vpop.f32.mrf.mxu0  ;;  %1689 = vmatprep.subr.bf16.mxu1 %v2716_v15  ;;  %2497 = vmatpush3.bf16.msra.mxu0 %v2741_v23 }
 0x1a0   : > { %v1129_v29 = vmax.f32 %v1117_v21, 0.0  ;;  %2498 = vmatprep.subr.bf16.mxu0 %v2743_v27  ;;  %v2417_v27 = vld [vmem:[%s3517_s4] ss:$0 sm:$0xff] }
 0x1a1   : > { %v1052_v30 = vpop.f32.mrf.mxu0 }
 0x1a2   : > { %1690 = vmatpush2.bf16.msra.mxu1 %v2714_v50  ;;  %v2467_v54 = vpack.c.bf16 %v1129_v29, %v1128_v4  ;;  %v1086_v34 = vmax.f32 %v1050_v24, %v1052_v30  ;;  %v2751_v4 = vld [vmem:[%s3518_s5 + $0xc8] sm:$0xff]  }
 0x1a3   : > { %v1056_v32 = vpop.f32.mrf.mxu0  ;;  %1691 = vmatprep.subr.bf16.mxu1 %v2719_v26  ;;  %2499 = vmatpush3.bf16.msra.mxu0 %v2745_v61 }
 0x1a4   : > { %1789 = vmatmul.mubr.bf16.gmra.mxu0 %v2467_v54  ;;  %v1099_v39 = vmax.f32 %v1085_v33, %v1086_v34  ;;  %2500 = vmatprep.subr.bf16.mxu0 %v2747_v28 }
 0x1a5   : > { %v1058_v36 = vpop.f32.mrf.mxu0  ;;  %1798 = vmatprep.mubr.bf16.mxu0 %v2774_v19 }
 0x1a6   : > { %1692 = vmatpush2.bf16.msra.mxu1 %v2717_v31  ;;  %v1087_v62 = vmax.f32 %v1056_v32, %v1058_v36  ;;  %v1118_v43 = vadd.f32 %v3244_v40, %v1099_v39 }
 0x1a7   : > { %v1060_v58 = vpop.f32.mrf.mxu0  ;;  %1693 = vmatprep.subr.bf16.mxu1 %v2722_v18  ;;  %2501 = vmatpush3.bf16.msra.mxu0 %v2748_v0 }
 0x1a8   : > { %v1130_v19 = vmax.f32 %v1118_v43, 0.0  ;;  %2502 = vmatprep.subr.bf16.mxu0 %v2749_v1 }
 0x1a9   : > { %v1062_v41 = vpop.f32.mrf.mxu0 }
 0x1aa   : > { %v1088_v42 = vmax.f32 %v1060_v58, %v1062_v41  ;;  %1694 = vmatpush2.bf16.msra.mxu1 %v2720_v37  ;;  %v2468_v7 = vpack.c.bf16 %v1130_v19, %v1129_v29 }
 0x1ab   : > { %2503 = vmatpush3.bf16.msra.mxu0 %v2750_v3 }
 0x1ac   : > { %v1100_v44 = vmax.f32 %v1087_v62, %v1088_v42  ;;  %2504 = vmatprep.subr.bf16.mxu0 %v2751_v4 }
 0x1ad   : > { %1696 = vmatmul.mubr.bf16.vlgmr.msra.gmra.mxu1 %v3280_v22  ;;  %v2723_v22 = vld [vmem:[%s3518_s5 + $0x78] sm:$0xff]  }
 0x1ae   : > { %v1119_v46 = vadd.f32 %v3244_v40, %v1100_v44  ;;  %1705 = vmatprep.mubr.bf16.mxu1 %v3311_v11  ;;  %v2724_v40 = vld [vmem:[%s3518_s5 + $0x38] sm:$0xff]   ;;  %2470 = vmatprep.subr.bf16.mxu1 %v2723_v22  ;;  %v2727_v11 = vld [vmem:[%s3518_s5 + $0x68] sm:$0xff]  }
 0x1af   : > { %2471 = vmatpush3.bf16.msra.mxu1 %v2724_v40  ;;  %2505 = vmatpush3.bf16.msra.mxu0 %v2752_v5 }
 0x1b0   : > { %v1131_v47 = vmax.f32 %v1119_v46, 0.0  ;;  %2506 = vmatprep.subr.bf16.mxu0 %v2753_v38 }
 0x1b2   : > { %v2469_v48 = vpack.c.bf16 %v1131_v47, %v1130_v19 }
 0x1b3   : > { %2507 = vmatpush3.bf16.msra.mxu0 %v2754_v8 }
 0x1b4   : > { %1799 = vmatmul.mubr.bf16.gmra.mxu0 %v2469_v48 }
 0x1b5   : > { %1706 = vmatmul.mubr.bf16.gmra.mxu1 %v3294_v35  ;;  %v2725_v35 = vld [vmem:[%s3518_s5 + $0x70] sm:$0xff]  }
 0x1b6   : > { %1715 = vmatprep.mubr.bf16.mxu1 %v2466_v10  ;;  %2472 = vmatprep.subr.bf16.mxu1 %v2725_v35 }
 0x1b7   : > { %2473 = vmatpush3.bf16.msra.mxu1 %v2726_v9 }
 0x1b8   : > { %2474 = vmatprep.subr.bf16.mxu1 %v2727_v11 }
 0x1bb   : > { %2475 = vmatpush3.bf16.msra.mxu1 %v2728_v49 }
 0x1bc   : > { %2476 = vmatprep.subr.bf16.mxu1 %v2729_v2 }
 0x1bd   : > { %1716 = vmatmul.mubr.bf16.gmra.mxu1 %v3331_v25  ;;  %v2742_v25 = vld [vmem:[%s3518_s5 + $0x8] sm:$0xff]  }
 0x1be   : > { %1725 = vmatprep.mubr.bf16.mxu1 %v2468_v7 }
 0x1bf   : > { %2477 = vmatpush3.bf16.msra.mxu1 %v2730_v51 }
 0x1c0   : > { %2478 = vmatprep.subr.bf16.mxu1 %v2732_v52 }
 0x1c3   : > { %2479 = vmatpush3.bf16.msra.mxu1 %v2734_v53 }
 0x1c4   : > { %2480 = vmatprep.subr.bf16.mxu1 %v2736_v56 }
 0x1c5   : > { %1726 = vmatmul.mubr.bf16.gmra.mxu1 %v2467_v54 }
 0x1c7   : > { %2481 = vmatpush3.bf16.msra.mxu1 %v2738_v6 }
 0x1c8   : > { %2482 = vmatprep.subr.bf16.mxu1 %v2740_v59 }
 0x1cb   : > { %2483 = vmatpush3.bf16.msra.mxu1 %v2742_v25 }
 0x1cc   : > { %2484 = vmatprep.subr.bf16.mxu1 %v2744_v60 }
 0x1cf   : > { %2485 = vmatpush3.bf16.msra.mxu1 %v2746_v63 }
 0x22d   : > { %v1624_v10 = vpop.f32.mrf.mxu1 }
 0x22f   : > { %v1626_v13 = vpop.f32.mrf.mxu1 }
 0x231   : > { %v1628_v14 = vpop.f32.mrf.mxu1 }
 0x233   : > { %v1630_v15 = vpop.f32.mrf.mxu1 }
 0x23d   : > { %v1634_v45 = vpop.f32.mrf.mxu1 }
 0x23f   : > { %v1636_v20 = vpop.f32.mrf.mxu1 }
 0x241   : > { %v1638_v21 = vpop.f32.mrf.mxu1 }
 0x243   : > { %v1640_v50 = vpop.f32.mrf.mxu1 }
 0x244   : > { %v1770_v29 = vpop.f32.mrf.mxu0 }
 0x246   : > { %v1772_v31 = vpop.f32.mrf.mxu0 }
 0x248   : > { %v1774_v32 = vpop.f32.mrf.mxu0 }
 0x24a   : > { %v1776_v33 = vpop.f32.mrf.mxu0 }
 0x24d   : > { %v3472_v24 = vpop.f32.mrf.mxu1 }
 0x24f   : > { %v1646_v26 = vpop.f32.mrf.mxu1 }
 0x251   : > { %v1648_v30 = vpop.f32.mrf.mxu1 }
 0x253   : > { %v1650_v54 = vpop.f32.mrf.mxu1 }
 0x254   : > { %v1780_v36 = vpop.f32.mrf.mxu0 }
 0x256   : > { %v1782_v58 = vpop.f32.mrf.mxu0 }
 0x258   : > { %v1784_v62 = vpop.f32.mrf.mxu0 }
 0x25a   : > { %v1786_v43 = vpop.f32.mrf.mxu0 }
 0x25d   : > { %v3474_v18 = vpop.f32.mrf.mxu1 }
 0x25f   : > { %v1656_v34 = vpop.f32.mrf.mxu1 }
 0x261   : > { %v3476_v37 = vpop.f32.mrf.mxu1 }
 0x263   : > { %v3478_v39 = vpop.f32.mrf.mxu1 }
 0x264   : > { %v1790_v46 = vpop.f32.mrf.mxu0 }
 0x266   : > { %v1792_v9 = vpop.f32.mrf.mxu0 }
 0x268   : > { %v1794_v56 = vpop.f32.mrf.mxu0 }
 0x26a   : > { %v1796_v28 = vpop.f32.mrf.mxu0 }
 0x26d   : > { %v1697_v41 = vpop.f32.mrf.mxu1 }
 0x26e   : > { %v1698_v22 = vadd.f32 %v1697_v41, %v1624_v10 }
 0x26f   : > { %v1699_v42 = vpop.f32.mrf.mxu1 }
 0x270   : > { %v1700_v19 = vadd.f32 %v1699_v42, %v1626_v13  ;;  %v1771_v17 = vadd.f32 %v1770_v29, %v1698_v22 }
 0x271   : > { %v1701_v44 = vpop.f32.mrf.mxu1 }
 0x272   : > { %v1702_v47 = vadd.f32 %v1701_v44, %v1628_v14  ;;  %v1773_v11 = vadd.f32 %v1772_v31, %v1700_v19 }
 0x273   : > { %v1703_v48 = vpop.f32.mrf.mxu1 }
 0x274   : > { %v1704_v7 = vadd.f32 %v1703_v48, %v1630_v15  ;;  %v1775_v49 = vadd.f32 %v1774_v32, %v1702_v47  ;;  %v1809_v57 = vmax.f32 %v1771_v17, %v1773_v11  ;;  %v1800_v5 = vpop.f32.mrf.mxu0 }
 0x275   : > { %v1707_v40 = vpop.f32.mrf.mxu1 }
 0x276   : > { %v1777_v35 = vadd.f32 %v1776_v33, %v1704_v7  ;;  %v1708_v53 = vadd.f32 %v1707_v40, %v1634_v45 }
 0x277   : > { %v1709_v2 = vpop.f32.mrf.mxu1 }
 0x278   : > { %v1710_v51 = vadd.f32 %v1709_v2, %v1636_v20  ;;  %v1810_v52 = vmax.f32 %v1775_v49, %v1777_v35  ;;  %v1781_v60 = vadd.f32 %v1780_v36, %v1708_v53  ;;  %v2756_v53 = vld [vmem:[%s3520_s7 + $0x10] sm:$0xff]  }
 0x279   : > { %v1711_v12 = vpop.f32.mrf.mxu1 }
 0x27a   : > { %v1712_v55 = vadd.f32 %v1711_v12, %v1638_v21  ;;  %v1783_v16 = vadd.f32 %v1782_v58, %v1710_v51  ;;  %v1817_v23 = vmax.f32 %v1809_v57, %v1810_v52  ;;  %v1802_v21 = vpop.f32.mrf.mxu0  ;;  %v2775_v12 = vmov 0.0  }
 0x27b   : > { %v1713_v6 = vpop.f32.mrf.mxu1  ;;  %2519 = vmatprep.subr.bf16.mxu1 %v2775_v12 }
 0x27c   : > { %v1714_v59 = vadd.f32 %v1713_v6, %v1640_v50  ;;  %v1785_v61 = vadd.f32 %v1784_v62, %v1712_v55  ;;  %v1811_v1 = vmax.f32 %v1781_v60, %v1783_v16  ;;  %v1828_v4 = vadd.f32 %v2417_v27, %v1817_v23  ;;  %v2757_v55 = vld [vmem:[%s3520_s7 + $0x8] sm:$0xff]  }
 0x27d   : > { %v1717_v25 = vpop.f32.mrf.mxu1 }
 0x27e   : > { %v1787_v63 = vadd.f32 %v1786_v43, %v1714_v59  ;;  %v1832_v20 = vmax.f32 %v1828_v4, 0.0  ;;  %v1718_v50 = vadd.f32 %v1717_v25, %v3472_v24  ;;  %v1804_v43 = vpop.f32.mrf.mxu0  ;;  %v2418_v25 = vld [vmem:[%s3519_s6] ss:$0 sm:$0xff] }
 0x27f   : > { %v1719_v0 = vpop.f32.mrf.mxu1 }
 0x280   : > { %v1812_v3 = vmax.f32 %v1785_v61, %v1787_v63  ;;  %v1720_v10 = vadd.f32 %v1719_v0, %v1646_v26  ;;  %v1836_v42 = vpack.c.bf16 %v1832_v20, %v1832_v20  ;;  %v1791_v44 = vadd.f32 %v1790_v46, %v1718_v50  ;;  %v1806_v22 = vpop.f32.mrf.mxu0 }
 0x281   : > { %v1721_v38 = vpop.f32.mrf.mxu1 }
 0x282   : > { %v1818_v8 = vmax.f32 %v1811_v1, %v1812_v3  ;;  %v1722_v13 = vadd.f32 %v1721_v38, %v1648_v30  ;;  %v1793_v33 = vadd.f32 %v1792_v9, %v1720_v10 }
 0x283   : > { %v1723_v14 = vpop.f32.mrf.mxu1 }
 0x284   : > { %v1724_v15 = vadd.f32 %v1723_v14, %v1650_v54  ;;  %v1829_v45 = vadd.f32 %v2417_v27, %v1818_v8  ;;  %v1795_v36 = vadd.f32 %v1794_v56, %v1722_v13  ;;  %v1813_v47 = vmax.f32 %v1791_v44, %v1793_v33  ;;  %v2758_v56 = vld [vmem:[%s3520_s7] sm:$0xff]  }
 0x285   : > { %v1727_v29 = vpop.f32.mrf.mxu1 }
 0x286   : > { %v1797_v31 = vadd.f32 %v1796_v28, %v1724_v15  ;;  %v1833_v32 = vmax.f32 %v1829_v45, 0.0  ;;  %v1728_v54 = vadd.f32 %v1727_v29, %v3474_v18 }
 0x287   : > { %v1729_v58 = vpop.f32.mrf.mxu1 }
 0x288   : > { %v1730_v62 = vadd.f32 %v1729_v58, %v1656_v34  ;;  %v1837_v41 = vpack.c.bf16 %v1833_v32, %v1833_v32  ;;  %v1814_v26 = vmax.f32 %v1795_v36, %v1797_v31  ;;  %v1801_v34 = vadd.f32 %v1800_v5, %v1728_v54  ;;  %v2451_v5 = vld [vmem:[%s3521_s8] ss:$0 sm:$0xff] }
 0x289   : > { %v1731_v30 = vpop.f32.mrf.mxu1 }
 0x28a   : > { %v1732_v19 = vadd.f32 %v1731_v30, %v3476_v37  ;;  %2071 = vmatprep.mubr.bf16.mxu1 %v1837_v41  ;;  %v1803_v48 = vadd.f32 %v1802_v21, %v1730_v62  ;;  %v1819_v40 = vmax.f32 %v1813_v47, %v1814_v26 }
 0x28b   : > { %v1733_v24 = vpop.f32.mrf.mxu1  ;;  %2072 = vmatmul.mubr.bf16.vlgmr.msra.gmra.mxu1 %v1836_v42 }
 0x28c   : > { %v1734_v7 = vadd.f32 %v1733_v24, %v3478_v39  ;;  %v1805_v35 = vadd.f32 %v1804_v43, %v1732_v19  ;;  %v1815_v11 = vmax.f32 %v1801_v34, %v1803_v48  ;;  %v1830_v49 = vadd.f32 %v2417_v27, %v1819_v40  ;;  %v2755_v39 = vld [vmem:[%s3520_s7 + $0x18] sm:$0xff]   ;;  %2527 = vmatprep.mubr.msk.bf16.mxu1 %vm2776_vm3, %v2775_v12 }
 0x28d   : > { %2520 = vmatpush3.bf16.msra.mxu1 %v2755_v39 }
 0x28e   : > { %v1807_v9 = vadd.f32 %v1806_v22, %v1734_v7  ;;  %v1834_v18 = vmax.f32 %v1830_v49, 0.0  ;;  %2521 = vmatprep.subr.bf16.mxu1 %v2775_v12 }
 0x290   : > { %v1816_v46 = vmax.f32 %v1805_v35, %v1807_v9  ;;  %v1838_v52 = vpack.c.bf16 %v1834_v18, %v1834_v18 }
 0x291   : > { %2522 = vmatpush3.bf16.msra.mxu1 %v2756_v53 }
 0x292   : > { %v1820_v2 = vmax.f32 %v1815_v11, %v1816_v46  ;;  %2523 = vmatprep.subr.bf16.mxu1 %v2775_v12 }
 0x294   : > { %v1831_v51 = vadd.f32 %v2417_v27, %v1820_v2 }
 0x295   : > { %2524 = vmatpush3.bf16.msra.mxu1 %v2757_v55 }
 0x296   : > { %v1835_v17 = vmax.f32 %v1831_v51, 0.0  ;;  %2525 = vmatprep.subr.bf16.mxu1 %v2775_v12 }
 0x298   : > { %v1839_v37 = vpack.c.bf16 %v1835_v17, %v1835_v17 }
 0x299   : > { %2526 = vmatpush3.bf16.msra.mxu1 %v2758_v56 }
 0x29a   : > { %2111 = vmatprep.mubr.bf16.mxu0 %v1839_v37 }
 0x29b   : > { %2112 = vmatmul.mubr.bf16.vlgmr.msra.gmra.mxu0 %v1838_v52 }
 0x34b   : > { %v2486_v57 = vpop.f32.mrf.mxu1 }
 0x34d   : > { %v2487_v6 = vpop.f32.mrf.mxu1 }
 0x34e   : > { %v2488_v23 = vadd.f32 %v2487_v6, %v2486_v57 }
 0x34f   : > { %v2489_v16 = vpop.f32.mrf.mxu1 }
 0x350   : > { %v2074_v61 = vadd.f32 %v2488_v23, %v2418_v25 }
 0x351   : > { %v2490_v59 = vpop.f32.mrf.mxu1 }
 0x35b   : > { %v2508_v27 = vpop.f32.mrf.mxu0 }
 0x35d   : > { %v2509_v60 = vpop.f32.mrf.mxu0 }
 0x35e   : > { %v2510_v63 = vadd.f32 %v2509_v60, %v2508_v27 }
 0x35f   : > { %v2511_v28 = vpop.f32.mrf.mxu0 }
 0x360   : > { %v2114_v0 = vadd.f32 %v2510_v63, %v2074_v61 }
 0x361   : > { %v2512_v1 = vpop.f32.mrf.mxu0 }
 0x362   : > { %v2119_v3 = vmax.f32 %v2114_v0, 0.0 }
 0x364   : > { %v2120_v4 = vpack.c.bf16 %v2119_v3, %v2119_v3 }
 0x366   : > { %2528 = vmatmul.mubr.msk.bf16.vlgmr.msra.gmra.mxu1 %vm724_vm1, %v2120_v4 }
 0x426   : > { %v2189_v38 = vpop.f32.mrf.mxu1 }
 0x427   : > { %v2190_v8 = vadd.f32 %v2451_v5, %v2189_v38 }
 0x428   : > { %v2529_v10 = vpop.f32.mrf.mxu1 }
 0x429   : > { %2195 = vmax.xlane.f32.xlu0 %v2190_v8 }
 0x42a   : > { %v2192_v13 = vpop.f32.mrf.mxu1 }
 0x42c   : > { %v2530_v14 = vpop.f32.mrf.mxu1 }
 0x4b2   : > { %v2196_v15 = vpop.xlane.xlu0 %2195 }
 0x4b3   : > { %v2197_v45 = vsub.f32 %v2190_v8, %v2196_v15 }
 0x4b5   : > { %v2198_v20 = vmul.f32 1.442695, %v2197_v45 }
 0x4b7   : > { %2759 = vpow2.f32 %v2198_v20 }
 0x4c4   : > { %v2760_v21 = vpop.eup %2759 }
 0x4c5   : > { %2200 = vadd.xlane.f32.xlu1 %v2760_v21 }
 0x54e   : > { %v2201_v50 = vpop.xlane.xlu1 %2200 }
 0x54f   : > { %2761 = vlog2.f32 %v2201_v50 }
 0x55c   : > { %v2762_v29 = vpop.eup %2761 }
 0x55d   : > { %v2203_v31 = vmul.f32 0.6931472, %v2762_v29 }
 0x55f   : > { %v2204_v32 = vsub.f32 %v2197_v45, %v2203_v31 }
 0x561   : > { %2205 = vst [vmem:[%s330_s20] sm:$0xff] %v2204_v32 }
 0x562 PF: > { %s19_s30 = sadd.s32 1, %s2769_s30  }
 0x563   : > { %p16_p4 = scmp.ge.s32.totalorder %s19_s30, 4  }
 0x565   :  { %18 = sbr.rel (!%p16_p4) target bundleno = 1 (0x1), region = 86 }

// kernel: _forward.1
= control target key start
LH: loop header
LB: loop body
LE: loop exit
PB: predicated region body
PF: predicated region fallthrough
CT: control target
= control target key end

     0   :  { %s3864_s30 = smov 0   ;;  %s5179_s0 = inlined_call_operand.vmem [shape: bf16[2,28,8,32], index: 0, kind: input, shape index: {}]   ;;  %s5180_s1 = inlined_call_operand.vmem [shape: bf16[160,256], index: 1, kind: input, shape index: {}]   ;;  %s5181_s2 = inlined_call_operand.vmem [shape: f32[1,128], index: 2, kind: input, shape index: {}]   ;;  %s5182_s3 = inlined_call_operand.vmem [shape: bf16[640,256], index: 3, kind: input, shape index: {}]   ;;  %s5183_s4 = inlined_call_operand.vmem [shape: f32[1,128], index: 4, kind: input, shape index: {}]   ;;  %s5184_s5 = inlined_call_operand.vmem [shape: bf16[512,64], index: 5, kind: input, shape index: {}]   ;;  %s5185_s6 = inlined_call_operand.vmem [shape: f32[1,64], index: 6, kind: input, shape index: {}]   ;;  %s5186_s7 = inlined_call_operand.vmem [shape: bf16[64,128], index: 7, kind: input, shape index: {}]   ;;  %s5187_s8 = inlined_call_operand.vmem [shape: f32[1,128], index: 8, kind: input, shape index: {}]   ;;  %s5188_s9 = inlined_call_operand.vmem [shape: f32[16,128], index: 9, kind: output, shape index: {}]  }
   0x1 LB: > { %s3178_s10 = sadd.s32 4294967295, %s3809_s30   ;;  %p3182_p0 = scmp.ge.s32.totalorder %s3809_s30, 1  ;;  %s3809_s30 = sphi %s3864_s30, %s19_s30  }
   0x2   : > { %p287_p1 = scmp.lt.s32.totalorder %s3809_s30, 3 }
   0x4   : > { %p288_p2 = pnand %p3182_p0, %p287_p1 }
   0x6   : > { %291 = sbr.rel (%p288_p2) target bundleno = 1514 (0x5ea), region = 56 }
   0xb   : > { %v3586_v0 = vld [vmem:[%s5180_s1 + $0x34] ss:$8 sps:$4 sm:$0xff]   ;;  %p322_p3 = scmp.lt.s32.totalorder %s3178_s10, 1  ;;  %v3588_v1 = vld [vmem:[%s5180_s1 + $0x30] ss:$8 sps:$4 sm:$0xff]   ;;  %v5189_v2 = vmov 0  }
   0xc   : > { %681 = vmatprep.mubr.bf16.mxu0 %v5189_v2  ;;  %791 = vmatprep.mubr.bf16.mxu1 %v5189_v2  ;;  %v3589_v3 = vld [vmem:[%s5180_s1 + $0x24] ss:$8 sps:$4 sm:$0xff]   ;;  %v3591_v4 = vld [vmem:[%s5180_s1 + $0x20] ss:$8 sps:$4 sm:$0xff]   ;;  %v3597_v5 = vld [vmem:[%s5180_s1 + $0x14] ss:$8 sps:$4 sm:$0xff]  }
   0xd   : > { %661 = vmatprep.subr.bf16.mxu0 %v3586_v0  ;;  %3570 = vmatprep.subr.bf16.mxu1 %v3586_v0  ;;  %s5266_s10 = smov (!%p322_p3, %s3178_s10), 1  ;;  %v3600_v6 = vld [vmem:[%s5180_s1 + $0x54] ss:$8 sps:$4 sm:$0xff]   ;;  %vm612_vm0 = vcmask 261120   ;;  %v3598_v9 = vld [vmem:[%s5180_s1 + $0x50] ss:$8 sps:$4 sm:$0xff]  }
   0xe   : > { %662 = vmatpush1.bf16.msra.mxu0 %v3588_v1  ;;  %3572 = vmatpush1.bf16.msra.mxu1 %v3588_v1  ;;  %s3574_s19 = smul.u32 112, %s5266_s10  ;;  %v3595_v13 = vld [vmem:[%s5180_s1 + $0x10] ss:$8 sps:$4 sm:$0xff]   ;;  %v3603_v15 = vld [vmem:[%s5180_s1 + $0x4] ss:$8 sps:$4 sm:$0xff]   ;;  %vm3813_vm1 = vmmov 0  }
   0xf   : > { %663 = vmatprep.subr.bf16.mxu0 %v3589_v3  ;;  %3571 = vmatprep.subr.bf16.mxu1 %v3589_v3  ;;  %v3601_v16 = vld [vmem:[%s5180_s1] ss:$8 sps:$4 sm:$0xff]   ;;  %v3615_v21 = vld [vmem:[%s5180_s1 + $0x44] ss:$8 sps:$4 sm:$0xff]   ;;  %v3626_v24 = vld [vmem:[%s5180_s1 + $0x70] ss:$8 sps:$4 sm:$0xff]  }
  0x10   : > { %s3898_s26 = scalar_lea.vmem %s5179_s0, %s3574_s19  ;;  %v3613_v20 = vld [vmem:[%s5180_s1 + $0x40] ss:$8 sps:$4 sm:$0xff]   ;;  %v3628_v25 = vld [vmem:[%s5180_s1 + $0x74] ss:$8 sps:$4 sm:$0xff]   ;;  %v3636_v29 = vld [vmem:[%s5180_s1 + $0x64] ss:$8 sps:$4 sm:$0xff]  }
  0x11   : > { %v333_v7 = vld [vmem:[%s3898_s26 + $0x4] sm:$0xf]  ;;  %v334_v8 = vld [vmem:[%s3898_s26 + $0x8] sm:$0xf]  ;;  %v3906_v11 = vld [vmem:[%s3898_s26 + $0x5c] sm:$0xf] }
  0x12   : > { %664 = vmatpush1.bf16.msra.mxu0 %v3591_v4  ;;  %3573 = vmatpush1.bf16.msra.mxu1 %v3591_v4  ;;  %v3185_v10 = vcombine.low %v333_v7, %v334_v8  ;;  %v3909_v12 = vld [vmem:[%s3898_s26 + $0x60] sm:$0xf]  ;;  %v335_v18 = vld [vmem:[%s3898_s26 + $0xc] sm:$0xf]  ;;  %v336_v19 = vld [vmem:[%s3898_s26 + $0x10] sm:$0xf] }
  0x13   : > { %884 = vmatprep.subr.bf16.mxu1 %v3597_v5  ;;  %1063 = vmatprep.subr.bf16.mxu0 %v3600_v6  ;;  %v3916_v14 = vcombine.low %v3906_v11, %v3909_v12  ;;  %v332_v17 = vld [vmem:[%s3898_s26] sm:$0xf]  ;;  %v3938_v22 = vcombine.low %v335_v18, %v336_v19  ;;  %v337_v26 = vld [vmem:[%s3898_s26 + $0x14] sm:$0xf]  ;;  %v338_v28 = vld [vmem:[%s3898_s26 + $0x18] sm:$0xf]  ;;  %v3964_v32 = vcombine.low %v334_v8, %v335_v18 }
  0x14   : > { %v3213_v23 = vcombine.low %v332_v17, %v333_v7  ;;  %v3632_v27 = vld [vmem:[%s5180_s1 + $0x94] ss:$8 sps:$4 sm:$0xff]   ;;  %v3634_v30 = vld [vmem:[%s5180_s1 + $0x60] ss:$8 sps:$4 sm:$0xff]   ;;  %v3962_v31 = vcombine.low %v337_v26, %v338_v28  ;;  %v3976_v36 = vcombine.low %v336_v19, %v337_v26  ;;  %v341_v37 = vld [vmem:[%s3898_s26 + $0x24] sm:$0xf] }
  0x15   : > { %3201 = vmatmul.mubr.msk.bf16.vlgmr.msra.gmra.mxu0 %vm612_vm0, %v3185_v10  ;;  %3212 = vmatmul.mubr.msk.bf16.vlgmr.msra.gmra.mxu1 %vm612_vm0, %v3916_v14  ;;  %v339_v33 = vld [vmem:[%s3898_s26 + $0x1c] sm:$0xf]  ;;  %v340_v34 = vld [vmem:[%s3898_s26 + $0x20] sm:$0xf]  ;;  %v342_v38 = vld [vmem:[%s3898_s26 + $0x28] sm:$0xf] }
  0x16   : > { %1064 = vmatpush1.bf16.msra.mxu0 %v3598_v9  ;;  %885 = vmatpush1.bf16.msra.mxu1 %v3595_v13  ;;  %v3974_v35 = vcombine.low %v339_v33, %v340_v34  ;;  %v3986_v39 = vcombine.low %v341_v37, %v342_v38  ;;  %v3988_v40 = vcombine.low %v338_v28, %v339_v33  ;;  %v343_v41 = vld [vmem:[%s3898_s26 + $0x2c] sm:$0xf]  ;;  %v344_v42 = vld [vmem:[%s3898_s26 + $0x30] sm:$0xf]  ;;  %v345_v45 = vld [vmem:[%s3898_s26 + $0x34] sm:$0xf] }
  0x17   : > { %691 = vmatprep.mubr.bf16.mxu0 %v5189_v2  ;;  %886 = vmatprep.subr.bf16.mxu1 %v3603_v15  ;;  %v3998_v43 = vcombine.low %v343_v41, %v344_v42  ;;  %v4000_v44 = vcombine.low %v340_v34, %v341_v37  ;;  %v346_v46 = vld [vmem:[%s3898_s26 + $0x38] sm:$0xf]  ;;  %v4012_v48 = vcombine.low %v342_v38, %v343_v41  ;;  %v347_v49 = vld [vmem:[%s3898_s26 + $0x3c] sm:$0xf]  ;;  %v348_v50 = vld [vmem:[%s3898_s26 + $0x40] sm:$0xf] }
  0x18   : > { %904 = vmatprep.mubr.bf16.mxu1 %v5189_v2  ;;  %1065 = vmatprep.subr.bf16.mxu0 %v3615_v21  ;;  %v4010_v47 = vcombine.low %v345_v45, %v346_v46  ;;  %v4022_v51 = vcombine.low %v347_v49, %v348_v50  ;;  %v4024_v52 = vcombine.low %v344_v42, %v345_v45  ;;  %v349_v53 = vld [vmem:[%s3898_s26 + $0x44] sm:$0xf]  ;;  %v350_v54 = vld [vmem:[%s3898_s26 + $0x48] sm:$0xf]  ;;  %v351_v57 = vld [vmem:[%s3898_s26 + $0x4c] sm:$0xf] }
  0x19   : > { %v4034_v55 = vcombine.low %v349_v53, %v350_v54  ;;  %v4036_v56 = vcombine.low %v346_v46, %v347_v49  ;;  %v352_v58 = vld [vmem:[%s3898_s26 + $0x50] sm:$0xf]  ;;  %v4048_v60 = vcombine.low %v348_v50, %v349_v53  ;;  %v353_v61 = vld [vmem:[%s3898_s26 + $0x54] sm:$0xf]  ;;  %v354_v62 = vld [vmem:[%s3898_s26 + $0x58] sm:$0xf]  ;;  %v4058_v0 = vcombine.low %v350_v54, %v351_v57 }
  0x1a   : > { %1066 = vmatpush1.bf16.msra.mxu0 %v3613_v20  ;;  %887 = vmatpush1.bf16.msra.mxu1 %v3601_v16  ;;  %v4046_v59 = vcombine.low %v351_v57, %v352_v58  ;;  %v3195_v63 = vcombine.low %v353_v61, %v354_v62  ;;  %v4065_v1 = vcombine.low %v352_v58, %v353_v61  ;;  %v3630_v3 = vld [vmem:[%s5180_s1 + $0x90] ss:$8 sps:$4 sm:$0xff]   ;;  %v3639_v4 = vld [vmem:[%s5180_s1 + $0x84] ss:$8 sps:$4 sm:$0xff]   ;;  %v3637_v5 = vld [vmem:[%s5180_s1 + $0x80] ss:$8 sps:$4 sm:$0xff]  }
  0x1b   : > { %1290 = vmatprep.subr.bf16.mxu1 %v3628_v25  ;;  %1517 = vmatprep.subr.bf16.mxu0 %v3632_v27  ;;  %v4083_v6 = vcombine.low %v354_v62, %v3906_v11  ;;  %v357_v7 = vld [vmem:[%s3898_s26 + $0x64] sm:$0xf]  ;;  %v4161_v9 = vld [vmem:[%s3898_s26 + $0x68] sm:$0xf]  ;;  %v3643_v37 = vld [vmem:[%s5182_s3 + $0xf0] ss:$8 sps:$4 sm:$0xff]  }
  0x1c   : > { %v4147_v8 = vcombine.low %v3909_v12, %v357_v7  ;;  %v3258_v10 = vcombine.low %v357_v7, %v4161_v9  ;;  %v3645_v38 = vld [vmem:[%s5182_s3 + $0xf4] ss:$8 sps:$4 sm:$0xff]   ;;  %v3648_v57 = vld [vmem:[%s5182_s3 + $0xe4] ss:$8 sps:$4 sm:$0xff]   ;;  %vm3070_vm2 = vcmask 523264   ;;  %s3184_s12 = sshll.u32 %s5266_s10, 3 }
  0x1d   : > { %3202 = vmatmul.mubr.msk.bf16.gmra.mxu0 %vm612_vm0, %v3938_v22  ;;  %3229 = vmatmul.mubr.msk.bf16.vlgmr.msra.gmra.mxu1 %vm612_vm0, %v3213_v23  ;;  %s330_s15 = scalar_lea.vmem %s5188_s9, %s3184_s12 }
  0x1e   : > { %701 = vmatprep.mubr.bf16.mxu0 %v5189_v2  ;;  %914 = vmatprep.mubr.bf16.mxu1 %v5189_v2 }
  0x1f   : > { %1291 = vmatpush1.bf16.msra.mxu1 %v3626_v24 }
  0x20   : > { %1292 = vmatprep.subr.bf16.mxu1 %v3636_v29 }
  0x23   : > { %1293 = vmatpush1.bf16.msra.mxu1 %v3634_v30 }
  0x24   : > { %1889 = vmatprep.subr.bf16.mxu1 %v3645_v38 }
  0x25   : > { %3203 = vmatmul.mubr.msk.bf16.gmra.mxu0 %vm612_vm0, %v3962_v31  ;;  %3230 = vmatmul.mubr.msk.bf16.gmra.mxu1 %vm612_vm0, %v3964_v32 }
  0x26   : > { %711 = vmatprep.mubr.bf16.mxu0 %v5189_v2  ;;  %924 = vmatprep.mubr.bf16.mxu1 %v5189_v2 }
  0x2d   : > { %3204 = vmatmul.mubr.msk.bf16.gmra.mxu0 %vm612_vm0, %v3974_v35  ;;  %3231 = vmatmul.mubr.msk.bf16.gmra.mxu1 %vm612_vm0, %v3976_v36 }
  0x2e   : > { %721 = vmatprep.mubr.bf16.mxu0 %v5189_v2  ;;  %934 = vmatprep.mubr.bf16.mxu1 %v5189_v2 }
  0x35   : > { %3205 = vmatmul.mubr.msk.bf16.gmra.mxu0 %vm612_vm0, %v3986_v39  ;;  %3232 = vmatmul.mubr.msk.bf16.gmra.mxu1 %vm612_vm0, %v3988_v40 }
  0x36   : > { %731 = vmatprep.mubr.bf16.mxu0 %v5189_v2  ;;  %944 = vmatprep.mubr.bf16.mxu1 %v5189_v2 }
  0x3d   : > { %3206 = vmatmul.mubr.msk.bf16.gmra.mxu0 %vm612_vm0, %v3998_v43  ;;  %3233 = vmatmul.mubr.msk.bf16.gmra.mxu1 %vm612_vm0, %v4000_v44 }
  0x3e   : > { %741 = vmatprep.mubr.bf16.mxu0 %v5189_v2  ;;  %954 = vmatprep.mubr.bf16.mxu1 %v5189_v2 }
  0x45   : > { %3207 = vmatmul.mubr.msk.bf16.gmra.mxu0 %vm612_vm0, %v4010_v47  ;;  %3234 = vmatmul.mubr.msk.bf16.gmra.mxu1 %vm612_vm0, %v4012_v48 }
  0x46   : > { %751 = vmatprep.mubr.bf16.mxu0 %v5189_v2  ;;  %964 = vmatprep.mubr.bf16.mxu1 %v5189_v2 }
  0x4d   : > { %3208 = vmatmul.mubr.msk.bf16.gmra.mxu0 %vm612_vm0, %v4022_v51  ;;  %3235 = vmatmul.mubr.msk.bf16.gmra.mxu1 %vm612_vm0, %v4024_v52 }
  0x4e   : > { %761 = vmatprep.mubr.bf16.mxu0 %v5189_v2  ;;  %974 = vmatprep.mubr.bf16.mxu1 %v5189_v2 }
  0x55   : > { %3209 = vmatmul.mubr.msk.bf16.gmra.mxu0 %vm612_vm0, %v4034_v55  ;;  %3236 = vmatmul.mubr.msk.bf16.gmra.mxu1 %vm612_vm0, %v4036_v56 }
  0x56   : > { %771 = vmatprep.mubr.bf16.mxu0 %v5189_v2  ;;  %984 = vmatprep.mubr.bf16.mxu1 %v5189_v2 }
  0x5d   : > { %3210 = vmatmul.mubr.msk.bf16.gmra.mxu0 %vm612_vm0, %v4046_v59  ;;  %3237 = vmatmul.mubr.msk.bf16.gmra.mxu1 %vm612_vm0, %v4048_v60 }
  0x5e   : > { %781 = vmatprep.mubr.bf16.mxu0 %v5189_v2  ;;  %994 = vmatprep.mubr.bf16.mxu1 %v5189_v2 }
  0x65   : > { %3211 = vmatmul.mubr.msk.bf16.gmra.mxu0 %vm612_vm0, %v3195_v63  ;;  %3238 = vmatmul.mubr.msk.bf16.gmra.mxu1 %vm612_vm0, %v4058_v0 }
  0x66   : > { %1083 = vmatprep.mubr.bf16.mxu0 %v5189_v2  ;;  %1004 = vmatprep.mubr.bf16.mxu1 %v5189_v2 }
  0x6d   : > { %3246 = vmatmul.mubr.msk.bf16.vlgmr.msra.gmra.mxu0 %vm612_vm0, %v3964_v32  ;;  %3239 = vmatmul.mubr.msk.bf16.gmra.mxu1 %vm612_vm0, %v4065_v1 }
  0x6e   : > { %1518 = vmatpush1.bf16.msra.mxu0 %v3630_v3  ;;  %1014 = vmatprep.mubr.bf16.mxu1 %v5189_v2 }
  0x6f   : > { %1093 = vmatprep.mubr.bf16.mxu0 %v5189_v2  ;;  %1519 = vmatprep.subr.bf16.mxu0 %v3639_v4 }
  0x72   : > { %1520 = vmatpush1.bf16.msra.mxu0 %v3637_v5 }
  0x75   : > { %3247 = vmatmul.mubr.msk.bf16.gmra.mxu0 %vm612_vm0, %v3976_v36  ;;  %3240 = vmatmul.mubr.msk.bf16.gmra.mxu1 %vm612_vm0, %v4083_v6 }
  0x76   : > { %1103 = vmatprep.mubr.bf16.mxu0 %v5189_v2  ;;  %1310 = vmatprep.mubr.bf16.mxu1 %v5189_v2 }
  0x7d   : > { %3248 = vmatmul.mubr.msk.bf16.gmra.mxu0 %vm612_vm0, %v3988_v40  ;;  %3263 = vmatmul.mubr.msk.bf16.vlgmr.msra.gmra.mxu1 %vm612_vm0, %v3938_v22 }
  0x7e   : > { %1113 = vmatprep.mubr.bf16.mxu0 %v5189_v2  ;;  %1320 = vmatprep.mubr.bf16.mxu1 %v5189_v2 }
  0x7f   : > { %1890 = vmatpush1.bf16.msra.mxu1 %v3643_v37 }
  0x80   : > { %1891 = vmatprep.subr.bf16.mxu1 %v3648_v57 }
  0x85   : > { %3249 = vmatmul.mubr.msk.bf16.gmra.mxu0 %vm612_vm0, %v4000_v44  ;;  %3264 = vmatmul.mubr.msk.bf16.gmra.mxu1 %vm612_vm0, %v3962_v31 }
  0x86   : > { %1123 = vmatprep.mubr.bf16.mxu0 %v5189_v2  ;;  %1330 = vmatprep.mubr.bf16.mxu1 %v5189_v2 }
  0x8d   : > { %3250 = vmatmul.mubr.msk.bf16.gmra.mxu0 %vm612_vm0, %v4012_v48  ;;  %3265 = vmatmul.mubr.msk.bf16.gmra.mxu1 %vm612_vm0, %v3974_v35 }
  0x8e   : > { %1133 = vmatprep.mubr.bf16.mxu0 %v5189_v2  ;;  %1340 = vmatprep.mubr.bf16.mxu1 %v5189_v2 }
  0x95   : > { %3251 = vmatmul.mubr.msk.bf16.gmra.mxu0 %vm612_vm0, %v4024_v52  ;;  %3266 = vmatmul.mubr.msk.bf16.gmra.mxu1 %vm612_vm0, %v3986_v39 }
  0x96   : > { %1143 = vmatprep.mubr.bf16.mxu0 %v5189_v2  ;;  %1350 = vmatprep.mubr.bf16.mxu1 %v5189_v2 }
  0x9d   : > { %3252 = vmatmul.mubr.msk.bf16.gmra.mxu0 %vm612_vm0, %v4036_v56  ;;  %3267 = vmatmul.mubr.msk.bf16.gmra.mxu1 %vm612_vm0, %v3998_v43 }
  0x9e   : > { %1153 = vmatprep.mubr.bf16.mxu0 %v5189_v2  ;;  %1360 = vmatprep.mubr.bf16.mxu1 %v5189_v2 }
  0xa5   : > { %3253 = vmatmul.mubr.msk.bf16.gmra.mxu0 %vm612_vm0, %v4048_v60  ;;  %3268 = vmatmul.mubr.msk.bf16.gmra.mxu1 %vm612_vm0, %v4010_v47 }
  0xa6   : > { %1163 = vmatprep.mubr.bf16.mxu0 %v5189_v2  ;;  %1370 = vmatprep.mubr.bf16.mxu1 %v5189_v2 }
  0xad   : > { %3254 = vmatmul.mubr.msk.bf16.gmra.mxu0 %vm612_vm0, %v4058_v0  ;;  %3269 = vmatmul.mubr.msk.bf16.gmra.mxu1 %vm612_vm0, %v4022_v51 }
  0xae   : > { %1173 = vmatprep.mubr.bf16.mxu0 %v5189_v2  ;;  %1380 = vmatprep.mubr.bf16.mxu1 %v5189_v2 }
  0xb5   : > { %3255 = vmatmul.mubr.msk.bf16.gmra.mxu0 %vm612_vm0, %v4065_v1  ;;  %3270 = vmatmul.mubr.msk.bf16.gmra.mxu1 %vm612_vm0, %v4034_v55 }
  0xb6   : > { %1183 = vmatprep.mubr.bf16.mxu0 %v5189_v2  ;;  %1390 = vmatprep.mubr.bf16.mxu1 %v5189_v2 }
  0xbd   : > { %3256 = vmatmul.mubr.msk.bf16.gmra.mxu0 %vm612_vm0, %v4083_v6  ;;  %3271 = vmatmul.mubr.msk.bf16.gmra.mxu1 %vm612_vm0, %v4046_v59 }
  0xbe   : > { %1193 = vmatprep.mubr.bf16.mxu0 %v5189_v2  ;;  %1400 = vmatprep.mubr.bf16.mxu1 %v5189_v2 }
  0xc5   : > { %3257 = vmatmul.mubr.msk.bf16.gmra.mxu0 %vm612_vm0, %v4147_v8  ;;  %3272 = vmatmul.mubr.msk.bf16.gmra.mxu1 %vm612_vm0, %v3195_v63 }
  0xc6   : > { %1537 = vmatprep.mubr.bf16.mxu0 %v5189_v2  ;;  %1410 = vmatprep.mubr.bf16.mxu1 %v5189_v2 }
  0xcd   : > { %3280 = vmatmul.mubr.msk.bf16.vlgmr.msra.gmra.mxu0 %vm612_vm0, %v3976_v36  ;;  %3273 = vmatmul.mubr.msk.bf16.gmra.mxu1 %vm612_vm0, %v3916_v14 }
  0xce   : > { %1547 = vmatprep.mubr.bf16.mxu0 %v5189_v2  ;;  %1420 = vmatprep.mubr.bf16.mxu1 %v5189_v2 }
  0xd5   : > { %v683_v11 = vpop.f32.mrf.mxu0  ;;  %3281 = vmatmul.mubr.msk.bf16.gmra.mxu0 %vm612_vm0, %v3988_v40  ;;  %v4166_v12 = vpop.f32.mrf.mxu1  ;;  %3274 = vmatmul.mubr.msk.bf16.gmra.mxu1 %vm612_vm0, %v3258_v10 }
  0xd6   : > { %1557 = vmatprep.mubr.bf16.mxu0 %v5189_v2  ;;  %1921 = vmatprep.mubr.bf16.mxu1 %v5189_v2 }
  0xd7   : > { %v685_v13 = vpop.f32.mrf.mxu0  ;;  %v4171_v14 = vpop.f32.mrf.mxu1 }
  0xd9   : > { %v687_v15 = vpop.f32.mrf.mxu0  ;;  %v4173_v16 = vpop.f32.mrf.mxu1 }
  0xdb   : > { %v4175_v17 = vpop.f32.mrf.mxu0  ;;  %v4177_v18 = vpop.f32.mrf.mxu1 }
  0xdc   : > { %5191 = vst [vmem:[#allocation2_spill] sm:$0xff] %v4177_v18  ;;  %v5199_v18 = vmov 0  }
  0xdd   : > { %v693_v19 = vpop.f32.mrf.mxu0  ;;  %3282 = vmatmul.mubr.msk.bf16.gmra.mxu0 %vm612_vm0, %v4000_v44  ;;  %v906_v20 = vpop.f32.mrf.mxu1 }
  0xde   : > { %1567 = vmatprep.mubr.bf16.mxu0 %v5189_v2  ;;  %v4182_v21 = vadd.f32 %v906_v20, %v683_v11 }
  0xdf   : > { %v695_v22 = vpop.f32.mrf.mxu0  ;;  %v908_v23 = vpop.f32.mrf.mxu1 }
  0xe0   : > { %v4184_v24 = vadd.f32 %v908_v23, %v685_v13  ;;  %v3649_v23 = vld [vmem:[%s5182_s3 + $0xd0] ss:$8 sps:$4 sm:$0xff]  }
  0xe1   : > { %v697_v25 = vpop.f32.mrf.mxu0  ;;  %v910_v26 = vpop.f32.mrf.mxu1 }
  0xe2   : > { %v4186_v27 = vadd.f32 %v910_v26, %v687_v15 }
  0xe3   : > { %v4188_v28 = vpop.f32.mrf.mxu0  ;;  %v4190_v29 = vpop.f32.mrf.mxu1 }
  0xe5   : > { %v703_v30 = vpop.f32.mrf.mxu0  ;;  %3283 = vmatmul.mubr.msk.bf16.gmra.mxu0 %vm612_vm0, %v4012_v48  ;;  %v916_v31 = vpop.f32.mrf.mxu1 }
  0xe6   : > { %1577 = vmatprep.mubr.bf16.mxu0 %v5189_v2  ;;  %v4195_v32 = vadd.f32 %v916_v31, %v693_v19 }
  0xe7   : > { %v705_v33 = vpop.f32.mrf.mxu0  ;;  %v918_v34 = vpop.f32.mrf.mxu1 }
  0xe8   : > { %v4197_v35 = vadd.f32 %v918_v34, %v695_v22 }
  0xe9   : > { %v707_v36 = vpop.f32.mrf.mxu0  ;;  %v920_v39 = vpop.f32.mrf.mxu1 }
  0xea   : > { %v4205_v40 = vadd.f32 %v920_v39, %v697_v25  ;;  %v3651_v25 = vld [vmem:[%s5182_s3 + $0xd4] ss:$8 sps:$4 sm:$0xff]  }
  0xeb   : > { %v4207_v41 = vpop.f32.mrf.mxu0  ;;  %v4209_v42 = vpop.f32.mrf.mxu1 }
  0xec   : > { %5192 = vst [vmem:[#allocation3_spill] sm:$0xff] %v4207_v41 }
  0xed   : > { %v713_v43 = vpop.f32.mrf.mxu0  ;;  %3284 = vmatmul.mubr.msk.bf16.gmra.mxu0 %vm612_vm0, %v4024_v52  ;;  %v926_v44 = vpop.f32.mrf.mxu1  ;;  %v3646_v52 = vld [vmem:[%s5182_s3 + $0xe0] ss:$8 sps:$4 sm:$0xff]  }
  0xee   : > { %1587 = vmatprep.mubr.bf16.mxu0 %v5189_v2  ;;  %v4214_v45 = vadd.f32 %v926_v44, %v703_v30  ;;  %1892 = vmatpush1.bf16.msra.mxu1 %v3646_v52 }
  0xef   : > { %v715_v46 = vpop.f32.mrf.mxu0  ;;  %v928_v47 = vpop.f32.mrf.mxu1  ;;  %1893 = vmatprep.subr.bf16.mxu1 %v3651_v25 }
  0xf0   : > { %v4216_v48 = vadd.f32 %v928_v47, %v705_v33 }
  0xf1   : > { %v717_v49 = vpop.f32.mrf.mxu0  ;;  %v930_v50 = vpop.f32.mrf.mxu1 }
  0xf2   : > { %v4218_v51 = vadd.f32 %v930_v50, %v707_v36  ;;  %1894 = vmatpush1.bf16.msra.mxu1 %v3649_v23 }
  0xf3   : > { %v4220_v53 = vpop.f32.mrf.mxu0  ;;  %v4222_v54 = vpop.f32.mrf.mxu1 }
  0xf4   : > { %5193 = vst [vmem:[#allocation4_spill] sm:$0xff] %v4222_v54 }
  0xf5   : > { %v723_v55 = vpop.f32.mrf.mxu0  ;;  %3285 = vmatmul.mubr.msk.bf16.gmra.mxu0 %vm612_vm0, %v4036_v56  ;;  %v936_v58 = vpop.f32.mrf.mxu1 }
  0xf6   : > { %1597 = vmatprep.mubr.bf16.mxu0 %v5189_v2  ;;  %v4233_v59 = vadd.f32 %v936_v58, %v713_v43 }
  0xf7   : > { %v725_v61 = vpop.f32.mrf.mxu0  ;;  %v938_v62 = vpop.f32.mrf.mxu1 }
  0xf8   : > { %v4235_v63 = vadd.f32 %v938_v62, %v715_v46 }
  0xf9   : > { %v727_v56 = vpop.f32.mrf.mxu0  ;;  %v940_v3 = vpop.f32.mrf.mxu1 }
  0xfa   : > { %v4237_v4 = vadd.f32 %v940_v3, %v717_v49 }
  0xfb   : > { %v4239_v5 = vpop.f32.mrf.mxu0  ;;  %v4241_v7 = vpop.f32.mrf.mxu1 }
  0xfd   : > { %v733_v10 = vpop.f32.mrf.mxu0  ;;  %3286 = vmatmul.mubr.msk.bf16.gmra.mxu0 %vm612_vm0, %v4048_v60  ;;  %v946_v11 = vpop.f32.mrf.mxu1 }
  0xfe   : > { %1607 = vmatprep.mubr.bf16.mxu0 %v5189_v2  ;;  %v4246_v13 = vadd.f32 %v946_v11, %v723_v55  ;;  %v3654_v55 = vld [vmem:[%s5182_s3 + $0xc4] ss:$8 sps:$4 sm:$0xff]  }
  0xff   : > { %v735_v15 = vpop.f32.mrf.mxu0  ;;  %v948_v19 = vpop.f32.mrf.mxu1  ;;  %1895 = vmatprep.subr.bf16.mxu1 %v3654_v55 }
 0x100   : > { %v4248_v20 = vadd.f32 %v948_v19, %v725_v61 }
 0x101   : > { %v737_v22 = vpop.f32.mrf.mxu0  ;;  %v950_v26 = vpop.f32.mrf.mxu1 }
 0x102   : > { %v4256_v60 = vadd.f32 %v950_v26, %v727_v56 }
 0x103   : > { %v4258_v30 = vpop.f32.mrf.mxu0  ;;  %v4260_v31 = vpop.f32.mrf.mxu1 }
 0x105   : > { %v743_v33 = vpop.f32.mrf.mxu0  ;;  %3287 = vmatmul.mubr.msk.bf16.gmra.mxu0 %vm612_vm0, %v4058_v0  ;;  %v956_v34 = vpop.f32.mrf.mxu1  ;;  %v3652_v0 = vld [vmem:[%s5182_s3 + $0xc0] ss:$8 sps:$4 sm:$0xff]  }
 0x106   : > { %1617 = vmatprep.mubr.bf16.mxu0 %v5189_v2  ;;  %v4265_v36 = vadd.f32 %v956_v34, %v733_v10  ;;  %1896 = vmatpush1.bf16.msra.mxu1 %v3652_v0  ;;  %v359_v0 = vld [vmem:[%s3898_s26 + $0x6c] sm:$0xf] }
 0x107   : > { %v745_v37 = vpop.f32.mrf.mxu0  ;;  %v958_v38 = vpop.f32.mrf.mxu1 }
 0x108   : > { %v4267_v39 = vadd.f32 %v958_v38, %v735_v15 }
 0x109   : > { %v747_v43 = vpop.f32.mrf.mxu0  ;;  %v960_v44 = vpop.f32.mrf.mxu1 }
 0x10a   : > { %v4269_v46 = vadd.f32 %v960_v44, %v737_v22  ;;  %v3657_v44 = vld [vmem:[%s5182_s3 + $0xb4] ss:$8 sps:$4 sm:$0xff]  }
 0x10b   : > { %v4271_v47 = vpop.f32.mrf.mxu0  ;;  %v4273_v49 = vpop.f32.mrf.mxu1  ;;  %1897 = vmatprep.subr.bf16.mxu1 %v3657_v44  ;;  %v3663_v44 = vld [vmem:[%s5182_s3 + $0xa4] ss:$8 sps:$4 sm:$0xff]  }
 0x10d   : > { %v753_v50 = vpop.f32.mrf.mxu0  ;;  %3288 = vmatmul.mubr.msk.bf16.gmra.mxu0 %vm612_vm0, %v4065_v1  ;;  %v966_v52 = vpop.f32.mrf.mxu1 }
 0x10e   : > { %1627 = vmatprep.mubr.bf16.mxu0 %v5189_v2  ;;  %v4284_v57 = vadd.f32 %v966_v52, %v743_v33 }
 0x10f   : > { %v755_v58 = vpop.f32.mrf.mxu0  ;;  %v968_v61 = vpop.f32.mrf.mxu1 }
 0x110   : > { %v4286_v62 = vadd.f32 %v968_v61, %v745_v37  ;;  %v3660_v61 = vld [vmem:[%s5182_s3 + $0x1f4] ss:$8 sps:$4 sm:$0xff]  }
 0x111   : > { %v757_v1 = vpop.f32.mrf.mxu0  ;;  %v970_v56 = vpop.f32.mrf.mxu1  ;;  %2382 = vmatprep.subr.bf16.mxu0 %v3660_v61 }
 0x112   : > { %v4288_v3 = vadd.f32 %v970_v56, %v747_v43  ;;  %v3658_v56 = vld [vmem:[%s5182_s3 + $0x1f0] ss:$8 sps:$4 sm:$0xff]  }
 0x113   : > { %v4290_v10 = vpop.f32.mrf.mxu0  ;;  %v4292_v11 = vpop.f32.mrf.mxu1  ;;  %2383 = vmatpush1.bf16.msra.mxu0 %v3658_v56  ;;  %v3669_v56 = vld [vmem:[%s5182_s3 + $0x94] ss:$8 sps:$4 sm:$0xff]  }
 0x114   : > { %5194 = vst [vmem:[#allocation5_spill] sm:$0xff] %v4290_v10 }
 0x115   : > { %v763_v15 = vpop.f32.mrf.mxu0  ;;  %3289 = vmatmul.mubr.msk.bf16.gmra.mxu0 %vm612_vm0, %v4083_v6  ;;  %v976_v19 = vpop.f32.mrf.mxu1  ;;  %v3655_v6 = vld [vmem:[%s5182_s3 + $0xb0] ss:$8 sps:$4 sm:$0xff]  }
 0x116   : > { %1637 = vmatprep.mubr.bf16.mxu0 %v5189_v2  ;;  %v4297_v22 = vadd.f32 %v976_v19, %v753_v50  ;;  %1898 = vmatpush1.bf16.msra.mxu1 %v3655_v6 }
 0x117   : > { %v765_v23 = vpop.f32.mrf.mxu0  ;;  %v978_v25 = vpop.f32.mrf.mxu1  ;;  %1899 = vmatprep.subr.bf16.mxu1 %v3663_v44 }
 0x118   : > { %v4299_v26 = vadd.f32 %v978_v25, %v755_v58 }
 0x119   : > { %v767_v33 = vpop.f32.mrf.mxu0  ;;  %v980_v34 = vpop.f32.mrf.mxu1 }
 0x11a   : > { %v4301_v37 = vadd.f32 %v980_v34, %v757_v1 }
 0x11b   : > { %v4303_v38 = vpop.f32.mrf.mxu0  ;;  %v4305_v43 = vpop.f32.mrf.mxu1 }
 0x11c   : > { %5195 = vst [vmem:[#allocation6_spill] sm:$0xff] %v4303_v38  ;;  %5196 = vst [vmem:[#allocation7_spill] sm:$0xff] %v4305_v43  ;;  %v3678_v38 = vld [vmem:[%s5182_s3 + $0x1c4] ss:$8 sps:$4 sm:$0xff]  }
 0x11d   : > { %v773_v50 = vpop.f32.mrf.mxu0  ;;  %3290 = vmatmul.mubr.msk.bf16.gmra.mxu0 %vm612_vm0, %v4147_v8  ;;  %v986_v55 = vpop.f32.mrf.mxu1  ;;  %v3275_v8 = vcombine.low %v4161_v9, %v359_v0  ;;  %v3661_v9 = vld [vmem:[%s5182_s3 + $0xa0] ss:$8 sps:$4 sm:$0xff]  }
 0x11e   : > { %1647 = vmatprep.mubr.bf16.mxu0 %v5189_v2  ;;  %v4317_v52 = vadd.f32 %v986_v55, %v763_v15  ;;  %v3666_v55 = vld [vmem:[%s5182_s3 + $0x1e4] ss:$8 sps:$4 sm:$0xff]   ;;  %1900 = vmatpush1.bf16.msra.mxu1 %v3661_v9 }
 0x11f   : > { %v775_v58 = vpop.f32.mrf.mxu0  ;;  %v988_v1 = vpop.f32.mrf.mxu1  ;;  %2384 = vmatprep.subr.bf16.mxu0 %v3666_v55  ;;  %1901 = vmatprep.subr.bf16.mxu1 %v3669_v56 }
 0x120   : > { %v4326_v19 = vadd.f32 %v988_v1, %v765_v23  ;;  %v3664_v23 = vld [vmem:[%s5182_s3 + $0x1e0] ss:$8 sps:$4 sm:$0xff]  }
 0x121   : > { %v777_v25 = vpop.f32.mrf.mxu0  ;;  %v990_v34 = vpop.f32.mrf.mxu1  ;;  %2385 = vmatpush1.bf16.msra.mxu0 %v3664_v23 }
 0x122   : > { %v4328_v15 = vadd.f32 %v990_v34, %v767_v33  ;;  %v3672_v34 = vld [vmem:[%s5182_s3 + $0x1d4] ss:$8 sps:$4 sm:$0xff]  }
 0x123   : > { %v4330_v6 = vpop.f32.mrf.mxu0  ;;  %v4338_v2 = vpop.f32.mrf.mxu1  ;;  %2386 = vmatprep.subr.bf16.mxu0 %v3672_v34 }
 0x124   : > { %5197 = vst [vmem:[#allocation8_spill] sm:$0xff] %v4330_v6  ;;  %5198 = vst [vmem:[#allocation9_spill] sm:$0xff] %v4338_v2  ;;  %v3675_v2 = vld [vmem:[%s5182_s3 + $0x84] ss:$8 sps:$4 sm:$0xff]  }
 0x125   : > { %v783_v33 = vpop.f32.mrf.mxu0  ;;  %3291 = vmatmul.mubr.msk.bf16.gmra.mxu0 %vm612_vm0, %v3275_v8  ;;  %v996_v0 = vpop.f32.mrf.mxu1  ;;  %v3667_v8 = vld [vmem:[%s5182_s3 + $0x90] ss:$8 sps:$4 sm:$0xff]  }
 0x126   : > { %v4347_v61 = vadd.f32 %v996_v0, %v773_v50  ;;  %2414 = vmatprep.mubr.bf16.mxu0 %v5199_v18  ;;  %v3670_v50 = vld [vmem:[%s5182_s3 + $0x1d0] ss:$8 sps:$4 sm:$0xff]   ;;  %1902 = vmatpush1.bf16.msra.mxu1 %v3667_v8 }
 0x127   : > { %v785_v1 = vpop.f32.mrf.mxu0  ;;  %v998_v6 = vpop.f32.mrf.mxu1  ;;  %2387 = vmatpush1.bf16.msra.mxu0 %v3670_v50  ;;  %1903 = vmatprep.subr.bf16.mxu1 %v3675_v2  ;;  %v3679_v2 = vld [vmem:[%s5182_s3 + $0x1b0] ss:$8 sps:$4 sm:$0xff]  }
 0x128   : > { %v4362_v44 = vadd.f32 %v998_v6, %v775_v58  ;;  %v3673_v6 = vld [vmem:[%s5182_s3 + $0x80] ss:$8 sps:$4 sm:$0xff]   ;;  %2388 = vmatprep.subr.bf16.mxu0 %v3678_v38 }
 0x129   : > { %v787_v55 = vpop.f32.mrf.mxu0  ;;  %v1000_v9 = vpop.f32.mrf.mxu1 }
 0x12a   : > { %v4364_v23 = vadd.f32 %v1000_v9, %v777_v25  ;;  %v3676_v25 = vld [vmem:[%s5182_s3 + $0x1c0] ss:$8 sps:$4 sm:$0xff]   ;;  %1904 = vmatpush1.bf16.msra.mxu1 %v3673_v6 }
 0x12b   : > { %v4366_v0 = vpop.f32.mrf.mxu0  ;;  %v4374_v58 = vpop.f32.mrf.mxu1  ;;  %2389 = vmatpush1.bf16.msra.mxu0 %v3676_v25 }
 0x12c   : > { %5200 = vst [vmem:[#allocation10_spill] sm:$0xff] %v4366_v0  ;;  %5201 = vst [vmem:[#allocation11_spill] sm:$0xff] %v4374_v58  ;;  %v3681_v0 = vld [vmem:[%s5182_s3 + $0x1b4] ss:$8 sps:$4 sm:$0xff]  }
 0x12d   : > { %v1085_v56 = vpop.f32.mrf.mxu0  ;;  %v1006_v34 = vpop.f32.mrf.mxu1  ;;  %2390 = vmatprep.subr.bf16.mxu0 %v3681_v0 }
 0x12e   : > { %v1204_v8 = vadd.f32 %v1085_v56, %v4182_v21  ;;  %v4383_v50 = vadd.f32 %v1006_v34, %v783_v33 }
 0x12f   : > { %v1087_v9 = vpop.f32.mrf.mxu0  ;;  %v1008_v58 = vpop.f32.mrf.mxu1  ;;  %2391 = vmatpush1.bf16.msra.mxu0 %v3679_v2  ;;  %v3685_v2 = vld [vmem:[%s5182_s3 + $0x190] ss:$8 sps:$4 sm:$0xff]  }
 0x130   : > { %v1205_v43 = vadd.f32 %v1087_v9, %v4184_v24  ;;  %v4392_v38 = vadd.f32 %v1008_v58, %v785_v1  ;;  %v3684_v24 = vld [vmem:[%s5182_s3 + $0x1a4] ss:$8 sps:$4 sm:$0xff]   ;;  %v3682_v1 = vld [vmem:[%s5182_s3 + $0x1a0] ss:$8 sps:$4 sm:$0xff]  }
 0x131   : > { %v1089_v10 = vpop.f32.mrf.mxu0  ;;  %v1010_v21 = vpop.f32.mrf.mxu1  ;;  %2392 = vmatprep.subr.bf16.mxu0 %v3684_v24 }
 0x132   : > { %v1206_v33 = vadd.f32 %v1089_v10, %v4186_v27  ;;  %v4395_v6 = vadd.f32 %v1010_v21, %v787_v55  ;;  %v3687_v55 = vld [vmem:[%s5182_s3 + $0x194] ss:$8 sps:$4 sm:$0xff]  }
 0x133   : > { %v4397_v25 = vpop.f32.mrf.mxu0  ;;  %v4402_v56 = vpop.f32.mrf.mxu1  ;;  %2393 = vmatpush1.bf16.msra.mxu0 %v3682_v1 }
 0x134   : > { %5202 = vst [vmem:[#allocation12_spill] sm:$0xff] %v4402_v56  ;;  %2394 = vmatprep.subr.bf16.mxu0 %v3687_v55 }
 0x135   : > { %v1095_v58 = vpop.f32.mrf.mxu0  ;;  %v4407_v0 = vpop.f32.mrf.mxu1 }
 0x136   : > { %v4410_v27 = vadd.f32 %v1095_v58, %v4195_v32  ;;  %v3690_v58 = vld [vmem:[%s5182_s3 + $0x184] ss:$8 sps:$4 sm:$0xff]  }
 0x137   : > { %v1097_v10 = vpop.f32.mrf.mxu0  ;;  %v4415_v34 = vpop.f32.mrf.mxu1  ;;  %2395 = vmatpush1.bf16.msra.mxu0 %v3685_v2 }
 0x138   : > { %v4418_v9 = vadd.f32 %v1097_v10, %v4197_v35  ;;  %v3688_v10 = vld [vmem:[%s5182_s3 + $0x180] ss:$8 sps:$4 sm:$0xff]   ;;  %2396 = vmatprep.subr.bf16.mxu0 %v3690_v58 }
 0x139   : > { %v1099_v21 = vpop.f32.mrf.mxu0  ;;  %v4423_v24 = vpop.f32.mrf.mxu1 }
 0x13a   : > { %v4426_v32 = vadd.f32 %v1099_v21, %v4205_v40 }
 0x13b   : > { %v4428_v1 = vpop.f32.mrf.mxu0  ;;  %v4433_v35 = vpop.f32.mrf.mxu1  ;;  %2397 = vmatpush1.bf16.msra.mxu0 %v3688_v10 }
 0x13c   : > { %5203 = vst [vmem:[#allocation13_spill] sm:$0xff] %v4426_v32  ;;  %5204 = vst [vmem:[#allocation14_spill] sm:$0xff] %v4428_v1 }
 0x13d   : > { %5205 = vst [vmem:[#allocation15_spill] sm:$0xff] %v4433_v35  ;;  %v1105_v56 = vpop.f32.mrf.mxu0  ;;  %v1312_v40 = vpop.f32.mrf.mxu1 }
 0x13e   : > { %v4439_v55 = vadd.f32 %v1105_v56, %v4214_v45  ;;  %v4441_v21 = vadd.f32 %v1312_v40, %v1204_v8 }
 0x13f   : > { %v1107_v18 = vpop.f32.mrf.mxu0  ;;  %v1314_v54 = vpop.f32.mrf.mxu1 }
 0x140   : > { %v4444_v2 = vadd.f32 %v1107_v18, %v4216_v48  ;;  %v4446_v41 = vadd.f32 %v1314_v54, %v1205_v43  ;;  %v3693_v54 = vld [vmem:[%s5182_s3 + $0x74] ss:$8 sps:$4 sm:$0xff]  }
 0x141   : > { %v1109_v35 = vpop.f32.mrf.mxu0  ;;  %v1316_v1 = vpop.f32.mrf.mxu1  ;;  %2052 = vmatprep.subr.bf16.mxu1 %v3693_v54 }
 0x142   : > { %v4449_v32 = vadd.f32 %v1109_v35, %v4218_v51  ;;  %v4451_v58 = vadd.f32 %v1316_v1, %v1206_v33  ;;  %v943_v1 = vadd.f32 %v4241_v7, %v4220_v53  ;;  %v953_v7 = vadd.f32 %v4260_v31, %v4239_v5 }
 0x143   : > { %v4453_v45 = vpop.f32.mrf.mxu0  ;;  %v4455_v56 = vpop.f32.mrf.mxu1  ;;  %v963_v5 = vadd.f32 %v4273_v49, %v4258_v30  ;;  %v973_v30 = vadd.f32 %v4292_v11, %v4271_v47 }
 0x144   : > { %5206 = vst [vmem:[#allocation16_spill] sm:$0xff] %v4449_v32 }
 0x145   : > { %v1115_v8 = vpop.f32.mrf.mxu0  ;;  %v4460_v18 = vpop.f32.mrf.mxu1 }
 0x146   : > { %v4458_v10 = vadd.f32 %v1115_v8, %v4233_v59 }
 0x147   : > { %v1117_v48 = vpop.f32.mrf.mxu0  ;;  %v4468_v43 = vpop.f32.mrf.mxu1 }
 0x148   : > { %5207 = vst [vmem:[#allocation17_spill] sm:$0xff] %v4458_v10  ;;  %v4466_v51 = vadd.f32 %v1117_v48, %v4235_v63 }
 0x149   : > { %v1119_v33 = vpop.f32.mrf.mxu0  ;;  %v4475_v35 = vpop.f32.mrf.mxu1 }
 0x14a   : > { %5208 = vst [vmem:[#allocation18_spill] sm:$0xff] %v4466_v51  ;;  %v4473_v59 = vadd.f32 %v1119_v33, %v4237_v4 }
 0x14b   : > { %v1121_v40 = vpop.f32.mrf.mxu0  ;;  %v4479_v10 = vpop.f32.mrf.mxu1 }
 0x14c   : > { %v4477_v8 = vadd.f32 %v1121_v40, %v943_v1 }
 0x14d   : > { %v1125_v32 = vpop.f32.mrf.mxu0  ;;  %v4484_v48 = vpop.f32.mrf.mxu1 }
 0x14e   : > { %5209 = vst [vmem:[#allocation19_spill] sm:$0xff] %v4477_v8  ;;  %v4482_v63 = vadd.f32 %v1125_v32, %v4246_v13 }
 0x14f   : > { %v1127_v54 = vpop.f32.mrf.mxu0  ;;  %v4489_v53 = vpop.f32.mrf.mxu1 }
 0x150   : > { %5210 = vst [vmem:[#allocation20_spill] sm:$0xff] %v4482_v63  ;;  %v4487_v51 = vadd.f32 %v1127_v54, %v4248_v20 }
 0x151   : > { %v1129_v4 = vpop.f32.mrf.mxu0  ;;  %v4496_v1 = vpop.f32.mrf.mxu1 }
 0x152   : > { %5211 = vst [vmem:[#allocation21_spill] sm:$0xff] %v4487_v51  ;;  %v4494_v33 = vadd.f32 %v1129_v4, %v4256_v60 }
 0x153   : > { %v1131_v40 = vpop.f32.mrf.mxu0  ;;  %v4503_v20 = vpop.f32.mrf.mxu1 }
 0x154   : > { %v4498_v13 = vadd.f32 %v1131_v40, %v953_v7 }
 0x155   : > { %v1135_v32 = vpop.f32.mrf.mxu0  ;;  %v4513_v31 = vpop.f32.mrf.mxu1 }
 0x156   : > { %v4501_v63 = vadd.f32 %v1135_v32, %v4265_v36 }
 0x157   : > { %v1137_v54 = vpop.f32.mrf.mxu0  ;;  %v4520_v32 = vpop.f32.mrf.mxu1 }
 0x158   : > { %v4506_v51 = vadd.f32 %v1137_v54, %v4267_v39 }
 0x159   : > { %v1139_v8 = vpop.f32.mrf.mxu0  ;;  %v4530_v49 = vpop.f32.mrf.mxu1 }
 0x15a   : > { %5212 = vst [vmem:[#allocation22_spill] sm:$0xff] %v4506_v51  ;;  %v4511_v60 = vadd.f32 %v1139_v8, %v4269_v46 }
 0x15b   : > { %v1141_v4 = vpop.f32.mrf.mxu0 }
 0x15c   : > { %v4515_v7 = vadd.f32 %v1141_v4, %v963_v5 }
 0x15d   : > { %v1145_v36 = vpop.f32.mrf.mxu0 }
 0x15e   : > { %v4518_v40 = vadd.f32 %v1145_v36, %v4284_v57  ;;  %v4537_v36 = vpop.f32.mrf.mxu1 }
 0x15f   : > { %v1147_v39 = vpop.f32.mrf.mxu0 }
 0x160   : > { %v4523_v54 = vadd.f32 %v1147_v39, %v4286_v62 }
 0x161   : > { %v1149_v51 = vpop.f32.mrf.mxu0 }
 0x162   : > { %5213 = vst [vmem:[#allocation23_spill] sm:$0xff] %v4523_v54  ;;  %v4528_v46 = vadd.f32 %v1149_v51, %v4288_v3  ;;  %v4545_v3 = vpop.f32.mrf.mxu1 }
 0x163   : > { %v1151_v8 = vpop.f32.mrf.mxu0 }
 0x164   : > { %v4532_v5 = vadd.f32 %v1151_v8, %v973_v30 }
 0x165   : > { %v1155_v57 = vpop.f32.mrf.mxu0 }
 0x166   : > { %v4535_v4 = vadd.f32 %v1155_v57, %v4297_v22  ;;  %v4552_v22 = vpop.f32.mrf.mxu1 }
 0x167   : > { %v1157_v62 = vpop.f32.mrf.mxu0 }
 0x168   : > { %v4540_v39 = vadd.f32 %v1157_v62, %v4299_v26 }
 0x169   : > { %v1159_v54 = vpop.f32.mrf.mxu0 }
 0x16a   : > { %v4543_v47 = vadd.f32 %v1159_v54, %v4301_v37  ;;  %v4560_v37 = vpop.f32.mrf.mxu1 }
 0x16b   : > { %v4547_v11 = vpop.f32.mrf.mxu0 }
 0x16c   : > { %5214 = vst [vmem:[#allocation24_spill] sm:$0xff] %v4543_v47  ;;  %5215 = vst [vmem:[#allocation25_spill] sm:$0xff] %v4547_v11 }
 0x16d   : > { %v1165_v51 = vpop.f32.mrf.mxu0 }
 0x16e   : > { %v4550_v30 = vadd.f32 %v1165_v51, %v4317_v52  ;;  %v4567_v52 = vpop.f32.mrf.mxu1 }
 0x16f   : > { %v1167_v8 = vpop.f32.mrf.mxu0 }
 0x170   : > { %5216 = vst [vmem:[#allocation26_spill] sm:$0xff] %v4550_v30  ;;  %v4555_v57 = vadd.f32 %v1167_v8, %v4326_v19 }
 0x171   : > { %v1169_v26 = vpop.f32.mrf.mxu0 }
 0x172   : > { %v4558_v62 = vadd.f32 %v1169_v26, %v4328_v15  ;;  %v4575_v15 = vpop.f32.mrf.mxu1 }
 0x173   : > { %v4562_v54 = vpop.f32.mrf.mxu0 }
 0x174   : > { %5217 = vst [vmem:[#allocation27_spill] sm:$0xff] %v4558_v62  ;;  %5218 = vst [vmem:[#allocation28_spill] sm:$0xff] %v4562_v54 }
 0x175   : > { %v1175_v47 = vpop.f32.mrf.mxu0 }
 0x176   : > { %v4565_v11 = vadd.f32 %v1175_v47, %v4347_v61  ;;  %v4582_v61 = vpop.f32.mrf.mxu1 }
 0x177   : > { %v1177_v51 = vpop.f32.mrf.mxu0 }
 0x178   : > { %5219 = vst [vmem:[#allocation29_spill] sm:$0xff] %v4565_v11  ;;  %v4570_v30 = vadd.f32 %v1177_v51, %v4362_v44 }
 0x179   : > { %v1179_v19 = vpop.f32.mrf.mxu0 }
 0x17a   : > { %v4573_v8 = vadd.f32 %v1179_v19, %v4364_v23  ;;  %v4590_v23 = vpop.f32.mrf.mxu1 }
 0x17b   : > { %v4577_v26 = vpop.f32.mrf.mxu0 }
 0x17c   : > { %5220 = vst [vmem:[#allocation30_spill] sm:$0xff] %v4573_v8  ;;  %5221 = vst [vmem:[#allocation31_spill] sm:$0xff] %v4577_v26  ;;  %v1017_v8 = vadd.f32 %v4407_v0, %v4166_v12 }
 0x17d   : > { %v1185_v62 = vpop.f32.mrf.mxu0 }
 0x17e   : > { %v4580_v54 = vadd.f32 %v1185_v62, %v4383_v50  ;;  %v1019_v50 = vadd.f32 %v4415_v34, %v4171_v14  ;;  %v913_v14 = vadd.f32 %v4190_v29, %v4175_v17  ;;  %v923_v29 = vadd.f32 %v4209_v42, %v4188_v28 }
 0x17f   : > { %v1187_v47 = vpop.f32.mrf.mxu0 }
 0x180   : > { %5222 = vst [vmem:[#allocation32_spill] sm:$0xff] %v4580_v54  ;;  %v4585_v11 = vadd.f32 %v1187_v47, %v4392_v38  ;;  %v4600_v54 = vpop.f32.mrf.mxu1 }
 0x181   : > { %v1189_v44 = vpop.f32.mrf.mxu0 }
 0x182   : > { %v4588_v51 = vadd.f32 %v1189_v44, %v4395_v6  ;;  %v1021_v6 = vadd.f32 %v4423_v24, %v4173_v16  ;;  %v1207_v16 = vadd.f32 %v4397_v25, %v913_v14  ;;  %v5228_v14 = vld [vmem:[#allocation14_spill] sm:$0xff] }
 0x183   : > { %v4592_v19 = vpop.f32.mrf.mxu0 }
 0x184   : > { %5223 = vst [vmem:[#allocation33_spill] sm:$0xff] %v4588_v51  ;;  %5224 = vst [vmem:[#allocation34_spill] sm:$0xff] %v4592_v19  ;;  %v4608_v19 = vpop.f32.mrf.mxu1 }
 0x185   : > { %v1195_v26 = vpop.f32.mrf.mxu0 }
 0x186   : > { %v4598_v62 = vadd.f32 %v1195_v26, %v1017_v8  ;;  %v4615_v8 = vpop.f32.mrf.mxu1 }
 0x187   : > { %v1197_v38 = vpop.f32.mrf.mxu0 }
 0x188   : > { %v4604_v47 = vadd.f32 %v1197_v38, %v1019_v50  ;;  %v1434_v38 = vadd.f32 %v4455_v56, %v1207_v16 }
 0x189   : > { %v1199_v44 = vpop.f32.mrf.mxu0 }
 0x18a   : > { %5225 = vst [vmem:[#allocation35_spill] sm:$0xff] %v4604_v47  ;;  %v4606_v51 = vadd.f32 %v1199_v44, %v1021_v6 }
 0x18b   : > { %v4610_v12 = vpop.f32.mrf.mxu0 }
 0x18c   : > { %5226 = vst [vmem:[#allocation36_spill] sm:$0xff] %v4606_v51  ;;  %5227 = vst [vmem:[#allocation37_spill] sm:$0xff] %v4610_v12  ;;  %v4621_v51 = vpop.f32.mrf.mxu1 }
 0x18d   : > { %v1539_v0 = vpop.f32.mrf.mxu0 }
 0x18e   : > { %v1658_v34 = vadd.f32 %v1539_v0, %v4441_v21  ;;  %v1435_v21 = vadd.f32 %v4460_v18, %v4410_v27  ;;  %v4629_v0 = vpop.f32.mrf.mxu1 }
 0x18f   : > { %v1541_v26 = vpop.f32.mrf.mxu0 }
 0x190   : > { %v1659_v24 = vadd.f32 %v1541_v26, %v4446_v41  ;;  %v1436_v41 = vadd.f32 %v4468_v43, %v4418_v9  ;;  %v4635_v27 = vpop.f32.mrf.mxu1 }
 0x191   : > { %v1543_v50 = vpop.f32.mrf.mxu0 }
 0x192   : > { %v1706_v6 = vmax.f32 %v1658_v34, %v1659_v24  ;;  %v1660_v44 = vadd.f32 %v1543_v50, %v4451_v58  ;;  %v1211_v58 = vadd.f32 %v5228_v14, %v923_v29  ;;  %v5229_v24 = vld [vmem:[#allocation13_spill] sm:$0xff] }
 0x193   : > { %v1545_v12 = vpop.f32.mrf.mxu0  ;;  %v1437_v50 = vadd.f32 %v4475_v35, %v5229_v24  ;;  %v1439_v35 = vadd.f32 %v4484_v48, %v4439_v55 }
 0x194   : > { %v1661_v47 = vadd.f32 %v1545_v12, %v1434_v38  ;;  %v1438_v28 = vadd.f32 %v4479_v10, %v1211_v58  ;;  %v5231_v38 = vld [vmem:[#allocation4_spill] sm:$0xff]  ;;  %v1440_v10 = vadd.f32 %v4489_v53, %v4444_v2 }
 0x195   : > { %v1549_v17 = vpop.f32.mrf.mxu0 }
 0x196   : > { %v1707_v25 = vmax.f32 %v1660_v44, %v1661_v47  ;;  %v1662_v26 = vadd.f32 %v1549_v17, %v1435_v21  ;;  %v5230_v47 = vld [vmem:[#allocation3_spill] sm:$0xff] }
 0x197   : > { %v1551_v56 = vpop.f32.mrf.mxu0  ;;  %v933_v44 = vadd.f32 %v5231_v38, %v5230_v47  ;;  %v5234_v47 = vld [vmem:[#allocation18_spill] sm:$0xff] }
 0x198   : > { %v1730_v34 = vmax.f32 %v1706_v6, %v1707_v25  ;;  %v1663_v16 = vadd.f32 %v1551_v56, %v1436_v41  ;;  %v4642_v6 = vld [vmem:[%s5181_s2] ss:$0 sm:$0xff]  ;;  %v4649_v41 = vpop.f32.mrf.mxu1  ;;  %v1444_v38 = vadd.f32 %v4520_v32, %v5234_v47 }
 0x199   : > { %v1553_v12 = vpop.f32.mrf.mxu0  ;;  %v1215_v21 = vadd.f32 %v4453_v45, %v933_v44 }
 0x19a   : > { %v1708_v42 = vmax.f32 %v1662_v26, %v1663_v16  ;;  %v1664_v9 = vadd.f32 %v1553_v12, %v1437_v50  ;;  %v1749_v56 = vadd.f32 %v4642_v6, %v1730_v34  ;;  %v5232_v12 = vld [vmem:[#allocation16_spill] sm:$0xff]  ;;  %v4656_v53 = vpop.f32.mrf.mxu1 }
 0x19b   : > { %v1555_v18 = vpop.f32.mrf.mxu0  ;;  %v1441_v24 = vadd.f32 %v4496_v1, %v5232_v12  ;;  %v1442_v55 = vadd.f32 %v4503_v20, %v1215_v21 }
 0x19c   : > { %v1665_v43 = vadd.f32 %v1555_v18, %v1438_v28  ;;  %v1761_v50 = vmax.f32 %v1749_v56, 0.0  ;;  %v4664_v44 = vpop.f32.mrf.mxu1  ;;  %v5235_v56 = vld [vmem:[#allocation19_spill] sm:$0xff] }
 0x19d   : > { %v1559_v17 = vpop.f32.mrf.mxu0 }
 0x19e   : > { %v1709_v29 = vmax.f32 %v1664_v9, %v1665_v43  ;;  %v1666_v58 = vadd.f32 %v1559_v17, %v1439_v35  ;;  %v4671_v32 = vpop.f32.mrf.mxu1 }
 0x19f   : > { %v1561_v25 = vpop.f32.mrf.mxu0 }
 0x1a0   : > { %v1731_v14 = vmax.f32 %v1708_v42, %v1709_v29  ;;  %v1667_v26 = vadd.f32 %v1561_v25, %v1440_v10  ;;  %v5233_v42 = vld [vmem:[#allocation17_spill] sm:$0xff]  ;;  %v1445_v25 = vadd.f32 %v4530_v49, %v4473_v59 }
 0x1a1   : > { %v1563_v16 = vpop.f32.mrf.mxu0  ;;  %v1443_v43 = vadd.f32 %v4513_v31, %v5233_v42  ;;  %v5237_v49 = vld [vmem:[#allocation21_spill] sm:$0xff] }
 0x1a2   : > { %v1750_v48 = vadd.f32 %v4642_v6, %v1731_v14  ;;  %v1710_v2 = vmax.f32 %v1666_v58, %v1667_v26  ;;  %v1668_v18 = vadd.f32 %v1563_v16, %v1441_v24  ;;  %v1446_v14 = vadd.f32 %v4537_v36, %v5235_v56 }
 0x1a3   : > { %v1565_v45 = vpop.f32.mrf.mxu0  ;;  %v1448_v36 = vadd.f32 %v4552_v22, %v5237_v49  ;;  %v1449_v22 = vadd.f32 %v4560_v37, %v4494_v33  ;;  %v3697_v33 = vld [vmem:[%s5182_s3 + $0x50] ss:$8 sps:$4 sm:$0xff]   ;;  %v5239_v37 = vld [vmem:[#allocation22_spill] sm:$0xff] }
 0x1a4   : > { %v1762_v28 = vmax.f32 %v1750_v48, 0.0  ;;  %v1669_v9 = vadd.f32 %v1565_v45, %v1442_v55  ;;  %v3691_v48 = vld [vmem:[%s5182_s3 + $0x70] ss:$8 sps:$4 sm:$0xff]  }
 0x1a5   : > { %v1569_v34 = vpop.f32.mrf.mxu0 }
 0x1a6   : > { %v4662_v1 = vpack.c.bf16 %v1762_v28, %v1761_v50  ;;  %v1711_v20 = vmax.f32 %v1668_v18, %v1669_v9  ;;  %v1670_v10 = vadd.f32 %v1569_v34, %v1443_v43  ;;  %v3696_v18 = vld [vmem:[%s5182_s3 + $0x64] ss:$8 sps:$4 sm:$0xff]   ;;  %v4683_v9 = vpop.f32.mrf.mxu1 }
 0x1a7   : > { %v1571_v17 = vpop.f32.mrf.mxu0 }
 0x1a8   : > { %v1732_v35 = vmax.f32 %v1710_v2, %v1711_v20  ;;  %v1671_v29 = vadd.f32 %v1571_v17, %v1444_v38  ;;  %v5236_v2 = vld [vmem:[#allocation20_spill] sm:$0xff]  ;;  %v5238_v20 = vmov 0  }
 0x1a9   : > { %v1573_v21 = vpop.f32.mrf.mxu0  ;;  %v1447_v59 = vadd.f32 %v4545_v3, %v5236_v2  ;;  %v3694_v3 = vld [vmem:[%s5182_s3 + $0x60] ss:$8 sps:$4 sm:$0xff]  }
 0x1aa   : > { %v1751_v31 = vadd.f32 %v4642_v6, %v1732_v35  ;;  %v1712_v58 = vmax.f32 %v1670_v10, %v1671_v29  ;;  %v1672_v12 = vadd.f32 %v1573_v21, %v1445_v25  ;;  %v3699_v10 = vld [vmem:[%s5182_s3 + $0x54] ss:$8 sps:$4 sm:$0xff]   ;;  %v4697_v29 = vpop.f32.mrf.mxu1 }
 0x1ab   : > { %v1575_v26 = vpop.f32.mrf.mxu0 }
 0x1ac   : > { %v1763_v16 = vmax.f32 %v1751_v31, 0.0  ;;  %v1673_v24 = vadd.f32 %v1575_v26, %v1446_v14  ;;  %v3702_v26 = vld [vmem:[%s5182_s3 + $0x44] ss:$8 sps:$4 sm:$0xff]  }
 0x1ad   : > { %v1579_v55 = vpop.f32.mrf.mxu0 }
 0x1ae   : > { %v3426_v45 = vpack.c.bf16 %v1763_v16, %v1762_v28  ;;  %v1713_v50 = vmax.f32 %v1672_v12, %v1673_v24  ;;  %v1674_v43 = vadd.f32 %v1579_v55, %v1447_v59  ;;  %v1450_v28 = vadd.f32 %v4567_v52, %v4498_v13  ;;  %v4711_v24 = vpop.f32.mrf.mxu1 }
 0x1af   : > { %v1581_v34 = vpop.f32.mrf.mxu0  ;;  %v1451_v13 = vadd.f32 %v4575_v15, %v4501_v63  ;;  %v1452_v52 = vadd.f32 %v4582_v61, %v5239_v37  ;;  %v3700_v63 = vld [vmem:[%s5182_s3 + $0x40] ss:$8 sps:$4 sm:$0xff]   ;;  %v1453_v15 = vadd.f32 %v4590_v23, %v4511_v60  ;;  %v1454_v61 = vadd.f32 %v4600_v54, %v4515_v7 }
 0x1b0   : > { %v1733_v42 = vmax.f32 %v1712_v58, %v1713_v50  ;;  %v1675_v47 = vadd.f32 %v1581_v34, %v1448_v36  ;;  %1922 = vmatmul.mubr.bf16.vlgmr.msra.gmra.mxu1 %v3426_v45  ;;  %v3705_v45 = vld [vmem:[%s5182_s3 + $0x34] ss:$8 sps:$4 sm:$0xff]   ;;  %v4724_v50 = vpop.f32.mrf.mxu1  ;;  %v1455_v60 = vadd.f32 %v4608_v19, %v4518_v40  ;;  %v5240_v7 = vld [vmem:[#allocation23_spill] sm:$0xff] }
 0x1b1   : > { %v1583_v38 = vpop.f32.mrf.mxu0  ;;  %1931 = vmatprep.mubr.bf16.mxu1 %v5238_v20  ;;  %2053 = vmatpush1.bf16.msra.mxu1 %v3691_v48  ;;  %v1456_v54 = vadd.f32 %v4615_v8, %v5240_v7  ;;  %v1457_v8 = vadd.f32 %v4621_v51, %v4528_v46  ;;  %v3717_v7 = vld [vmem:[%s5182_s3 + $0x174] ss:$8 sps:$4 sm:$0xff]  }
 0x1b2   : > { %v1714_v17 = vmax.f32 %v1674_v43, %v1675_v47  ;;  %v1752_v35 = vadd.f32 %v4642_v6, %v1733_v42  ;;  %2054 = vmatprep.subr.bf16.mxu1 %v3696_v18  ;;  %v1676_v25 = vadd.f32 %v1583_v38, %v1449_v22  ;;  %v4733_v22 = vpop.f32.mrf.mxu1 }
 0x1b3   : > { %v1585_v21 = vpop.f32.mrf.mxu0 }
 0x1b4   : > { %v1677_v56 = vadd.f32 %v1585_v21, %v1450_v28  ;;  %v1764_v14 = vmax.f32 %v1752_v35, 0.0  ;;  %v1458_v21 = vadd.f32 %v4629_v0, %v4532_v5  ;;  %v5241_v5 = vld [vmem:[#allocation5_spill] sm:$0xff]  ;;  %v5242_v0 = vld [vmem:[#allocation7_spill] sm:$0xff] }
 0x1b5   : > { %v1589_v31 = vpop.f32.mrf.mxu0  ;;  %2055 = vmatpush1.bf16.msra.mxu1 %v3694_v3  ;;  %v3703_v3 = vld [vmem:[%s5182_s3 + $0x30] ss:$8 sps:$4 sm:$0xff]  }
 0x1b6   : > { %v1715_v58 = vmax.f32 %v1676_v25, %v1677_v56  ;;  %2056 = vmatprep.subr.bf16.mxu1 %v3699_v10  ;;  %v4709_v12 = vpack.c.bf16 %v1764_v14, %v1763_v16  ;;  %v1678_v2 = vadd.f32 %v1589_v31, %v1451_v13  ;;  %v4748_v31 = vpop.f32.mrf.mxu1  ;;  %v3711_v13 = vld [vmem:[%s5182_s3 + $0x14] ss:$8 sps:$4 sm:$0xff]  }
 0x1b7   : > { %v1591_v55 = vpop.f32.mrf.mxu0 }
 0x1b8   : > { %v1734_v48 = vmax.f32 %v1714_v17, %v1715_v58  ;;  %v1679_v59 = vadd.f32 %v1591_v55, %v1452_v52  ;;  %v3708_v17 = vld [vmem:[%s5182_s3 + $0x24] ss:$8 sps:$4 sm:$0xff]   ;;  %v983_v52 = vadd.f32 %v5242_v0, %v5241_v5  ;;  %v1460_v55 = vadd.f32 %v4649_v41, %v4540_v39 }
 0x1b9   : > { %v1593_v49 = vpop.f32.mrf.mxu0  ;;  %2057 = vmatpush1.bf16.msra.mxu1 %v3697_v33 }
 0x1ba   : > { %v1716_v16 = vmax.f32 %v1678_v2, %v1679_v59  ;;  %v1753_v36 = vadd.f32 %v4642_v6, %v1734_v48  ;;  %2058 = vmatprep.subr.bf16.mxu1 %v3702_v26  ;;  %v1680_v34 = vadd.f32 %v1593_v49, %v1453_v15  ;;  %v1459_v26 = vadd.f32 %v4635_v27, %v4535_v4  ;;  %v3709_v2 = vld [vmem:[%s5182_s3 + $0x10] ss:$8 sps:$4 sm:$0xff]   ;;  %v4764_v49 = vpop.f32.mrf.mxu1  ;;  %v3714_v15 = vld [vmem:[%s5182_s3 + $0x4] ss:$8 sps:$4 sm:$0xff]  }
 0x1bb   : > { %v1595_v18 = vpop.f32.mrf.mxu0  ;;  %v5243_v4 = vld [vmem:[#allocation25_spill] sm:$0xff] }
 0x1bc   : > { %v1681_v42 = vadd.f32 %v1595_v18, %v1454_v61  ;;  %v1765_v43 = vmax.f32 %v1753_v36, 0.0  ;;  %v1235_v27 = vadd.f32 %v5243_v4, %v983_v52  ;;  %v5244_v36 = vld [vmem:[#allocation24_spill] sm:$0xff] }
 0x1bd   : > { %v1599_v47 = vpop.f32.mrf.mxu0  ;;  %2059 = vmatpush1.bf16.msra.mxu1 %v3700_v63 }
 0x1be   : > { %v1717_v23 = vmax.f32 %v1680_v34, %v1681_v42  ;;  %v3427_v38 = vpack.c.bf16 %v1765_v43, %v1764_v14  ;;  %2060 = vmatprep.subr.bf16.mxu1 %v3705_v45  ;;  %v1682_v10 = vadd.f32 %v1599_v47, %v1455_v60  ;;  %v3706_v14 = vld [vmem:[%s5182_s3 + $0x20] ss:$8 sps:$4 sm:$0xff]   ;;  %v1461_v45 = vadd.f32 %v4656_v53, %v5244_v36  ;;  %v1412_v47 = vpop.f32.mrf.mxu1 }
 0x1bf   : > { %v1601_v28 = vpop.f32.mrf.mxu0  ;;  %v1462_v18 = vadd.f32 %v4664_v44, %v1235_v27  ;;  %v5246_v44 = vld [vmem:[#allocation9_spill] sm:$0xff] }
 0x1c0   : > { %v1735_v35 = vmax.f32 %v1716_v16, %v1717_v23  ;;  %v1683_v40 = vadd.f32 %v1601_v28, %v1456_v54  ;;  %1932 = vmatmul.mubr.bf16.gmra.mxu1 %v3427_v38  ;;  %2415 = vmatmul.mubr.bf16.vlgmr.msra.gmra.mxu0 %v3427_v38  ;;  %v5245_v38 = vld [vmem:[#allocation6_spill] sm:$0xff] }
 0x1c1   : > { %v1603_v19 = vpop.f32.mrf.mxu0  ;;  %1941 = vmatprep.mubr.bf16.mxu1 %v5238_v20  ;;  %2424 = vmatprep.mubr.bf16.mxu0 %v5238_v20 }
 0x1c2   : > { %v1718_v25 = vmax.f32 %v1682_v10, %v1683_v40  ;;  %v1754_v56 = vadd.f32 %v4642_v6, %v1735_v35  ;;  %2061 = vmatpush1.bf16.msra.mxu1 %v3703_v3  ;;  %v1684_v46 = vadd.f32 %v1603_v19, %v1457_v8  ;;  %v993_v3 = vadd.f32 %v5246_v44, %v5245_v38  ;;  %v5248_v8 = vld [vmem:[#allocation28_spill] sm:$0xff]  ;;  %v5255_v38 = vld [vmem:[#allocation10_spill] sm:$0xff] }
 0x1c3   : > { %v1605_v33 = vpop.f32.mrf.mxu0  ;;  %2062 = vmatprep.subr.bf16.mxu1 %v3708_v17  ;;  %v5247_v17 = vld [vmem:[#allocation26_spill] sm:$0xff]  ;;  %v1464_v10 = vadd.f32 %v4683_v9, %v4555_v57  ;;  %v5256_v44 = vld [vmem:[#allocation12_spill] sm:$0xff] }
 0x1c4   : > { %v1685_v51 = vadd.f32 %v1605_v33, %v1458_v21  ;;  %v1766_v37 = vmax.f32 %v1754_v56, 0.0  ;;  %v1463_v35 = vadd.f32 %v4671_v32, %v5247_v17  ;;  %v1239_v21 = vadd.f32 %v5248_v8, %v993_v3  ;;  %v5249_v32 = vld [vmem:[#allocation27_spill] sm:$0xff]  ;;  %v5257_v17 = vld [vmem:[#allocation32_spill] sm:$0xff] }
 0x1c5   : > { %v1609_v58 = vpop.f32.mrf.mxu0  ;;  %v1465_v57 = vadd.f32 %v4697_v29, %v5249_v32  ;;  %v1468_v29 = vadd.f32 %v4733_v22, %v4570_v30  ;;  %v1013_v3 = vadd.f32 %v5256_v44, %v5255_v38  ;;  %v3726_v44 = vld [vmem:[%s5182_s3 + $0x144] ss:$8 sps:$4 sm:$0xff]  }
 0x1c6   : > { %v1719_v48 = vmax.f32 %v1684_v46, %v1685_v51  ;;  %2063 = vmatpush1.bf16.msra.mxu1 %v3706_v14  ;;  %v4762_v59 = vpack.c.bf16 %v1766_v37, %v1765_v43  ;;  %v1686_v39 = vadd.f32 %v1609_v58, %v1459_v26  ;;  %v3712_v43 = vld [vmem:[%s5182_s3] ss:$8 sps:$4 sm:$0xff]   ;;  %v1466_v9 = vadd.f32 %v4711_v24, %v1239_v21 }
 0x1c7   : > { %v1611_v63 = vpop.f32.mrf.mxu0  ;;  %2064 = vmatprep.subr.bf16.mxu1 %v3711_v13 }
 0x1c8   : > { %v1736_v61 = vmax.f32 %v1718_v25, %v1719_v48  ;;  %v1687_v41 = vadd.f32 %v1611_v63, %v1460_v55  ;;  %v1414_v25 = vpop.f32.mrf.mxu1  ;;  %v5250_v55 = vld [vmem:[#allocation8_spill] sm:$0xff]  ;;  %v5251_v48 = vld [vmem:[#allocation11_spill] sm:$0xff] }
 0x1c9   : > { %v1613_v16 = vpop.f32.mrf.mxu0 }
 0x1ca   : > { %v1720_v34 = vmax.f32 %v1686_v39, %v1687_v41  ;;  %v1755_v42 = vadd.f32 %v4642_v6, %v1736_v61  ;;  %2065 = vmatpush1.bf16.msra.mxu1 %v3709_v2  ;;  %v1688_v54 = vadd.f32 %v1613_v16, %v1461_v45  ;;  %v1416_v5 = vpop.f32.mrf.mxu1  ;;  %v1003_v2 = vadd.f32 %v5251_v48, %v5250_v55  ;;  %v5253_v41 = vld [vmem:[#allocation31_spill] sm:$0xff]  ;;  %v3715_v48 = vld [vmem:[%s5182_s3 + $0x170] ss:$8 sps:$4 sm:$0xff]  }
 0x1cb   : > { %v1615_v60 = vpop.f32.mrf.mxu0  ;;  %2066 = vmatprep.subr.bf16.mxu1 %v3714_v15  ;;  %v5252_v15 = vld [vmem:[#allocation29_spill] sm:$0xff] }
 0x1cc   : > { %v1689_v23 = vadd.f32 %v1615_v60, %v1462_v18  ;;  %v1767_v53 = vmax.f32 %v1755_v42, 0.0  ;;  %v1467_v4 = vadd.f32 %v4724_v50, %v5252_v15  ;;  %v1418_v61 = vpop.f32.mrf.mxu1  ;;  %v1243_v16 = vadd.f32 %v5253_v41, %v1003_v2  ;;  %v5254_v42 = vld [vmem:[#allocation30_spill] sm:$0xff] }
 0x1cd   : > { %v1619_v28 = vpop.f32.mrf.mxu0 }
 0x1ce   : > { %v1721_v40 = vmax.f32 %v1688_v54, %v1689_v23  ;;  %v3428_v19 = vpack.c.bf16 %v1767_v53, %v1766_v37  ;;  %2067 = vmatpush1.bf16.msra.mxu1 %v3712_v43  ;;  %v1690_v33 = vadd.f32 %v1619_v28, %v1463_v35  ;;  %v1469_v43 = vadd.f32 %v4748_v31, %v5254_v42  ;;  %v1422_v30 = vpop.f32.mrf.mxu1 }
 0x1cf   : > { %v1621_v56 = vpop.f32.mrf.mxu0  ;;  %2209 = vmatprep.subr.bf16.mxu1 %v3717_v7  ;;  %v1470_v60 = vadd.f32 %v4764_v49, %v1243_v16  ;;  %v1471_v35 = vadd.f32 %v1412_v47, %v5257_v17  ;;  %v1475_v2 = vadd.f32 %v1422_v30, %v4598_v62  ;;  %v3718_v62 = vld [vmem:[%s5182_s3 + $0x160] ss:$8 sps:$4 sm:$0xff]  }
 0x1d0   : > { %v1737_v14 = vmax.f32 %v1720_v34, %v1721_v40  ;;  %v1691_v13 = vadd.f32 %v1621_v56, %v1464_v10  ;;  %1942 = vmatmul.mubr.bf16.gmra.mxu1 %v3428_v19  ;;  %2425 = vmatmul.mubr.bf16.gmra.mxu0 %v3428_v19  ;;  %v1472_v10 = vadd.f32 %v1414_v25, %v4585_v11  ;;  %v5258_v19 = vld [vmem:[#allocation34_spill] sm:$0xff]  ;;  %v1424_v8 = vpop.f32.mrf.mxu1 }
 0x1d1   : > { %v1623_v46 = vpop.f32.mrf.mxu0  ;;  %1951 = vmatprep.mubr.bf16.mxu1 %v5238_v20  ;;  %2434 = vmatprep.mubr.bf16.mxu0 %v5238_v20  ;;  %v1247_v49 = vadd.f32 %v5258_v19, %v1013_v3 }
 0x1d2   : > { %v1756_v51 = vadd.f32 %v4642_v6, %v1737_v14  ;;  %v1722_v37 = vmax.f32 %v1690_v33, %v1691_v13  ;;  %v1692_v58 = vadd.f32 %v1623_v46, %v1465_v57  ;;  %v5259_v46 = vld [vmem:[#allocation33_spill] sm:$0xff]  ;;  %v1426_v57 = vpop.f32.mrf.mxu1 }
 0x1d3   : > { %v1625_v0 = vpop.f32.mrf.mxu0  ;;  %v1473_v47 = vadd.f32 %v1416_v5, %v5259_v46  ;;  %v1474_v32 = vadd.f32 %v1418_v61, %v1247_v49  ;;  %v5262_v5 = vld [vmem:[#allocation35_spill] sm:$0xff]  ;;  %v3735_v49 = vld [vmem:[%s5182_s3 + $0x114] ss:$8 sps:$4 sm:$0xff]  }
 0x1d4   : > { %v1768_v52 = vmax.f32 %v1756_v51, 0.0  ;;  %v1693_v26 = vadd.f32 %v1625_v0, %v1466_v9  ;;  %v3742_v46 = vld [vmem:[%s5182_s3 + $0x260] ss:$8 sps:$4 sm:$0xff]  }
 0x1d5   : > { %v1629_v63 = vpop.f32.mrf.mxu0 }
 0x1d6   : > { %v1723_v27 = vmax.f32 %v1692_v58, %v1693_v26  ;;  %v4799_v24 = vpack.c.bf16 %v1768_v52, %v1767_v53  ;;  %v1694_v45 = vadd.f32 %v1629_v63, %v1467_v4  ;;  %v5261_v58 = vld [vmem:[#allocation15_spill] sm:$0xff]  ;;  %v1476_v63 = vadd.f32 %v1424_v8, %v5262_v5  ;;  %v3733_v8 = vld [vmem:[%s5182_s3 + $0x110] ss:$8 sps:$4 sm:$0xff]  }
 0x1d7   : > { %v1631_v39 = vpop.f32.mrf.mxu0  ;;  %v3720_v4 = vld [vmem:[%s5182_s3 + $0x164] ss:$8 sps:$4 sm:$0xff]  }
 0x1d8   : > { %v1738_v36 = vmax.f32 %v1722_v37, %v1723_v27  ;;  %v1695_v18 = vadd.f32 %v1631_v39, %v1468_v29  ;;  %v1428_v27 = vpop.f32.mrf.mxu1  ;;  %v5263_v39 = vld [vmem:[#allocation37_spill] sm:$0xff]  ;;  %v3769_v5 = vld [vmem:[%s5184_s5 + $0x68] sm:$0xff]  }
 0x1d9   : > { %v1633_v34 = vpop.f32.mrf.mxu0 }
 0x1da   : > { %v1757_v50 = vadd.f32 %v4642_v6, %v1738_v36  ;;  %v1724_v7 = vmax.f32 %v1694_v45, %v1695_v18  ;;  %v1696_v23 = vadd.f32 %v1633_v34, %v1469_v43  ;;  %v5264_v34 = vld [vmem:[#allocation36_spill] sm:$0xff] }
 0x1db   : > { %v1635_v22 = vpop.f32.mrf.mxu0  ;;  %v1477_v42 = vadd.f32 %v1426_v57, %v5264_v34  ;;  %v3751_v57 = vld [vmem:[%s5182_s3 + $0x230] ss:$8 sps:$4 sm:$0xff]  }
 0x1dc   : > { %v1769_v54 = vmax.f32 %v1757_v50, 0.0  ;;  %v1697_v53 = vadd.f32 %v1635_v22, %v1470_v60 }
 0x1dd   : > { %v1639_v28 = vpop.f32.mrf.mxu0 }
 0x1de   : > { %v1725_v40 = vmax.f32 %v1696_v23, %v1697_v53  ;;  %v3429_v31 = vpack.c.bf16 %v1769_v54, %v1768_v52  ;;  %v1698_v14 = vadd.f32 %v1639_v28, %v1471_v35  ;;  %v5260_v52 = vld [vmem:[#allocation2_spill] sm:$0xff]  ;;  %v3721_v23 = vld [vmem:[%s5182_s3 + $0x150] ss:$8 sps:$4 sm:$0xff]   ;;  %v3729_v35 = vld [vmem:[%s5182_s3 + $0x134] ss:$8 sps:$4 sm:$0xff]  }
 0x1df   : > { %v1641_v21 = vpop.f32.mrf.mxu0  ;;  %v1023_v26 = vadd.f32 %v5261_v58, %v5260_v52  ;;  %v3724_v28 = vld [vmem:[%s5182_s3 + $0x140] ss:$8 sps:$4 sm:$0xff]   ;;  %v3762_v52 = vld [vmem:[%s5182_s3 + $0x204] ss:$8 sps:$4 sm:$0xff]  }
 0x1e0   : > { %v1739_v56 = vmax.f32 %v1724_v7, %v1725_v40  ;;  %v1699_v33 = vadd.f32 %v1641_v21, %v1472_v10  ;;  %1952 = vmatmul.mubr.bf16.gmra.mxu1 %v3429_v31  ;;  %2435 = vmatmul.mubr.bf16.gmra.mxu0 %v3429_v31  ;;  %v3723_v7 = vld [vmem:[%s5182_s3 + $0x154] ss:$8 sps:$4 sm:$0xff]   ;;  %v3727_v40 = vld [vmem:[%s5182_s3 + $0x130] ss:$8 sps:$4 sm:$0xff]   ;;  %v3732_v31 = vld [vmem:[%s5182_s3 + $0x124] ss:$8 sps:$4 sm:$0xff]  }
 0x1e1   : > { %v1643_v13 = vpop.f32.mrf.mxu0  ;;  %2084 = vmatprep.mubr.bf16.mxu1 %v5238_v20  ;;  %2444 = vmatprep.mubr.bf16.mxu0 %v5238_v20  ;;  %v1251_v41 = vadd.f32 %v5263_v39, %v1023_v26  ;;  %v3738_v21 = vld [vmem:[%s5182_s3 + $0x104] ss:$8 sps:$4 sm:$0xff]   ;;  %v3760_v58 = vld [vmem:[%s5182_s3 + $0x200] ss:$8 sps:$4 sm:$0xff]   ;;  %v3763_v26 = vld [vmem:[%s5184_s5 + $0x38] sm:$0xff]  }
 0x1e2   : > { %v1758_v11 = vadd.f32 %v4642_v6, %v1739_v56  ;;  %v1726_v25 = vmax.f32 %v1698_v14, %v1699_v33  ;;  %v1700_v37 = vadd.f32 %v1643_v13, %v1473_v47  ;;  %v3736_v56 = vld [vmem:[%s5182_s3 + $0x100] ss:$8 sps:$4 sm:$0xff]   ;;  %v3741_v14 = vld [vmem:[%s5182_s3 + $0x274] ss:$8 sps:$4 sm:$0xff]   ;;  %v3739_v33 = vld [vmem:[%s5182_s3 + $0x270] ss:$8 sps:$4 sm:$0xff]  }
 0x1e3   : > { %v1645_v9 = vpop.f32.mrf.mxu0  ;;  %v1478_v43 = vadd.f32 %v1428_v27, %v1251_v41  ;;  %v3744_v13 = vld [vmem:[%s5182_s3 + $0x264] ss:$8 sps:$4 sm:$0xff]   ;;  %v3747_v47 = vld [vmem:[%s5182_s3 + $0x254] ss:$8 sps:$4 sm:$0xff]  }
 0x1e4   : > { %v1770_v51 = vmax.f32 %v1758_v11, 0.0  ;;  %v1701_v0 = vadd.f32 %v1645_v9, %v1474_v32  ;;  %v3745_v32 = vld [vmem:[%s5182_s3 + $0x250] ss:$8 sps:$4 sm:$0xff]   ;;  %v3748_v11 = vld [vmem:[%s5182_s3 + $0x240] ss:$8 sps:$4 sm:$0xff]  }
 0x1e5   : > { %v1649_v55 = vpop.f32.mrf.mxu0  ;;  %v3756_v9 = vld [vmem:[%s5182_s3 + $0x224] ss:$8 sps:$4 sm:$0xff]   ;;  %v3775_v39 = vld [vmem:[%s5184_s5 + $0x50] sm:$0xff]  }
 0x1e6   : > { %v1727_v15 = vmax.f32 %v1700_v37, %v1701_v0  ;;  %v4825_v29 = vpack.c.bf16 %v1770_v51, %v1769_v54  ;;  %v1702_v36 = vadd.f32 %v1649_v55, %v1475_v2  ;;  %v3759_v37 = vld [vmem:[%s5182_s3 + $0x214] ss:$8 sps:$4 sm:$0xff]   ;;  %v3757_v0 = vld [vmem:[%s5182_s3 + $0x210] ss:$8 sps:$4 sm:$0xff]   ;;  %v3812_v55 = vmov 0.0   ;;  %v3768_v2 = vld [vmem:[%s5184_s5 + $0x20] sm:$0xff]  }
 0x1e7   : > { %v1651_v61 = vpop.f32.mrf.mxu0  ;;  %3478 = vmatprep.subr.bf16.mxu0 %v3812_v55  ;;  %v3774_v27 = vld [vmem:[%s5184_s5 + $0x8] sm:$0xff]   ;;  %v3776_v41 = vld [vmem:[%s5184_s5] sm:$0xff]  }
 0x1e8   : > { %v1740_v16 = vmax.f32 %v1726_v25, %v1727_v15  ;;  %v1703_v45 = vadd.f32 %v1651_v61, %v1476_v63  ;;  %2085 = vmatmul.mubr.bf16.vlgmr.msra.gmra.mxu1 %v4662_v1  ;;  %v3753_v25 = vld [vmem:[%s5182_s3 + $0x234] ss:$8 sps:$4 sm:$0xff]   ;;  %v3771_v15 = vld [vmem:[%s5184_s5 + $0x60] sm:$0xff]  }
 0x1e9   : > { %v1653_v18 = vpop.f32.mrf.mxu0  ;;  %2210 = vmatpush1.bf16.msra.mxu1 %v3715_v48  ;;  %2094 = vmatprep.mubr.bf16.mxu1 %v5238_v20  ;;  %v3767_v48 = vld [vmem:[%s5184_s5 + $0x70] sm:$0xff]   ;;  %v3770_v63 = vld [vmem:[%s5184_s5 + $0x18] sm:$0xff]  }
 0x1ea   : > { %v1759_v60 = vadd.f32 %v4642_v6, %v1740_v16  ;;  %v1728_v50 = vmax.f32 %v1702_v36, %v1703_v45  ;;  %2211 = vmatprep.subr.bf16.mxu1 %v3720_v4  ;;  %v1704_v22 = vadd.f32 %v1653_v18, %v1477_v42  ;;  %v3772_v4 = vld [vmem:[%s5184_s5 + $0x10] sm:$0xff]   ;;  %v3777_v36 = vld [vmem:[%s5184_s5 + $0x48] sm:$0xff]   ;;  %v3779_v18 = vld [vmem:[%s5184_s5 + $0x40] sm:$0xff]  }
 0x1eb   : > { %v1655_v1 = vpop.f32.mrf.mxu0 }
 0x1ec   : > { %v1771_v30 = vmax.f32 %v1759_v60, 0.0  ;;  %v1705_v54 = vadd.f32 %v1655_v1, %v1478_v43 }
 0x1ed   : > { %2212 = vmatpush1.bf16.msra.mxu1 %v3718_v62 }
 0x1ee   : > { %v1729_v53 = vmax.f32 %v1704_v22, %v1705_v54  ;;  %2213 = vmatprep.subr.bf16.mxu1 %v3723_v7  ;;  %v3435_v38 = vpack.c.bf16 %v1771_v30, %v1770_v51  ;;  %v3754_v51 = vld [vmem:[%s5182_s3 + $0x220] ss:$8 sps:$4 sm:$0xff]  }
 0x1f0   : > { %v1741_v3 = vmax.f32 %v1728_v50, %v1729_v53  ;;  %2095 = vmatmul.mubr.bf16.gmra.mxu1 %v4709_v12  ;;  %2445 = vmatmul.mubr.bf16.gmra.mxu0 %v3435_v38 }
 0x1f1   : > { %2214 = vmatpush1.bf16.msra.mxu1 %v3721_v23  ;;  %2104 = vmatprep.mubr.bf16.mxu1 %v5238_v20 }
 0x1f2   : > { %v1760_v17 = vadd.f32 %v4642_v6, %v1741_v3  ;;  %2215 = vmatprep.subr.bf16.mxu1 %v3726_v44  ;;  %v3730_v6 = vld [vmem:[%s5182_s3 + $0x120] ss:$8 sps:$4 sm:$0xff]   ;;  %3494 = vmatprep.mubr.msk.bf16.mxu0 %vm3813_vm1, %v3812_v55 }
 0x1f4   : > { %v1772_v10 = vmax.f32 %v1760_v17, 0.0 }
 0x1f5   : > { %2216 = vmatpush1.bf16.msra.mxu1 %v3724_v28 }
 0x1f6   : > { %2217 = vmatprep.subr.bf16.mxu1 %v3729_v35  ;;  %v3436_v19 = vpack.c.bf16 %v1772_v10, %v1771_v30 }
 0x1f8   : > { %2105 = vmatmul.mubr.bf16.gmra.mxu1 %v4762_v59 }
 0x1f9   : > { %2218 = vmatpush1.bf16.msra.mxu1 %v3727_v40  ;;  %2114 = vmatprep.mubr.bf16.mxu1 %v5238_v20 }
 0x1fa   : > { %2219 = vmatprep.subr.bf16.mxu1 %v3732_v31 }
 0x1fd   : > { %2220 = vmatpush1.bf16.msra.mxu1 %v3730_v6 }
 0x1fe   : > { %2221 = vmatprep.subr.bf16.mxu1 %v3735_v49 }
 0x200   : > { %2115 = vmatmul.mubr.bf16.gmra.mxu1 %v4799_v24 }
 0x201   : > { %2222 = vmatpush1.bf16.msra.mxu1 %v3733_v8  ;;  %2241 = vmatprep.mubr.bf16.mxu1 %v5238_v20 }
 0x202   : > { %2223 = vmatprep.subr.bf16.mxu1 %v3738_v21 }
 0x205   : > { %2224 = vmatpush1.bf16.msra.mxu1 %v3736_v56 }
 0x206   : > { %2555 = vmatprep.subr.bf16.mxu1 %v3741_v14 }
 0x208   : > { %2242 = vmatmul.mubr.bf16.vlgmr.msra.gmra.mxu1 %v4709_v12  ;;  %v3750_v12 = vld [vmem:[%s5182_s3 + $0x244] ss:$8 sps:$4 sm:$0xff]  }
 0x209   : > { %2556 = vmatpush1.bf16.msra.mxu1 %v3739_v33  ;;  %2251 = vmatprep.mubr.bf16.mxu1 %v5238_v20 }
 0x20a   : > { %2557 = vmatprep.subr.bf16.mxu1 %v3744_v13 }
 0x20d   : > { %2558 = vmatpush1.bf16.msra.mxu1 %v3742_v46 }
 0x20e   : > { %2559 = vmatprep.subr.bf16.mxu1 %v3747_v47 }
 0x210   : > { %2252 = vmatmul.mubr.bf16.gmra.mxu1 %v4762_v59 }
 0x211   : > { %2560 = vmatpush1.bf16.msra.mxu1 %v3745_v32  ;;  %2261 = vmatprep.mubr.bf16.mxu1 %v5238_v20 }
 0x212   : > { %2561 = vmatprep.subr.bf16.mxu1 %v3750_v12 }
 0x215   : > { %2562 = vmatpush1.bf16.msra.mxu1 %v3748_v11 }
 0x216   : > { %2563 = vmatprep.subr.bf16.mxu1 %v3753_v25 }
 0x218   : > { %2262 = vmatmul.mubr.bf16.gmra.mxu1 %v4799_v24 }
 0x219   : > { %2564 = vmatpush1.bf16.msra.mxu1 %v3751_v57  ;;  %2271 = vmatprep.mubr.bf16.mxu1 %v5238_v20 }
 0x21a   : > { %2565 = vmatprep.subr.bf16.mxu1 %v3756_v9 }
 0x21d   : > { %2566 = vmatpush1.bf16.msra.mxu1 %v3754_v51 }
 0x21e   : > { %2567 = vmatprep.subr.bf16.mxu1 %v3759_v37 }
 0x220   : > { %2272 = vmatmul.mubr.bf16.gmra.mxu1 %v4825_v29 }
 0x221   : > { %2568 = vmatpush1.bf16.msra.mxu1 %v3757_v0  ;;  %2587 = vmatprep.mubr.bf16.mxu1 %v5238_v20 }
 0x222   : > { %2569 = vmatprep.subr.bf16.mxu1 %v3762_v52 }
 0x225   : > { %2570 = vmatpush1.bf16.msra.mxu1 %v3760_v58 }
 0x226   : > { %3498 = vmatprep.subr.bf16.mxu1 %v3812_v55 }
 0x228   : > { %2588 = vmatmul.mubr.bf16.vlgmr.msra.gmra.mxu1 %v4762_v59  ;;  %v3764_v59 = vld [vmem:[%s5184_s5 + $0x30] sm:$0xff]  }
 0x229   : > { %2597 = vmatprep.mubr.bf16.mxu1 %v5238_v20  ;;  %3499 = vmatpush3.bf16.msra.mxu1 %v3763_v26 }
 0x22a   : > { %3500 = vmatprep.subr.bf16.mxu1 %v3812_v55 }
 0x22d   : > { %3501 = vmatpush3.bf16.msra.mxu1 %v3764_v59 }
 0x22e   : > { %3502 = vmatprep.subr.bf16.mxu1 %v3812_v55 }
 0x230   : > { %2598 = vmatmul.mubr.bf16.gmra.mxu1 %v4799_v24  ;;  %v3766_v24 = vld [vmem:[%s5184_s5 + $0x28] sm:$0xff]  }
 0x231   : > { %2607 = vmatprep.mubr.bf16.mxu1 %v5238_v20  ;;  %3503 = vmatpush3.bf16.msra.mxu1 %v3766_v24 }
 0x232   : > { %3504 = vmatprep.subr.bf16.mxu1 %v3812_v55 }
 0x235   : > { %3505 = vmatpush3.bf16.msra.mxu1 %v3768_v2 }
 0x236   : > { %3506 = vmatprep.subr.bf16.mxu1 %v3812_v55 }
 0x238   : > { %2608 = vmatmul.mubr.bf16.gmra.mxu1 %v4825_v29  ;;  %v3773_v29 = vld [vmem:[%s5184_s5 + $0x58] sm:$0xff]  }
 0x239   : > { %2617 = vmatprep.mubr.bf16.mxu1 %v5238_v20  ;;  %v3765_v20 = vld [vmem:[%s5184_s5 + $0x78] sm:$0xff]   ;;  %3507 = vmatpush3.bf16.msra.mxu1 %v3770_v63 }
 0x23a   : > { %3479 = vmatpush3.bf16.msra.mxu0 %v3765_v20  ;;  %3508 = vmatprep.subr.bf16.mxu1 %v3812_v55 }
 0x23b   : > { %3480 = vmatprep.subr.bf16.mxu0 %v3812_v55 }
 0x23d   : > { %3509 = vmatpush3.bf16.msra.mxu1 %v3772_v4 }
 0x23e   : > { %3481 = vmatpush3.bf16.msra.mxu0 %v3767_v48  ;;  %3510 = vmatprep.subr.bf16.mxu1 %v3812_v55 }
 0x23f   : > { %3482 = vmatprep.subr.bf16.mxu0 %v3812_v55 }
 0x240   : > { %2618 = vmatmul.mubr.bf16.gmra.mxu1 %v3436_v19 }
 0x241   : > { %3511 = vmatpush3.bf16.msra.mxu1 %v3774_v27  ;;  %3514 = vmatprep.mubr.msk.bf16.mxu1 %vm3813_vm1, %v3812_v55 }
 0x242   : > { %3483 = vmatpush3.bf16.msra.mxu0 %v3769_v5  ;;  %3512 = vmatprep.subr.bf16.mxu1 %v3812_v55 }
 0x243   : > { %3484 = vmatprep.subr.bf16.mxu0 %v3812_v55 }
 0x245   : > { %3513 = vmatpush3.bf16.msra.mxu1 %v3776_v41 }
 0x246   : > { %3485 = vmatpush3.bf16.msra.mxu0 %v3771_v15  ;;  %3538 = vmatprep.subr.bf16.mxu1 %v3812_v55 }
 0x247   : > { %3486 = vmatprep.subr.bf16.mxu0 %v3812_v55 }
 0x24a   : > { %3487 = vmatpush3.bf16.msra.mxu0 %v3773_v29 }
 0x24b   : > { %3488 = vmatprep.subr.bf16.mxu0 %v3812_v55 }
 0x24e   : > { %3489 = vmatpush3.bf16.msra.mxu0 %v3775_v39 }
 0x24f   : > { %3490 = vmatprep.subr.bf16.mxu0 %v3812_v55 }
 0x252   : > { %3491 = vmatpush3.bf16.msra.mxu0 %v3777_v36 }
 0x253   : > { %3492 = vmatprep.subr.bf16.mxu0 %v3812_v55 }
 0x256   : > { %3493 = vmatpush3.bf16.msra.mxu0 %v3779_v18 }
 0x257   : > { %3518 = vmatprep.subr.bf16.mxu0 %v3812_v55 }
 0x270   : > { %v1923_v61 = vpop.f32.mrf.mxu1 }
 0x272   : > { %v4998_v16 = vpop.f32.mrf.mxu1 }
 0x274   : > { %v5008_v45 = vpop.f32.mrf.mxu1 }
 0x276   : > { %v5014_v62 = vpop.f32.mrf.mxu1 }
 0x280   : > { %v1933_v34 = vpop.f32.mrf.mxu1  ;;  %v2416_v52 = vpop.f32.mrf.mxu0 }
 0x282   : > { %v5016_v42 = vpop.f32.mrf.mxu1  ;;  %v2418_v59 = vpop.f32.mrf.mxu0 }
 0x284   : > { %v5018_v43 = vpop.f32.mrf.mxu1  ;;  %v2420_v48 = vpop.f32.mrf.mxu0 }
 0x286   : > { %v5020_v60 = vpop.f32.mrf.mxu1  ;;  %v2422_v63 = vpop.f32.mrf.mxu0 }
 0x290   : > { %v1943_v50 = vpop.f32.mrf.mxu1  ;;  %v2426_v4 = vpop.f32.mrf.mxu0 }
 0x292   : > { %v1945_v7 = vpop.f32.mrf.mxu1 }
 0x294   : > { %v1947_v1 = vpop.f32.mrf.mxu1 }
 0x296   : > { %v1949_v30 = vpop.f32.mrf.mxu1 }
 0x2a0   : > { %v1953_v22 = vpop.f32.mrf.mxu1 }
 0x2a2   : > { %v1955_v54 = vpop.f32.mrf.mxu1 }
 0x2a4   : > { %v1957_v23 = vpop.f32.mrf.mxu1 }
 0x2a6   : > { %v1959_v53 = vpop.f32.mrf.mxu1 }
 0x2a8   : > { %v2086_v38 = vpop.f32.mrf.mxu1 }
 0x2a9   : > { %v2087_v44 = vadd.f32 %v2086_v38, %v1923_v61  ;;  %v2428_v61 = vpop.f32.mrf.mxu0 }
 0x2aa   : > { %v2088_v3 = vpop.f32.mrf.mxu1 }
 0x2ab   : > { %v2089_v36 = vadd.f32 %v2088_v3, %v4998_v16  ;;  %v2430_v18 = vpop.f32.mrf.mxu0 }
 0x2ac   : > { %v2090_v28 = vpop.f32.mrf.mxu1 }
 0x2ae   : > { %v2092_v17 = vpop.f32.mrf.mxu1 }
 0x2b0   : > { %v2096_v35 = vpop.f32.mrf.mxu1 }
 0x2b1   : > { %v2097_v10 = vadd.f32 %v2096_v35, %v1933_v34 }
 0x2b2   : > { %v2098_v40 = vpop.f32.mrf.mxu1 }
 0x2b3   : > { %v2099_v16 = vadd.f32 %v2098_v40, %v5016_v42 }
 0x2b4   : > { %v5022_v31 = vpop.f32.mrf.mxu1 }
 0x2b6   : > { %v5024_v19 = vpop.f32.mrf.mxu1 }
 0x2b8   : > { %v2106_v6 = vpop.f32.mrf.mxu1 }
 0x2b9   : > { %v5026_v49 = vadd.f32 %v2106_v6, %v1943_v50 }
 0x2ba   : > { %v2108_v8 = vpop.f32.mrf.mxu1 }
 0x2bb   : > { %v5028_v21 = vadd.f32 %v2108_v8, %v1945_v7 }
 0x2bc   : > { %v2110_v56 = vpop.f32.mrf.mxu1 }
 0x2bd   : > { %v5030_v14 = vadd.f32 %v2110_v56, %v1947_v1  ;;  %v2091_v1 = vadd.f32 %v2090_v28, %v5008_v45 }
 0x2be   : > { %v2112_v33 = vpop.f32.mrf.mxu1 }
 0x2bf   : > { %v5032_v13 = vadd.f32 %v2112_v33, %v1949_v30 }
 0x2c0   : > { %v2116_v46 = vpop.f32.mrf.mxu1 }
 0x2c1   : > { %v5034_v47 = vadd.f32 %v2116_v46, %v1953_v22  ;;  %v2093_v22 = vadd.f32 %v2092_v17, %v5014_v62  ;;  %v2101_v62 = vadd.f32 %v5022_v31, %v5018_v43 }
 0x2c2   : > { %v2118_v32 = vpop.f32.mrf.mxu1 }
 0x2c3   : > { %v5036_v12 = vadd.f32 %v2118_v32, %v1955_v54  ;;  %v2432_v54 = vpop.f32.mrf.mxu0 }
 0x2c4   : > { %v2120_v11 = vpop.f32.mrf.mxu1 }
 0x2c5   : > { %v5038_v25 = vadd.f32 %v2120_v11, %v1957_v23  ;;  %v2436_v8 = vpop.f32.mrf.mxu0 }
 0x2c6   : > { %v2122_v57 = vpop.f32.mrf.mxu1 }
 0x2c7   : > { %v5040_v9 = vadd.f32 %v2122_v57, %v1959_v53  ;;  %v2438_v57 = vpop.f32.mrf.mxu0 }
 0x2c8   : > { %v2243_v51 = vpop.f32.mrf.mxu1 }
 0x2c9   : > { %v2282_v50 = vadd.f32 %v2243_v51, %v2087_v44  ;;  %v2103_v51 = vadd.f32 %v5024_v19, %v5020_v60 }
 0x2ca   : > { %v2245_v37 = vpop.f32.mrf.mxu1 }
 0x2cb   : > { %v2283_v7 = vadd.f32 %v2245_v37, %v2089_v36  ;;  %v2455_v35 = vadd.f32 %v2416_v52, %v2282_v50 }
 0x2cc   : > { %v2247_v0 = vpop.f32.mrf.mxu1 }
 0x2cd   : > { %v2284_v23 = vadd.f32 %v2247_v0, %v2091_v1  ;;  %v2456_v6 = vadd.f32 %v2418_v59, %v2283_v7 }
 0x2ce   : > { %v2249_v58 = vpop.f32.mrf.mxu1 }
 0x2cf   : > { %v2285_v38 = vadd.f32 %v2249_v58, %v2093_v22  ;;  %v2457_v44 = vadd.f32 %v2420_v48, %v2284_v23 }
 0x2d0   : > { %v2253_v26 = vpop.f32.mrf.mxu1 }
 0x2d1   : > { %v2286_v32 = vadd.f32 %v2253_v26, %v2097_v10  ;;  %v2458_v11 = vadd.f32 %v2422_v63, %v2285_v38  ;;  %v2440_v10 = vpop.f32.mrf.mxu0  ;;  %v5063_v26 = vld [vmem:[%s5183_s4] ss:$0 sm:$0xff] }
 0x2d2   : > { %v2255_v20 = vpop.f32.mrf.mxu1 }
 0x2d3   : > { %v2287_v45 = vadd.f32 %v2255_v20, %v2099_v16  ;;  %v2459_v59 = vadd.f32 %v2426_v4, %v2286_v32  ;;  %v2442_v50 = vpop.f32.mrf.mxu0 }
 0x2d4   : > { %v2257_v24 = vpop.f32.mrf.mxu1 }
 0x2d5   : > { %v2288_v52 = vadd.f32 %v2257_v24, %v2101_v62  ;;  %v2460_v48 = vadd.f32 %v2428_v61, %v2287_v45 }
 0x2d6   : > { %v2259_v2 = vpop.f32.mrf.mxu1 }
 0x2d7   : > { %v2289_v40 = vadd.f32 %v2259_v2, %v2103_v51  ;;  %v2461_v19 = vadd.f32 %v2430_v18, %v2288_v52 }
 0x2d8   : > { %v2263_v5 = vpop.f32.mrf.mxu1 }
 0x2d9   : > { %v2290_v60 = vadd.f32 %v2263_v5, %v5026_v49  ;;  %v2462_v61 = vadd.f32 %v2432_v54, %v2289_v40  ;;  %v3778_v49 = vld [vmem:[%s5184_s5 + $0xf8] sm:$0xff]  }
 0x2da   : > { %v2265_v15 = vpop.f32.mrf.mxu1 }
 0x2db   : > { %v2291_v24 = vadd.f32 %v2265_v15, %v5028_v21 }
 0x2dc   : > { %v2267_v29 = vpop.f32.mrf.mxu1 }
 0x2dd   : > { %v2292_v38 = vadd.f32 %v2267_v29, %v5030_v14  ;;  %v2464_v18 = vadd.f32 %v2438_v57, %v2291_v24 }
 0x2de   : > { %v5042_v27 = vpop.f32.mrf.mxu1 }
 0x2df   : > { %v2293_v21 = vadd.f32 %v5042_v27, %v5032_v13  ;;  %v2465_v29 = vadd.f32 %v2440_v10, %v2292_v38 }
 0x2e0   : > { %v5044_v39 = vpop.f32.mrf.mxu1 }
 0x2e1   : > { %v2294_v14 = vadd.f32 %v5044_v39, %v5034_v47  ;;  %v2466_v32 = vadd.f32 %v2442_v50, %v2293_v21  ;;  %v3790_v50 = vld [vmem:[%s5184_s5 + $0xc8] sm:$0xff]  }
 0x2e2   : > { %v5046_v41 = vpop.f32.mrf.mxu1 }
 0x2e3   : > { %v2295_v13 = vadd.f32 %v5046_v41, %v5036_v12  ;;  %v3781_v12 = vld [vmem:[%s5184_s5 + $0xb8] sm:$0xff]   ;;  %v3782_v41 = vld [vmem:[%s5184_s5 + $0xe8] sm:$0xff]  }
 0x2e4   : > { %v5049_v34 = vpop.f32.mrf.mxu1 }
 0x2e5   : > { %v2296_v57 = vadd.f32 %v5049_v34, %v5038_v25 }
 0x2e6   : > { %v5052_v30 = vpop.f32.mrf.mxu1 }
 0x2e7   : > { %v2297_v51 = vadd.f32 %v5052_v30, %v5040_v9  ;;  %v3784_v9 = vld [vmem:[%s5184_s5 + $0xe0] sm:$0xff]  }
 0x2e8   : > { %v2589_v53 = vpop.f32.mrf.mxu1 }
 0x2e9   : > { %v2628_v3 = vadd.f32 %v2589_v53, %v2455_v35  ;;  %v2446_v53 = vpop.f32.mrf.mxu0  ;;  %v2463_v35 = vadd.f32 %v2436_v8, %v2290_v60  ;;  %v3785_v60 = vld [vmem:[%s5184_s5 + $0xa8] sm:$0xff]  }
 0x2ea   : > { %v2591_v56 = vpop.f32.mrf.mxu1  ;;  %v2467_v62 = vadd.f32 %v2446_v53, %v2294_v14  ;;  %v3793_v53 = vld [vmem:[%s5184_s5 + $0x88] sm:$0xff]  }
 0x2eb   : > { %v2629_v33 = vadd.f32 %v2591_v56, %v2456_v6 }
 0x2ec   : > { %v2593_v46 = vpop.f32.mrf.mxu1 }
 0x2ed   : > { %v2644_v28 = vmax.f32 %v2628_v3, %v2629_v33  ;;  %v2630_v37 = vadd.f32 %v2593_v46, %v2457_v44  ;;  %v2448_v33 = vpop.f32.mrf.mxu0  ;;  %v3780_v44 = vld [vmem:[%s5184_s5 + $0xf0] sm:$0xff]  }
 0x2ee   : > { %v2595_v17 = vpop.f32.mrf.mxu1  ;;  %v2468_v52 = vadd.f32 %v2448_v33, %v2295_v13 }
 0x2ef   : > { %v2631_v0 = vadd.f32 %v2595_v17, %v2458_v11  ;;  %v2450_v11 = vpop.f32.mrf.mxu0 }
 0x2f0   : > { %v2599_v42 = vpop.f32.mrf.mxu1  ;;  %v2469_v10 = vadd.f32 %v2450_v11, %v2296_v57 }
 0x2f1   : > { %v2645_v58 = vmax.f32 %v2630_v37, %v2631_v0  ;;  %v2632_v31 = vadd.f32 %v2599_v42, %v2459_v59 }
 0x2f2   : > { %v2601_v20 = vpop.f32.mrf.mxu1 }
 0x2f3   : > { %v2652_v43 = vmax.f32 %v2644_v28, %v2645_v58  ;;  %v2633_v63 = vadd.f32 %v2601_v20, %v2460_v48  ;;  %v2452_v58 = vpop.f32.mrf.mxu0  ;;  %v3783_v48 = vld [vmem:[%s5184_s5 + $0xb0] sm:$0xff]  }
 0x2f4   : > { %v2603_v36 = vpop.f32.mrf.mxu1  ;;  %v2470_v20 = vadd.f32 %v2452_v58, %v2297_v51 }
 0x2f5   : > { %v2663_v2 = vadd.f32 %v5063_v26, %v2652_v43  ;;  %v2646_v4 = vmax.f32 %v2632_v31, %v2633_v63  ;;  %v2634_v22 = vadd.f32 %v2603_v36, %v2461_v19  ;;  %v3786_v19 = vld [vmem:[%s5184_s5 + $0xd8] sm:$0xff]  }
 0x2f6   : > { %v2605_v7 = vpop.f32.mrf.mxu1 }
 0x2f7   : > { %v2667_v1 = vmax.f32 %v2663_v2, 0.0  ;;  %v2635_v23 = vadd.f32 %v2605_v7, %v2462_v61  ;;  %v3787_v2 = vld [vmem:[%s5184_s5 + $0xa0] sm:$0xff]   ;;  %v3789_v61 = vld [vmem:[%s5184_s5 + $0x98] sm:$0xff]  }
 0x2f8   : > { %v2609_v6 = vpop.f32.mrf.mxu1 }
 0x2f9   : > { %v2671_v5 = vpack.c.bf16 %v2667_v1, %v2667_v1  ;;  %v2647_v15 = vmax.f32 %v2634_v22, %v2635_v23  ;;  %v2636_v16 = vadd.f32 %v2609_v6, %v2463_v35  ;;  %v3791_v1 = vld [vmem:[%s5184_s5 + $0x90] sm:$0xff]   ;;  %v3792_v22 = vld [vmem:[%s5184_s5 + $0xc0] sm:$0xff]  }
 0x2fa   : > { %v2611_v54 = vpop.f32.mrf.mxu1  ;;  %v3794_v6 = vld [vmem:[%s5184_s5 + $0x80] sm:$0xff]  }
 0x2fb   : > { %v2653_v56 = vmax.f32 %v2646_v4, %v2647_v15  ;;  %v2637_v3 = vadd.f32 %v2611_v54, %v2464_v18  ;;  %3515 = vmatmul.mubr.bf16.vlgmr.msra.gmra.mxu1 %v2671_v5  ;;  %v3788_v4 = vld [vmem:[%s5184_s5 + $0xd0] sm:$0xff]   ;;  %v3797_v15 = vld [vmem:[%s5186_s7 + $0x8] sm:$0xff]   ;;  %v3798_v18 = vld [vmem:[%s5186_s7] sm:$0xff]  }
 0x2fc   : > { %3539 = vmatpush3.bf16.msra.mxu1 %v3778_v49  ;;  %v2613_v8 = vpop.f32.mrf.mxu1  ;;  %3554 = vmatprep.mubr.msk.bf16.mxu1 %vm3813_vm1, %v3812_v55  ;;  %v3796_v5 = vld [vmem:[%s5186_s7 + $0x10] sm:$0xff]  }
 0x2fd   : > { %v2664_v27 = vadd.f32 %v5063_v26, %v2653_v56  ;;  %v2648_v46 = vmax.f32 %v2636_v16, %v2637_v3  ;;  %3540 = vmatprep.subr.bf16.mxu1 %v3812_v55  ;;  %v2638_v45 = vadd.f32 %v2613_v8, %v2465_v29 }
 0x2fe   : > { %v2615_v47 = vpop.f32.mrf.mxu1 }
 0x2ff   : > { %v2668_v39 = vmax.f32 %v2664_v27, 0.0  ;;  %v2639_v28 = vadd.f32 %v2615_v47, %v2466_v32 }
 0x300   : > { %3541 = vmatpush3.bf16.msra.mxu1 %v3780_v44  ;;  %v2619_v17 = vpop.f32.mrf.mxu1 }
 0x301   : > { %v2672_v37 = vpack.c.bf16 %v2668_v39, %v2668_v39  ;;  %v2649_v0 = vmax.f32 %v2638_v45, %v2639_v28  ;;  %3542 = vmatprep.subr.bf16.mxu1 %v3812_v55  ;;  %v2640_v42 = vadd.f32 %v2619_v17, %v2467_v62  ;;  %v3417_v39 = vld [vmem:[%s5185_s6] ss:$0 sm:$0xff] }
 0x302   : > { %v2621_v25 = vpop.f32.mrf.mxu1 }
 0x303   : > { %v2654_v34 = vmax.f32 %v2648_v46, %v2649_v0  ;;  %v2641_v40 = vadd.f32 %v2621_v25, %v2468_v52  ;;  %3495 = vmatmul.mubr.bf16.vlgmr.msra.gmra.mxu0 %v2672_v37 }
 0x304   : > { %3519 = vmatpush3.bf16.msra.mxu0 %v3781_v12  ;;  %3543 = vmatpush3.bf16.msra.mxu1 %v3782_v41  ;;  %v2623_v59 = vpop.f32.mrf.mxu1  ;;  %v3418_v41 = vld [vmem:[%s5187_s8] ss:$0 sm:$0xff] }
 0x305   : > { %v2650_v30 = vmax.f32 %v2640_v42, %v2641_v40  ;;  %3520 = vmatprep.subr.bf16.mxu0 %v3812_v55  ;;  %3544 = vmatprep.subr.bf16.mxu1 %v3812_v55  ;;  %v2642_v31 = vadd.f32 %v2623_v59, %v2469_v10  ;;  %v2665_v38 = vadd.f32 %v5063_v26, %v2654_v34 }
 0x306   : > { %v2625_v43 = vpop.f32.mrf.mxu1  ;;  %3534 = vmatprep.mubr.msk.bf16.mxu0 %vm3813_vm1, %v3812_v55 }
 0x307   : > { %v2643_v63 = vadd.f32 %v2625_v43, %v2470_v20  ;;  %v2669_v49 = vmax.f32 %v2665_v38, 0.0 }
 0x308   : > { %3521 = vmatpush3.bf16.msra.mxu0 %v3783_v48  ;;  %3545 = vmatpush3.bf16.msra.mxu1 %v3784_v9 }
 0x309   : > { %v2651_v36 = vmax.f32 %v2642_v31, %v2643_v63  ;;  %3522 = vmatprep.subr.bf16.mxu0 %v3812_v55  ;;  %3546 = vmatprep.subr.bf16.mxu1 %v3812_v55  ;;  %v2673_v21 = vpack.c.bf16 %v2669_v49, %v2669_v49 }
 0x30b   : > { %v2655_v24 = vmax.f32 %v2650_v30, %v2651_v36 }
 0x30c   : > { %3523 = vmatpush3.bf16.msra.mxu0 %v3785_v60  ;;  %3547 = vmatpush3.bf16.msra.mxu1 %v3786_v19 }
 0x30d   : > { %3524 = vmatprep.subr.bf16.mxu0 %v3812_v55  ;;  %3548 = vmatprep.subr.bf16.mxu1 %v3812_v55  ;;  %v2666_v7 = vadd.f32 %v5063_v26, %v2655_v24  ;;  %v3795_v26 = vld [vmem:[%s5186_s7 + $0x18] sm:$0xff]  }
 0x30f   : > { %v2670_v23 = vmax.f32 %v2666_v7, 0.0 }
 0x310   : > { %3525 = vmatpush3.bf16.msra.mxu0 %v3787_v2  ;;  %3549 = vmatpush3.bf16.msra.mxu1 %v3788_v4 }
 0x311   : > { %3526 = vmatprep.subr.bf16.mxu0 %v3812_v55  ;;  %3550 = vmatprep.subr.bf16.mxu1 %v3812_v55  ;;  %v2674_v35 = vpack.c.bf16 %v2670_v23, %v2670_v23 }
 0x314   : > { %3527 = vmatpush3.bf16.msra.mxu0 %v3789_v61  ;;  %3551 = vmatpush3.bf16.msra.mxu1 %v3790_v50 }
 0x315   : > { %3528 = vmatprep.subr.bf16.mxu0 %v3812_v55  ;;  %3552 = vmatprep.subr.bf16.mxu1 %v3812_v55 }
 0x318   : > { %3529 = vmatpush3.bf16.msra.mxu0 %v3791_v1  ;;  %3553 = vmatpush3.bf16.msra.mxu1 %v3792_v22 }
 0x319   : > { %3530 = vmatprep.subr.bf16.mxu0 %v3812_v55 }
 0x31b   : > { %3555 = vmatmul.mubr.bf16.vlgmr.msra.gmra.mxu1 %v2674_v35 }
 0x31c   : > { %3531 = vmatpush3.bf16.msra.mxu0 %v3793_v53 }
 0x31d   : > { %3532 = vmatprep.subr.bf16.mxu0 %v3812_v55 }
 0x320   : > { %3533 = vmatpush3.bf16.msra.mxu0 %v3794_v6 }
 0x321   : > { %3558 = vmatprep.subr.bf16.mxu0 %v3812_v55 }
 0x323   : > { %3535 = vmatmul.mubr.bf16.vlgmr.msra.gmra.mxu0 %v2673_v21 }
 0x324   : > { %3566 = vmatprep.mubr.msk.bf16.mxu0 %vm3813_vm1, %v3812_v55  ;;  %3559 = vmatpush3.bf16.msra.mxu0 %v3795_v26 }
 0x325   : > { %3560 = vmatprep.subr.bf16.mxu0 %v3812_v55 }
 0x328   : > { %3561 = vmatpush3.bf16.msra.mxu0 %v3796_v5 }
 0x329   : > { %3562 = vmatprep.subr.bf16.mxu0 %v3812_v55 }
 0x32c   : > { %3563 = vmatpush3.bf16.msra.mxu0 %v3797_v15 }
 0x32d   : > { %3564 = vmatprep.subr.bf16.mxu0 %v3812_v55 }
 0x330   : > { %3565 = vmatpush3.bf16.msra.mxu0 %v3798_v18 }
 0x3bb   : > { %v2845_v54 = vpop.f32.mrf.mxu1 }
 0x3bd   : > { %v3516_v56 = vpop.f32.mrf.mxu1 }
 0x3bf   : > { %v2848_v16 = vpop.f32.mrf.mxu1 }
 0x3c1   : > { %v3517_v3 = vpop.f32.mrf.mxu1 }
 0x3c3   : > { %v2757_v33 = vpop.f32.mrf.mxu0 }
 0x3c4   : > { %v2846_v32 = vadd.f32 %v2845_v54, %v2757_v33 }
 0x3c5   : > { %v3496_v14 = vpop.f32.mrf.mxu0 }
 0x3c7   : > { %v2760_v29 = vpop.f32.mrf.mxu0 }
 0x3c9   : > { %v3497_v8 = vpop.f32.mrf.mxu0 }
 0x3db   : > { %v3022_v44 = vpop.f32.mrf.mxu1 }
 0x3dd   : > { %v3556_v13 = vpop.f32.mrf.mxu1 }
 0x3df   : > { %v3025_v27 = vpop.f32.mrf.mxu1 }
 0x3e1   : > { %v3557_v46 = vpop.f32.mrf.mxu1 }
 0x3e3   : > { %v2933_v47 = vpop.f32.mrf.mxu0 }
 0x3e4   : > { %v2939_v55 = vadd.f32 %v2933_v47, %v2846_v32 }
 0x3e5   : > { %v3536_v45 = vpop.f32.mrf.mxu0 }
 0x3e6   : > { %v3028_v28 = vadd.f32 %v3022_v44, %v2939_v55 }
 0x3e7   : > { %v2936_v11 = vpop.f32.mrf.mxu0 }
 0x3e8   : > { %v3036_v57 = vadd.f32 %v3417_v39, %v3028_v28 }
 0x3e9   : > { %v3537_v62 = vpop.f32.mrf.mxu0 }
 0x3ea   : > { %v3037_v17 = vmax.f32 %v3036_v57, 0.0 }
 0x3ec   : > { %v3038_v12 = vpack.c.bf16 %v3037_v17, %v3037_v17 }
 0x3ee   : > { %3567 = vmatmul.mubr.msk.bf16.vlgmr.msra.gmra.mxu0 %vm3070_vm2, %v3038_v12 }
 0x4ae   : > { %v3108_v51 = vpop.f32.mrf.mxu0 }
 0x4af   : > { %v3109_v37 = vadd.f32 %v3418_v41, %v3108_v51 }
 0x4b0   : > { %v3568_v0 = vpop.f32.mrf.mxu0 }
 0x4b1   : > { %3114 = vmax.xlane.f32.xlu0 %v3109_v37 }
 0x4b2   : > { %v3111_v52 = vpop.f32.mrf.mxu0 }
 0x4b4   : > { %v3569_v25 = vpop.f32.mrf.mxu0 }
 0x53a   : > { %v3115_v34 = vpop.xlane.xlu0 %3114 }
 0x53b   : > { %v3116_v42 = vsub.f32 %v3109_v37, %v3115_v34 }
 0x53d   : > { %v3117_v40 = vmul.f32 1.442695, %v3116_v42 }
 0x53f   : > { %3799 = vpow2.f32 %v3117_v40 }
 0x54c   : > { %v3800_v58 = vpop.eup %3799 }
 0x54d   : > { %3119 = vadd.xlane.f32.xlu0 %v3800_v58 }
 0x5d6   : > { %v3120_v59 = vpop.xlane.xlu0 %3119 }
 0x5d7   : > { %3801 = vlog2.f32 %v3120_v59 }
 0x5e4   : > { %v3802_v48 = vpop.eup %3801 }
 0x5e5   : > { %v3122_v9 = vmul.f32 0.6931472, %v3802_v48 }
 0x5e7   : > { %v3123_v30 = vsub.f32 %v3116_v42, %v3122_v9 }
 0x5e9   : > { %3124 = vst [vmem:[%s330_s15] sm:$0xff] %v3123_v30 }
 0x5ea PF: > { %s19_s30 = sadd.s32 1, %s3809_s30  }
 0x5eb   : > { %p16_p4 = scmp.ge.s32.totalorder %s19_s30, 4  }
 0x5ed   :  { %18 = sbr.rel (!%p16_p4) target bundleno = 1 (0x1), region = 86 }

</bundles_post_ra>
